<compile_context>
chip_gen: v6e
topology: v6e:2x2x1
jax: 0.10.0
libtpu: 0.0.40
codegen_flags: <defaults>
</compile_context>

<pallas_src>
import functools

import jax
import jax.numpy as jnp
from jax import lax
from jax.experimental import pallas as pl
from jax.experimental.pallas import tpu as pltpu

EPS = 1e-5


# --------------------------------------------------------------------------- #
# Fused Pallas kernel (one image per grid step)
# --------------------------------------------------------------------------- #
def _fused_kernel(x_ref, mask_ref, w1_ref, g1_ref, b1_ref, s1_ref, t1_ref,
                  w2_ref, s2_ref, t2_ref, w3_ref, s3_ref, t3_ref,
                  o_ref, a1_ref, acc_ref,
                  *, half, stride, Hg, Wg, Ho, inv_hw):
    s = stride
    Lq = acc_ref.shape[0]                                   # = Ho * Wg

    # ---- stage 1: 1x1 conv (bf16 MXU, f32 acc) + IBN/BN (f32) + ReLU ------------
    y = jnp.dot(x_ref[...], w1_ref[...],
                preferred_element_type=jnp.float32)         # (Pd, Cmid) f32
    Cmid = y.shape[-1]

    if half > 0:
        # Instance-norm statistics over the real H*W pixels of this sample.
        # Padding rows of x are exactly zero, so they contribute 0 to both sums;
        # dividing by the true pixel count (inv_hw) gives exact statistics.
        ssum = jnp.sum(y, axis=0, keepdims=True)            # (1, Cmid)
        ssq = jnp.sum(y * y, axis=0, keepdims=True)
        mu = ssum * inv_hw
        var = ssq * inv_hw - mu * mu                        # biased variance
        inst_scale = g1_ref[...] * lax.rsqrt(var + EPS)
        inst_shift = b1_ref[...] - mu * inst_scale
        ch = lax.broadcasted_iota(jnp.int32, (1, Cmid), 1)
        is_inst = ch < half
        scale1 = jnp.where(is_inst, inst_scale, s1_ref[...])
        shift1 = jnp.where(is_inst, inst_shift, t1_ref[...])
    else:
        scale1 = s1_ref[...]
        shift1 = t1_ref[...]

    # mask re-zeroes the padding ring so the 3x3 conv sees proper zero padding.
    a1_ref[...] = jnp.maximum(y * scale1 + shift1, 0.0) * mask_ref[...]

    # ---- stage 2: 3x3 conv (stride s) as 9 accumulating shifted matmuls ----------
    # Tap (kh, kw) of the strided conv is a contiguous row window of the
    # phase-decomposed padded layout stored in a1_ref.
    for kh in range(3):
        for kw in range(3):
            t = kh * 3 + kw
            row0 = (((kh % s) * s + (kw % s)) * Hg + kh // s) * Wg + kw // s
            lhs = a1_ref[pl.ds(row0, Lq), :].astype(jnp.bfloat16)
            contrib = jnp.dot(lhs, w2_ref[t], preferred_element_type=jnp.float32)
            if t == 0:
                acc_ref[...] = contrib
            else:
                acc_ref[...] += contrib

    y2 = jnp.maximum(acc_ref[...] * s2_ref[...] + t2_ref[...], 0.0)

    # ---- stage 3: 1x1 conv + BN (no activation) ----------------------------------
    y3 = jnp.dot(y2.astype(jnp.bfloat16), w3_ref[...],
                 preferred_element_type=jnp.float32)        # (Lq, Cout)
    o_ref[...] = (y3 * s3_ref[...] + t3_ref[...]).astype(o_ref.dtype)


# --------------------------------------------------------------------------- #
# Wrapper
# --------------------------------------------------------------------------- #
def ibn_res_bottleneck(x_nchw, params, *, stride, conv1_ibn):
    N, Cin, H, W = x_nchw.shape
    Cmid = params["w1"].shape[0]
    Cout = params["w3"].shape[0]
    half = Cmid // 2 if conv1_ibn else 0
    s = int(stride)

    Ho = (H - 1) // s + 1
    Wo = (W - 1) // s + 1
    Hg, Wg = Ho + 2, Wo + 2              # phase-group extents (cover padded extent / s)
    Pd = s * s * Hg * Wg                 # rows per image in decomposed padded layout
    Lq = Ho * Wg                         # rows per image produced by stages 2/3

    f32, bf16 = jnp.float32, jnp.bfloat16

    # ---- plain-JAX input prep: NHWC + zero-pad + space-to-depth (phase) layout ----
    # TODO(synk): if the caller can supply/accept NHWC directly, drop the transposes.
    x = jnp.transpose(x_nchw, (0, 2, 3, 1)).astype(f32)                  # (N, H, W, Cin)
    x = jnp.pad(x, ((0, 0), (1, s * Hg - H - 1), (1, s * Wg - W - 1), (0, 0)))
    x = x.reshape(N, Hg, s, Wg, s, Cin).transpose(0, 2, 4, 1, 3, 5)      # (N, rh, rw, gh, gw, C)
    x = x.reshape(N, Pd, Cin).astype(bf16)

    # mask of "real" (non-padding) pixels in the same flattened layout
    m2d = jnp.zeros((s * Hg, s * Wg), f32).at[1:H + 1, 1:W + 1].set(1.0)
    mask = m2d.reshape(Hg, s, Wg, s).transpose(1, 3, 0, 2).reshape(Pd, 1)

    # ---- fold BN into per-channel scale/shift; weights as bf16 matmul operands ----
    def bn_fold(g, b, mean, var):
        sc = g * lax.rsqrt(var + EPS)
        return sc.astype(f32), (b - mean * sc).astype(f32)

    row = lambda a: a.reshape(1, -1).astype(f32)

    w1m = params["w1"][:, :, 0, 0].T.astype(bf16)                        # (Cin, Cmid)
    w2m = jnp.transpose(params["w2"], (2, 3, 1, 0)).reshape(9, Cmid, Cmid).astype(bf16)
    w3m = params["w3"][:, :, 0, 0].T.astype(bf16)                        # (Cmid, Cout)

    bs1, bt1 = bn_fold(params["bn1_g"], params["bn1_b"], params["bn1_m"], params["bn1_v"])
    if conv1_ibn:
        zero = jnp.zeros((half,), f32)
        g1 = row(jnp.concatenate([params["in1_g"], zero]))   # IN affine (first half)
        b1 = row(jnp.concatenate([params["in1_b"], zero]))
        s1 = row(jnp.concatenate([zero, bs1]))               # folded BN (second half)
        t1 = row(jnp.concatenate([zero, bt1]))
    else:
        g1 = b1 = row(jnp.zeros((Cmid,), f32))               # unused when half == 0
        s1, t1 = row(bs1), row(bt1)
    s2, t2 = map(row, bn_fold(params["bn2_g"], params["bn2_b"], params["bn2_m"], params["bn2_v"]))
    s3, t3 = map(row, bn_fold(params["bn3_g"], params["bn3_b"], params["bn3_m"], params["bn3_v"]))

    full = lambda a: pl.BlockSpec(a.shape, lambda n, _nd=a.ndim: (0,) * _nd)

    kern = functools.partial(_fused_kernel, half=half, stride=s, Hg=Hg, Wg=Wg, Ho=Ho,
                             inv_hw=1.0 / float(H * W))

    out = pl.pallas_call(
        kern,
        out_shape=jax.ShapeDtypeStruct((N, Lq, Cout), f32),
        grid=(N,),
        in_specs=[pl.BlockSpec((None, Pd, Cin), lambda n: (n, 0, 0)),
                  full(mask),
                  full(w1m), full(g1), full(b1), full(s1), full(t1),
                  full(w2m), full(s2), full(t2),
                  full(w3m), full(s3), full(t3)],
        out_specs=pl.BlockSpec((None, Lq, Cout), lambda n: (n, 0, 0)),
        scratch_shapes=[pltpu.VMEM((Pd, Cmid), f32),     # a1 (padded, phase-decomposed)
                        pltpu.VMEM((Lq, Cmid), f32)],    # 3x3 conv accumulator
        compiler_params=pltpu.CompilerParams(
            dimension_semantics=("parallel",),
            vmem_limit_bytes=32 * 1024 * 1024),
    )(x, mask, w1m, g1, b1, s1, t1, w2m, s2, t2, w3m, s3, t3)

    y = out.reshape(N, Ho, Wg, Cout)[:, :, :Wo, :]        # drop the Wg-Wo garbage columns
    return jnp.transpose(y, (0, 3, 1, 2))                 # back to NCHW


# --------------------------------------------------------------------------- #
# Pure-JAX reference (mirrors the PyTorch module, NCHW).
# mxu_dtype=bfloat16 gives a precision-matched reference (bf16 conv operands, f32 acc).
# --------------------------------------------------------------------------- #
def reference(x, params, *, stride, conv1_ibn, mxu_dtype=jnp.float32):
    def conv(z, w, s_, pad):
        return lax.conv_general_dilated(
            z.astype(mxu_dtype), w.astype(mxu_dtype),
            window_strides=(s_, s_), padding=[(pad, pad), (pad, pad)],
            dimension_numbers=("NCHW", "OIHW", "NCHW"),
            preferred_element_type=jnp.float32,
            precision=lax.Precision.HIGHEST)

    def bn(z, g, b, m, v):
        r = lambda a: a.reshape(1, -1, 1, 1)
        return (z - r(m)) * lax.rsqrt(r(v) + EPS) * r(g) + r(b)

    y = conv(x, params["w1"], 1, 0)
    Cmid = y.shape[1]
    if conv1_ibn:
        half = Cmid // 2
        y1, y2 = y[:, :half], y[:, half:]
        mu = jnp.mean(y1, axis=(2, 3), keepdims=True)
        var = jnp.mean(jnp.square(y1 - mu), axis=(2, 3), keepdims=True)
        y1 = (y1 - mu) * lax.rsqrt(var + EPS)
        y1 = y1 * params["in1_g"].reshape(1, -1, 1, 1) + params["in1_b"].reshape(1, -1, 1, 1)
        y2 = bn(y2, params["bn1_g"], params["bn1_b"], params["bn1_m"], params["bn1_v"])
        y = jnp.concatenate([y1, y2], axis=1)
    else:
        y = bn(y, params["bn1_g"], params["bn1_b"], params["bn1_m"], params["bn1_v"])
    y = jnp.maximum(y, 0.0)
    y = conv(y, params["w2"], stride, 1)
    y = jnp.maximum(bn(y, params["bn2_g"], params["bn2_b"], params["bn2_m"], params["bn2_v"]), 0.0)
    y = conv(y, params["w3"], 1, 0)
    y = bn(y, params["bn3_g"], params["bn3_b"], params["bn3_m"], params["bn3_v"])
    return y


# --------------------------------------------------------------------------- #
# Deterministic synthetic parameters
# --------------------------------------------------------------------------- #
def init_params(key, in_channels, out_channels, conv1_ibn):
    mid = out_channels // 4
    half = mid // 2 if conv1_ibn else 0
    ks = jax.random.split(key, 20)

    def w(k, shape, fan_in):
        return jax.random.normal(k, shape, jnp.float32) / jnp.sqrt(float(fan_in))

    def bn_set(kg, kb, km, kv, c):
        return (1.0 + 0.1 * jax.random.normal(kg, (c,), jnp.float32),
                0.1 * jax.random.normal(kb, (c,), jnp.float32),
                0.1 * jax.random.normal(km, (c,), jnp.float32),
                jax.random.uniform(kv, (c,), jnp.float32, minval=0.5, maxval=1.5))

    p = {
        "w1": w(ks[0], (mid, in_channels, 1, 1), in_channels),
        "w2": w(ks[1], (mid, mid, 3, 3), 9 * mid),
        "w3": w(ks[2], (out_channels, mid, 1, 1), mid),
    }
    if conv1_ibn:
        p["in1_g"] = 1.0 + 0.1 * jax.random.normal(ks[3], (half,), jnp.float32)
        p["in1_b"] = 0.1 * jax.random.normal(ks[4], (half,), jnp.float32)
    p["bn1_g"], p["bn1_b"], p["bn1_m"], p["bn1_v"] = bn_set(ks[5], ks[6], ks[7], ks[8], mid - half)
    p["bn2_g"], p["bn2_b"], p["bn2_m"], p["bn2_v"] = bn_set(ks[9], ks[10], ks[11], ks[12], mid)
    p["bn3_g"], p["bn3_b"], p["bn3_m"], p["bn3_v"] = bn_set(ks[13], ks[14], ks[15], ks[16], out_channels)
    return p


# --------------------------------------------------------------------------- #
if __name__ == "__main__":
    key = jax.random.PRNGKey(0)
    kx, kp = jax.random.split(key)

    N, Cin, H, W = 2, 16, 16, 16
    Cout, stride, conv1_ibn = 32, 2, True          # mid = Cout // 4 = 8, IBN half = 4

    x = jax.random.normal(kx, (N, Cin, H, W), jnp.float32)
    params = init_params(kp, Cin, Cout, conv1_ibn)

    out = ibn_res_bottleneck(x, params, stride=stride, conv1_ibn=conv1_ibn)
    out = jax.block_until_ready(out)

    # Precision-matched reference (bf16 MXU operands, f32 accumulation) -> tight check.
    ref_bf16 = reference(x, params, stride=stride, conv1_ibn=conv1_ibn, mxu_dtype=jnp.bfloat16)
    # Full f32 reference -> loose absolute sanity check (bf16 MXU rounding is expected).
    ref_f32 = reference(x, params, stride=stride, conv1_ibn=conv1_ibn, mxu_dtype=jnp.float32)

    assert out.shape == ref_f32.shape, (out.shape, ref_f32.shape)
    err_matched = float(jnp.max(jnp.abs(out - ref_bf16)))
    err_f32 = float(jnp.max(jnp.abs(out - ref_f32)))
    assert err_matched < 3e-2, f"precision-matched max abs err too large: {err_matched}"
    assert err_f32 < 2.5e-1, f"f32-reference max abs err too large: {err_f32}"

    print("KERNEL_OK")
</pallas_src>

<mosaic_0001>
module attributes {stable_mosaic.version = 11 : i64} {
  func.func @_fused_kernel(%arg0: i32, %arg1: memref<1x400x16xbf16, #tpu.memory_space<vmem>>, %arg2: memref<400x1xf32, #tpu.memory_space<vmem>>, %arg3: memref<16x8xbf16, #tpu.memory_space<vmem>>, %arg4: memref<1x8xf32, #tpu.memory_space<vmem>>, %arg5: memref<1x8xf32, #tpu.memory_space<vmem>>, %arg6: memref<1x8xf32, #tpu.memory_space<vmem>>, %arg7: memref<1x8xf32, #tpu.memory_space<vmem>>, %arg8: memref<9x8x8xbf16, #tpu.memory_space<vmem>>, %arg9: memref<1x8xf32, #tpu.memory_space<vmem>>, %arg10: memref<1x8xf32, #tpu.memory_space<vmem>>, %arg11: memref<8x32xbf16, #tpu.memory_space<vmem>>, %arg12: memref<1x32xf32, #tpu.memory_space<vmem>>, %arg13: memref<1x32xf32, #tpu.memory_space<vmem>>, %arg14: memref<1x80x32xf32, #tpu.memory_space<vmem>>, %arg15: memref<400x8xf32, #tpu.memory_space<vmem>>, %arg16: memref<80x8xf32, #tpu.memory_space<vmem>>) attributes {dimension_semantics = [#tpu.dimension_semantics<parallel>], iteration_bounds = array<i64: 2>, scalar_prefetch = 0 : i64, scratch_operands = 2 : i64, tpu.core_type = #tpu.core_type<tc>, window_params = [{transform_indices = @transform_0, window_bounds = array<i64: 1, 400, 16>}, {pipeline_mode = #tpu.pipeline_mode<synchronous>, transform_indices = @transform_1, window_bounds = array<i64: 400, 1>}, {pipeline_mode = #tpu.pipeline_mode<synchronous>, transform_indices = @transform_2, window_bounds = array<i64: 16, 8>}, {pipeline_mode = #tpu.pipeline_mode<synchronous>, transform_indices = @transform_3, window_bounds = array<i64: 1, 8>}, {pipeline_mode = #tpu.pipeline_mode<synchronous>, transform_indices = @transform_4, window_bounds = array<i64: 1, 8>}, {pipeline_mode = #tpu.pipeline_mode<synchronous>, transform_indices = @transform_5, window_bounds = array<i64: 1, 8>}, {pipeline_mode = #tpu.pipeline_mode<synchronous>, transform_indices = @transform_6, window_bounds = array<i64: 1, 8>}, {pipeline_mode = #tpu.pipeline_mode<synchronous>, transform_indices = @transform_7, window_bounds = array<i64: 9, 8, 8>}, {pipeline_mode = #tpu.pipeline_mode<synchronous>, transform_indices = @transform_8, window_bounds = array<i64: 1, 8>}, {pipeline_mode = #tpu.pipeline_mode<synchronous>, transform_indices = @transform_9, window_bounds = array<i64: 1, 8>}, {pipeline_mode = #tpu.pipeline_mode<synchronous>, transform_indices = @transform_10, window_bounds = array<i64: 8, 32>}, {pipeline_mode = #tpu.pipeline_mode<synchronous>, transform_indices = @transform_11, window_bounds = array<i64: 1, 32>}, {pipeline_mode = #tpu.pipeline_mode<synchronous>, transform_indices = @transform_12, window_bounds = array<i64: 1, 32>}, {transform_indices = @transform_13, window_bounds = array<i64: 1, 80, 32>}]} {
    %c0 = arith.constant 0 : index
    %c0_0 = arith.constant 0 : index
    %c0_1 = arith.constant 0 : index
    %0 = vector.load %arg1[%c0, %c0_0, %c0_1] : memref<1x400x16xbf16, #tpu.memory_space<vmem>>, vector<1x400x16xbf16>
    %1 = vector.shape_cast %0 : vector<1x400x16xbf16> to vector<400x16xbf16>
    %c0_2 = arith.constant 0 : index
    %c0_3 = arith.constant 0 : index
    %2 = vector.load %arg3[%c0_2, %c0_3] : memref<16x8xbf16, #tpu.memory_space<vmem>>, vector<16x8xbf16>
    %cst = arith.constant dense<0.000000e+00> : vector<400x8xf32>
    %3 = tpu.matmul %1, %2, %cst {dimension_numbers = #tpu.dot_dimension_numbers<[1], [0], [0], [1], [0, 0, 1, 1], [], []>} : vector<400x16xbf16>, vector<16x8xbf16>, vector<400x8xf32> -> vector<400x8xf32>
    %cst_4 = arith.constant dense<0.000000e+00> : vector<8xf32>
    %4 = vector.multi_reduction <add>, %3, %cst_4 [0] : vector<400x8xf32> to vector<8xf32>
    %5 = vector.shape_cast %4 : vector<8xf32> to vector<1x8xf32>
    %6 = arith.mulf %3, %3 : vector<400x8xf32>
    %cst_5 = arith.constant dense<0.000000e+00> : vector<8xf32>
    %7 = vector.multi_reduction <add>, %6, %cst_5 [0] : vector<400x8xf32> to vector<8xf32>
    %8 = vector.shape_cast %7 : vector<8xf32> to vector<1x8xf32>
    %cst_6 = arith.constant 3.906250e-03 : f32
    %9 = vector.broadcast %cst_6 : f32 to vector<1x8xf32>
    %10 = arith.mulf %5, %9 : vector<1x8xf32>
    %cst_7 = arith.constant 3.906250e-03 : f32
    %11 = vector.broadcast %cst_7 : f32 to vector<1x8xf32>
    %12 = arith.mulf %8, %11 : vector<1x8xf32>
    %13 = arith.mulf %10, %10 : vector<1x8xf32>
    %14 = arith.subf %12, %13 : vector<1x8xf32>
    %c0_8 = arith.constant 0 : index
    %c0_9 = arith.constant 0 : index
    %15 = vector.load %arg4[%c0_8, %c0_9] : memref<1x8xf32, #tpu.memory_space<vmem>>, vector<1x8xf32>
    %cst_10 = arith.constant 9.99999974E-6 : f32
    %16 = vector.broadcast %cst_10 : f32 to vector<1x8xf32>
    %17 = arith.addf %14, %16 : vector<1x8xf32>
    %18 = math.rsqrt %17 : vector<1x8xf32>
    %19 = arith.mulf %15, %18 : vector<1x8xf32>
    %c0_11 = arith.constant 0 : index
    %c0_12 = arith.constant 0 : index
    %20 = vector.load %arg5[%c0_11, %c0_12] : memref<1x8xf32, #tpu.memory_space<vmem>>, vector<1x8xf32>
    %21 = arith.mulf %10, %19 : vector<1x8xf32>
    %22 = arith.subf %20, %21 : vector<1x8xf32>
    %23 = tpu.iota {dimensions = array<i32: 1>} : vector<1x8xi32>
    %c4_i32 = arith.constant 4 : i32
    %24 = vector.broadcast %c4_i32 : i32 to vector<1x8xi32>
    %25 = arith.cmpi slt, %23, %24 : vector<1x8xi32>
    %c0_13 = arith.constant 0 : index
    %c0_14 = arith.constant 0 : index
    %26 = vector.load %arg6[%c0_13, %c0_14] : memref<1x8xf32, #tpu.memory_space<vmem>>, vector<1x8xf32>
    %27 = arith.select %25, %19, %26 : vector<1x8xi1>, vector<1x8xf32>
    %c0_15 = arith.constant 0 : index
    %c0_16 = arith.constant 0 : index
    %28 = vector.load %arg7[%c0_15, %c0_16] : memref<1x8xf32, #tpu.memory_space<vmem>>, vector<1x8xf32>
    %29 = arith.select %25, %22, %28 : vector<1x8xi1>, vector<1x8xf32>
    %30 = vector.broadcast %27 : vector<1x8xf32> to vector<400x8xf32>
    %31 = arith.mulf %3, %30 : vector<400x8xf32>
    %32 = vector.broadcast %29 : vector<1x8xf32> to vector<400x8xf32>
    %33 = arith.addf %31, %32 : vector<400x8xf32>
    %cst_17 = arith.constant 0.000000e+00 : f32
    %34 = vector.broadcast %cst_17 : f32 to vector<400x8xf32>
    %35 = arith.maximumf %33, %34 : vector<400x8xf32>
    %c0_18 = arith.constant 0 : index
    %c0_19 = arith.constant 0 : index
    %36 = vector.load %arg2[%c0_18, %c0_19] : memref<400x1xf32, #tpu.memory_space<vmem>>, vector<400x1xf32>
    %37 = vector.broadcast %36 : vector<400x1xf32> to vector<400x8xf32>
    %38 = arith.mulf %35, %37 : vector<400x8xf32>
    %c0_20 = arith.constant 0 : index
    %c0_21 = arith.constant 0 : index
    %39 = vector.load %arg15[%c0_20, %c0_21] : memref<400x8xf32, #tpu.memory_space<vmem>>, vector<400x8xf32>
    tpu.vector_store %arg15[%c0_20, %c0_21], %38 {strides = array<i32>} : memref<400x8xf32, #tpu.memory_space<vmem>>, vector<400x8xf32>,
    %c0_22 = arith.constant 0 : index
    %c0_23 = arith.constant 0 : index
    %40 = vector.load %arg15[%c0_22, %c0_23] : memref<400x8xf32, #tpu.memory_space<vmem>>, vector<80x8xf32>
    %41 = arith.truncf %40 : vector<80x8xf32> to vector<80x8xbf16>
    %c0_24 = arith.constant 0 : index
    %c0_25 = arith.constant 0 : index
    %c0_26 = arith.constant 0 : index
    %42 = vector.load %arg8[%c0_24, %c0_25, %c0_26] : memref<9x8x8xbf16, #tpu.memory_space<vmem>>, vector<1x8x8xbf16>
    %43 = vector.shape_cast %42 : vector<1x8x8xbf16> to vector<8x8xbf16>
    %cst_27 = arith.constant dense<0.000000e+00> : vector<80x8xf32>
    %44 = tpu.matmul %41, %43, %cst_27 {dimension_numbers = #tpu.dot_dimension_numbers<[1], [0], [0], [1], [0, 0, 1, 1], [], []>} : vector<80x8xbf16>, vector<8x8xbf16>, vector<80x8xf32> -> vector<80x8xf32>
    %c0_28 = arith.constant 0 : index
    %c0_29 = arith.constant 0 : index
    %45 = vector.load %arg16[%c0_28, %c0_29] : memref<80x8xf32, #tpu.memory_space<vmem>>, vector<80x8xf32>
    tpu.vector_store %arg16[%c0_28, %c0_29], %44 {strides = array<i32>} : memref<80x8xf32, #tpu.memory_space<vmem>>, vector<80x8xf32>,
    %c100 = arith.constant 100 : index
    %c0_30 = arith.constant 0 : index
    %46 = vector.load %arg15[%c100, %c0_30] : memref<400x8xf32, #tpu.memory_space<vmem>>, vector<80x8xf32>
    %47 = arith.truncf %46 : vector<80x8xf32> to vector<80x8xbf16>
    %c1 = arith.constant 1 : index
    %c0_31 = arith.constant 0 : index
    %c0_32 = arith.constant 0 : index
    %48 = vector.load %arg8[%c1, %c0_31, %c0_32] : memref<9x8x8xbf16, #tpu.memory_space<vmem>>, vector<1x8x8xbf16>
    %49 = vector.shape_cast %48 : vector<1x8x8xbf16> to vector<8x8xbf16>
    %cst_33 = arith.constant dense<0.000000e+00> : vector<80x8xf32>
    %50 = tpu.matmul %47, %49, %cst_33 {dimension_numbers = #tpu.dot_dimension_numbers<[1], [0], [0], [1], [0, 0, 1, 1], [], []>} : vector<80x8xbf16>, vector<8x8xbf16>, vector<80x8xf32> -> vector<80x8xf32>
    %c0_34 = arith.constant 0 : index
    %c0_35 = arith.constant 0 : index
    %51 = vector.load %arg16[%c0_34, %c0_35] : memref<80x8xf32, #tpu.memory_space<vmem>>, vector<80x8xf32>
    %52 = arith.addf %51, %50 : vector<80x8xf32>
    %c0_36 = arith.constant 0 : index
    %c0_37 = arith.constant 0 : index
    %53 = vector.load %arg16[%c0_36, %c0_37] : memref<80x8xf32, #tpu.memory_space<vmem>>, vector<80x8xf32>
    tpu.vector_store %arg16[%c0_36, %c0_37], %52 {strides = array<i32>} : memref<80x8xf32, #tpu.memory_space<vmem>>, vector<80x8xf32>,
    %c1_38 = arith.constant 1 : index
    %c0_39 = arith.constant 0 : index
    %54 = vector.load %arg15[%c1_38, %c0_39] : memref<400x8xf32, #tpu.memory_space<vmem>>, vector<80x8xf32>
    %55 = arith.truncf %54 : vector<80x8xf32> to vector<80x8xbf16>
    %c2 = arith.constant 2 : index
    %c0_40 = arith.constant 0 : index
    %c0_41 = arith.constant 0 : index
    %56 = vector.load %arg8[%c2, %c0_40, %c0_41] : memref<9x8x8xbf16, #tpu.memory_space<vmem>>, vector<1x8x8xbf16>
    %57 = vector.shape_cast %56 : vector<1x8x8xbf16> to vector<8x8xbf16>
    %cst_42 = arith.constant dense<0.000000e+00> : vector<80x8xf32>
    %58 = tpu.matmul %55, %57, %cst_42 {dimension_numbers = #tpu.dot_dimension_numbers<[1], [0], [0], [1], [0, 0, 1, 1], [], []>} : vector<80x8xbf16>, vector<8x8xbf16>, vector<80x8xf32> -> vector<80x8xf32>
    %c0_43 = arith.constant 0 : index
    %c0_44 = arith.constant 0 : index
    %59 = vector.load %arg16[%c0_43, %c0_44] : memref<80x8xf32, #tpu.memory_space<vmem>>, vector<80x8xf32>
    %60 = arith.addf %59, %58 : vector<80x8xf32>
    %c0_45 = arith.constant 0 : index
    %c0_46 = arith.constant 0 : index
    %61 = vector.load %arg16[%c0_45, %c0_46] : memref<80x8xf32, #tpu.memory_space<vmem>>, vector<80x8xf32>
    tpu.vector_store %arg16[%c0_45, %c0_46], %60 {strides = array<i32>} : memref<80x8xf32, #tpu.memory_space<vmem>>, vector<80x8xf32>,
    %c200 = arith.constant 200 : index
    %c0_47 = arith.constant 0 : index
    %62 = vector.load %arg15[%c200, %c0_47] : memref<400x8xf32, #tpu.memory_space<vmem>>, vector<80x8xf32>
    %63 = arith.truncf %62 : vector<80x8xf32> to vector<80x8xbf16>
    %c3 = arith.constant 3 : index
    %c0_48 = arith.constant 0 : index
    %c0_49 = arith.constant 0 : index
    %64 = vector.load %arg8[%c3, %c0_48, %c0_49] : memref<9x8x8xbf16, #tpu.memory_space<vmem>>, vector<1x8x8xbf16>
    %65 = vector.shape_cast %64 : vector<1x8x8xbf16> to vector<8x8xbf16>
    %cst_50 = arith.constant dense<0.000000e+00> : vector<80x8xf32>
    %66 = tpu.matmul %63, %65, %cst_50 {dimension_numbers = #tpu.dot_dimension_numbers<[1], [0], [0], [1], [0, 0, 1, 1], [], []>} : vector<80x8xbf16>, vector<8x8xbf16>, vector<80x8xf32> -> vector<80x8xf32>
    %c0_51 = arith.constant 0 : index
    %c0_52 = arith.constant 0 : index
    %67 = vector.load %arg16[%c0_51, %c0_52] : memref<80x8xf32, #tpu.memory_space<vmem>>, vector<80x8xf32>
    %68 = arith.addf %67, %66 : vector<80x8xf32>
    %c0_53 = arith.constant 0 : index
    %c0_54 = arith.constant 0 : index
    %69 = vector.load %arg16[%c0_53, %c0_54] : memref<80x8xf32, #tpu.memory_space<vmem>>, vector<80x8xf32>
    tpu.vector_store %arg16[%c0_53, %c0_54], %68 {strides = array<i32>} : memref<80x8xf32, #tpu.memory_space<vmem>>, vector<80x8xf32>,
    %c300 = arith.constant 300 : index
    %c0_55 = arith.constant 0 : index
    %70 = vector.load %arg15[%c300, %c0_55] : memref<400x8xf32, #tpu.memory_space<vmem>>, vector<80x8xf32>
    %71 = arith.truncf %70 : vector<80x8xf32> to vector<80x8xbf16>
    %c4 = arith.constant 4 : index
    %c0_56 = arith.constant 0 : index
    %c0_57 = arith.constant 0 : index
    %72 = vector.load %arg8[%c4, %c0_56, %c0_57] : memref<9x8x8xbf16, #tpu.memory_space<vmem>>, vector<1x8x8xbf16>
    %73 = vector.shape_cast %72 : vector<1x8x8xbf16> to vector<8x8xbf16>
    %cst_58 = arith.constant dense<0.000000e+00> : vector<80x8xf32>
    %74 = tpu.matmul %71, %73, %cst_58 {dimension_numbers = #tpu.dot_dimension_numbers<[1], [0], [0], [1], [0, 0, 1, 1], [], []>} : vector<80x8xbf16>, vector<8x8xbf16>, vector<80x8xf32> -> vector<80x8xf32>
    %c0_59 = arith.constant 0 : index
    %c0_60 = arith.constant 0 : index
    %75 = vector.load %arg16[%c0_59, %c0_60] : memref<80x8xf32, #tpu.memory_space<vmem>>, vector<80x8xf32>
    %76 = arith.addf %75, %74 : vector<80x8xf32>
    %c0_61 = arith.constant 0 : index
    %c0_62 = arith.constant 0 : index
    %77 = vector.load %arg16[%c0_61, %c0_62] : memref<80x8xf32, #tpu.memory_space<vmem>>, vector<80x8xf32>
    tpu.vector_store %arg16[%c0_61, %c0_62], %76 {strides = array<i32>} : memref<80x8xf32, #tpu.memory_space<vmem>>, vector<80x8xf32>,
    %c201 = arith.constant 201 : index
    %c0_63 = arith.constant 0 : index
    %78 = vector.load %arg15[%c201, %c0_63] : memref<400x8xf32, #tpu.memory_space<vmem>>, vector<80x8xf32>
    %79 = arith.truncf %78 : vector<80x8xf32> to vector<80x8xbf16>
    %c5 = arith.constant 5 : index
    %c0_64 = arith.constant 0 : index
    %c0_65 = arith.constant 0 : index
    %80 = vector.load %arg8[%c5, %c0_64, %c0_65] : memref<9x8x8xbf16, #tpu.memory_space<vmem>>, vector<1x8x8xbf16>
    %81 = vector.shape_cast %80 : vector<1x8x8xbf16> to vector<8x8xbf16>
    %cst_66 = arith.constant dense<0.000000e+00> : vector<80x8xf32>
    %82 = tpu.matmul %79, %81, %cst_66 {dimension_numbers = #tpu.dot_dimension_numbers<[1], [0], [0], [1], [0, 0, 1, 1], [], []>} : vector<80x8xbf16>, vector<8x8xbf16>, vector<80x8xf32> -> vector<80x8xf32>
    %c0_67 = arith.constant 0 : index
    %c0_68 = arith.constant 0 : index
    %83 = vector.load %arg16[%c0_67, %c0_68] : memref<80x8xf32, #tpu.memory_space<vmem>>, vector<80x8xf32>
    %84 = arith.addf %83, %82 : vector<80x8xf32>
    %c0_69 = arith.constant 0 : index
    %c0_70 = arith.constant 0 : index
    %85 = vector.load %arg16[%c0_69, %c0_70] : memref<80x8xf32, #tpu.memory_space<vmem>>, vector<80x8xf32>
    tpu.vector_store %arg16[%c0_69, %c0_70], %84 {strides = array<i32>} : memref<80x8xf32, #tpu.memory_space<vmem>>, vector<80x8xf32>,
    %c10 = arith.constant 10 : index
    %c0_71 = arith.constant 0 : index
    %86 = vector.load %arg15[%c10, %c0_71] : memref<400x8xf32, #tpu.memory_space<vmem>>, vector<80x8xf32>
    %87 = arith.truncf %86 : vector<80x8xf32> to vector<80x8xbf16>
    %c6 = arith.constant 6 : index
    %c0_72 = arith.constant 0 : index
    %c0_73 = arith.constant 0 : index
    %88 = vector.load %arg8[%c6, %c0_72, %c0_73] : memref<9x8x8xbf16, #tpu.memory_space<vmem>>, vector<1x8x8xbf16>
    %89 = vector.shape_cast %88 : vector<1x8x8xbf16> to vector<8x8xbf16>
    %cst_74 = arith.constant dense<0.000000e+00> : vector<80x8xf32>
    %90 = tpu.matmul %87, %89, %cst_74 {dimension_numbers = #tpu.dot_dimension_numbers<[1], [0], [0], [1], [0, 0, 1, 1], [], []>} : vector<80x8xbf16>, vector<8x8xbf16>, vector<80x8xf32> -> vector<80x8xf32>
    %c0_75 = arith.constant 0 : index
    %c0_76 = arith.constant 0 : index
    %91 = vector.load %arg16[%c0_75, %c0_76] : memref<80x8xf32, #tpu.memory_space<vmem>>, vector<80x8xf32>
    %92 = arith.addf %91, %90 : vector<80x8xf32>
    %c0_77 = arith.constant 0 : index
    %c0_78 = arith.constant 0 : index
    %93 = vector.load %arg16[%c0_77, %c0_78] : memref<80x8xf32, #tpu.memory_space<vmem>>, vector<80x8xf32>
    tpu.vector_store %arg16[%c0_77, %c0_78], %92 {strides = array<i32>} : memref<80x8xf32, #tpu.memory_space<vmem>>, vector<80x8xf32>,
    %c110 = arith.constant 110 : index
    %c0_79 = arith.constant 0 : index
    %94 = vector.load %arg15[%c110, %c0_79] : memref<400x8xf32, #tpu.memory_space<vmem>>, vector<80x8xf32>
    %95 = arith.truncf %94 : vector<80x8xf32> to vector<80x8xbf16>
    %c7 = arith.constant 7 : index
    %c0_80 = arith.constant 0 : index
    %c0_81 = arith.constant 0 : index
    %96 = vector.load %arg8[%c7, %c0_80, %c0_81] : memref<9x8x8xbf16, #tpu.memory_space<vmem>>, vector<1x8x8xbf16>
    %97 = vector.shape_cast %96 : vector<1x8x8xbf16> to vector<8x8xbf16>
    %cst_82 = arith.constant dense<0.000000e+00> : vector<80x8xf32>
    %98 = tpu.matmul %95, %97, %cst_82 {dimension_numbers = #tpu.dot_dimension_numbers<[1], [0], [0], [1], [0, 0, 1, 1], [], []>} : vector<80x8xbf16>, vector<8x8xbf16>, vector<80x8xf32> -> vector<80x8xf32>
    %c0_83 = arith.constant 0 : index
    %c0_84 = arith.constant 0 : index
    %99 = vector.load %arg16[%c0_83, %c0_84] : memref<80x8xf32, #tpu.memory_space<vmem>>, vector<80x8xf32>
    %100 = arith.addf %99, %98 : vector<80x8xf32>
    %c0_85 = arith.constant 0 : index
    %c0_86 = arith.constant 0 : index
    %101 = vector.load %arg16[%c0_85, %c0_86] : memref<80x8xf32, #tpu.memory_space<vmem>>, vector<80x8xf32>
    tpu.vector_store %arg16[%c0_85, %c0_86], %100 {strides = array<i32>} : memref<80x8xf32, #tpu.memory_space<vmem>>, vector<80x8xf32>,
    %c11 = arith.constant 11 : index
    %c0_87 = arith.constant 0 : index
    %102 = vector.load %arg15[%c11, %c0_87] : memref<400x8xf32, #tpu.memory_space<vmem>>, vector<80x8xf32>
    %103 = arith.truncf %102 : vector<80x8xf32> to vector<80x8xbf16>
    %c8 = arith.constant 8 : index
    %c0_88 = arith.constant 0 : index
    %c0_89 = arith.constant 0 : index
    %104 = vector.load %arg8[%c8, %c0_88, %c0_89] : memref<9x8x8xbf16, #tpu.memory_space<vmem>>, vector<1x8x8xbf16>
    %105 = vector.shape_cast %104 : vector<1x8x8xbf16> to vector<8x8xbf16>
    %cst_90 = arith.constant dense<0.000000e+00> : vector<80x8xf32>
    %106 = tpu.matmul %103, %105, %cst_90 {dimension_numbers = #tpu.dot_dimension_numbers<[1], [0], [0], [1], [0, 0, 1, 1], [], []>} : vector<80x8xbf16>, vector<8x8xbf16>, vector<80x8xf32> -> vector<80x8xf32>
    %c0_91 = arith.constant 0 : index
    %c0_92 = arith.constant 0 : index
    %107 = vector.load %arg16[%c0_91, %c0_92] : memref<80x8xf32, #tpu.memory_space<vmem>>, vector<80x8xf32>
    %108 = arith.addf %107, %106 : vector<80x8xf32>
    %c0_93 = arith.constant 0 : index
    %c0_94 = arith.constant 0 : index
    %109 = vector.load %arg16[%c0_93, %c0_94] : memref<80x8xf32, #tpu.memory_space<vmem>>, vector<80x8xf32>
    tpu.vector_store %arg16[%c0_93, %c0_94], %108 {strides = array<i32>} : memref<80x8xf32, #tpu.memory_space<vmem>>, vector<80x8xf32>,
    %c0_95 = arith.constant 0 : index
    %c0_96 = arith.constant 0 : index
    %110 = vector.load %arg16[%c0_95, %c0_96] : memref<80x8xf32, #tpu.memory_space<vmem>>, vector<80x8xf32>
    %c0_97 = arith.constant 0 : index
    %c0_98 = arith.constant 0 : index
    %111 = vector.load %arg9[%c0_97, %c0_98] : memref<1x8xf32, #tpu.memory_space<vmem>>, vector<1x8xf32>
    %112 = vector.broadcast %111 : vector<1x8xf32> to vector<80x8xf32>
    %113 = arith.mulf %110, %112 : vector<80x8xf32>
    %c0_99 = arith.constant 0 : index
    %c0_100 = arith.constant 0 : index
    %114 = vector.load %arg10[%c0_99, %c0_100] : memref<1x8xf32, #tpu.memory_space<vmem>>, vector<1x8xf32>
    %115 = vector.broadcast %114 : vector<1x8xf32> to vector<80x8xf32>
    %116 = arith.addf %113, %115 : vector<80x8xf32>
    %cst_101 = arith.constant 0.000000e+00 : f32
    %117 = vector.broadcast %cst_101 : f32 to vector<80x8xf32>
    %118 = arith.maximumf %116, %117 : vector<80x8xf32>
    %119 = arith.truncf %118 : vector<80x8xf32> to vector<80x8xbf16>
    %c0_102 = arith.constant 0 : index
    %c0_103 = arith.constant 0 : index
    %120 = vector.load %arg11[%c0_102, %c0_103] : memref<8x32xbf16, #tpu.memory_space<vmem>>, vector<8x32xbf16>
    %cst_104 = arith.constant dense<0.000000e+00> : vector<80x32xf32>
    %121 = tpu.matmul %119, %120, %cst_104 {dimension_numbers = #tpu.dot_dimension_numbers<[1], [0], [0], [1], [0, 0, 1, 1], [], []>} : vector<80x8xbf16>, vector<8x32xbf16>, vector<80x32xf32> -> vector<80x32xf32>
    %c0_105 = arith.constant 0 : index
    %c0_106 = arith.constant 0 : index
    %122 = vector.load %arg12[%c0_105, %c0_106] : memref<1x32xf32, #tpu.memory_space<vmem>>, vector<1x32xf32>
    %123 = vector.broadcast %122 : vector<1x32xf32> to vector<80x32xf32>
    %124 = arith.mulf %121, %123 : vector<80x32xf32>
    %c0_107 = arith.constant 0 : index
    %c0_108 = arith.constant 0 : index
    %125 = vector.load %arg13[%c0_107, %c0_108] : memref<1x32xf32, #tpu.memory_space<vmem>>, vector<1x32xf32>
    %126 = vector.broadcast %125 : vector<1x32xf32> to vector<80x32xf32>
    %127 = arith.addf %124, %126 : vector<80x32xf32>
    %c0_109 = arith.constant 0 : index
    %c0_110 = arith.constant 0 : index
    %c0_111 = arith.constant 0 : index
    %128 = vector.load %arg14[%c0_109, %c0_110, %c0_111] : memref<1x80x32xf32, #tpu.memory_space<vmem>>, vector<1x80x32xf32>
    %129 = vector.shape_cast %128 : vector<1x80x32xf32> to vector<80x32xf32>
    %130 = vector.shape_cast %127 : vector<80x32xf32> to vector<1x80x32xf32>
    tpu.vector_store %arg14[%c0_109, %c0_110, %c0_111], %130 {strides = array<i32>} : memref<1x80x32xf32, #tpu.memory_space<vmem>>, vector<1x80x32xf32>,
    return
  }
  func.func @transform_0(%arg0: i32) -> (i32, i32, i32) {
    %c0_i32 = arith.constant 0 : i32
    %c0_i32_0 = arith.constant 0 : i32
    %c0_i32_1 = arith.constant 0 : i32
    return %arg0, %c0_i32, %c0_i32_0 : i32, i32, i32
  }
  func.func @transform_1(%arg0: i32) -> (i32, i32) {
    %c0_i32 = arith.constant 0 : i32
    %c0_i32_0 = arith.constant 0 : i32
    %c0_i32_1 = arith.constant 0 : i32
    return %c0_i32, %c0_i32_0 : i32, i32
  }
  func.func @transform_2(%arg0: i32) -> (i32, i32) {
    %c0_i32 = arith.constant 0 : i32
    %c0_i32_0 = arith.constant 0 : i32
    %c0_i32_1 = arith.constant 0 : i32
    return %c0_i32, %c0_i32_0 : i32, i32
  }
  func.func @transform_3(%arg0: i32) -> (i32, i32) {
    %c0_i32 = arith.constant 0 : i32
    %c0_i32_0 = arith.constant 0 : i32
    %c0_i32_1 = arith.constant 0 : i32
    return %c0_i32, %c0_i32_0 : i32, i32
  }
  func.func @transform_4(%arg0: i32) -> (i32, i32) {
    %c0_i32 = arith.constant 0 : i32
    %c0_i32_0 = arith.constant 0 : i32
    %c0_i32_1 = arith.constant 0 : i32
    return %c0_i32, %c0_i32_0 : i32, i32
  }
  func.func @transform_5(%arg0: i32) -> (i32, i32) {
    %c0_i32 = arith.constant 0 : i32
    %c0_i32_0 = arith.constant 0 : i32
    %c0_i32_1 = arith.constant 0 : i32
    return %c0_i32, %c0_i32_0 : i32, i32
  }
  func.func @transform_6(%arg0: i32) -> (i32, i32) {
    %c0_i32 = arith.constant 0 : i32
    %c0_i32_0 = arith.constant 0 : i32
    %c0_i32_1 = arith.constant 0 : i32
    return %c0_i32, %c0_i32_0 : i32, i32
  }
  func.func @transform_7(%arg0: i32) -> (i32, i32, i32) {
    %c0_i32 = arith.constant 0 : i32
    %c0_i32_0 = arith.constant 0 : i32
    %c0_i32_1 = arith.constant 0 : i32
    %c0_i32_2 = arith.constant 0 : i32
    return %c0_i32, %c0_i32_0, %c0_i32_1 : i32, i32, i32
  }
  func.func @transform_8(%arg0: i32) -> (i32, i32) {
    %c0_i32 = arith.constant 0 : i32
    %c0_i32_0 = arith.constant 0 : i32
    %c0_i32_1 = arith.constant 0 : i32
    return %c0_i32, %c0_i32_0 : i32, i32
  }
  func.func @transform_9(%arg0: i32) -> (i32, i32) {
    %c0_i32 = arith.constant 0 : i32
    %c0_i32_0 = arith.constant 0 : i32
    %c0_i32_1 = arith.constant 0 : i32
    return %c0_i32, %c0_i32_0 : i32, i32
  }
  func.func @transform_10(%arg0: i32) -> (i32, i32) {
    %c0_i32 = arith.constant 0 : i32
    %c0_i32_0 = arith.constant 0 : i32
    %c0_i32_1 = arith.constant 0 : i32
    return %c0_i32, %c0_i32_0 : i32, i32
  }
  func.func @transform_11(%arg0: i32) -> (i32, i32) {
    %c0_i32 = arith.constant 0 : i32
    %c0_i32_0 = arith.constant 0 : i32
    %c0_i32_1 = arith.constant 0 : i32
    return %c0_i32, %c0_i32_0 : i32, i32
  }
  func.func @transform_12(%arg0: i32) -> (i32, i32) {
    %c0_i32 = arith.constant 0 : i32
    %c0_i32_0 = arith.constant 0 : i32
    %c0_i32_1 = arith.constant 0 : i32
    return %c0_i32, %c0_i32_0 : i32, i32
  }
  func.func @transform_13(%arg0: i32) -> (i32, i32, i32) {
    %c0_i32 = arith.constant 0 : i32
    %c0_i32_0 = arith.constant 0 : i32
    %c0_i32_1 = arith.constant 0 : i32
    return %arg0, %c0_i32, %c0_i32_0 : i32, i32, i32
  }
}

</mosaic_0001>

<bundles_post_ra>
// kernel: tpu_custom_call.1
= control target key start
LH: loop header
LB: loop body
LE: loop exit
PB: predicated region body
PF: predicated region fallthrough
CT: control target
= control target key end

     0   :  { %s3900_s25 = smov 0   ;;  %s5321_s0 = inlined_call_operand.vmem [shape: bf16[2,400,16], index: 0, kind: input, shape index: {}]   ;;  %s5322_s1 = inlined_call_operand.vmem [shape: f32[400,1], index: 1, kind: input, shape index: {}]   ;;  %s5323_s2 = inlined_call_operand.vmem [shape: bf16[16,8], index: 2, kind: input, shape index: {}]   ;;  %s5324_s3 = inlined_call_operand.vmem [shape: f32[1,8], index: 3, kind: input, shape index: {}]   ;;  %s5325_s4 = inlined_call_operand.vmem [shape: f32[1,8], index: 4, kind: input, shape index: {}]   ;;  %s5326_s5 = inlined_call_operand.vmem [shape: f32[1,8], index: 5, kind: input, shape index: {}]   ;;  %s5327_s6 = inlined_call_operand.vmem [shape: f32[1,8], index: 6, kind: input, shape index: {}]   ;;  %s5328_s7 = inlined_call_operand.vmem [shape: bf16[9,8,8], index: 7, kind: input, shape index: {}]   ;;  %s5329_s8 = inlined_call_operand.vmem [shape: f32[1,8], index: 8, kind: input, shape index: {}]   ;;  %s5330_s9 = inlined_call_operand.vmem [shape: f32[1,8], index: 9, kind: input, shape index: {}]   ;;  %s5331_s10 = inlined_call_operand.vmem [shape: bf16[8,32], index: 10, kind: input, shape index: {}]   ;;  %s5332_s11 = inlined_call_operand.vmem [shape: f32[1,32], index: 11, kind: input, shape index: {}]   ;;  %s5333_s12 = inlined_call_operand.vmem [shape: f32[1,32], index: 12, kind: input, shape index: {}]   ;;  %s5334_s13 = inlined_call_operand.vmem [shape: f32[2,80,32], index: 13, kind: output, shape index: {}]  }
   0x1 LB: > { %s3244_s26 = sadd.s32 4294967295, %s3825_s25   ;;  %p3248_p0 = scmp.ge.s32.totalorder %s3825_s25, 1  ;;  %s3825_s25 = sphi %s3900_s25, %s23_s25  }
   0x2   : > { %p387_p1 = scmp.lt.s32.totalorder %s3825_s25, 3 }
   0x4   : > { %p388_p2 = pnand %p3248_p0, %p387_p1 }
   0x6   : > { %391 = sbr.rel (%p388_p2) target bundleno = 1182 (0x49e), region = 72 }
   0xb   : > { %v3791_v0 = vld [vmem:[%s5323_s2] sm:$0xff]   ;;  %v5335_v1 = vmov 0.0   ;;  %p431_p3 = scmp.lt.s32.totalorder %s3244_s26, 1  ;;  %vm3828_vm0 = vmmov 0   ;;  %vm625_vm1 = vcmask 130048   ;;  %v3829_v15 = vmov 0  }
   0xc   : > { %3452 = vmatprep.subr.bf16.mxu0 %v5335_v1  ;;  %3774 = vmatprep.subr.bf16.mxu1 %v5335_v1  ;;  %v1371_v16 = vld [vmem:[%s5322_s1] sm:$0xff]  ;;  %v1373_v17 = vld [vmem:[%s5322_s1 + $0x10] sm:$0xff]  ;;  %v1372_v18 = vld [vmem:[%s5322_s1 + $0x8] sm:$0xff]  ;;  %vm934_vm2 = vcmask 64512   ;;  %vm1802_vm3 = vcmask 1043456   ;;  %vm3178_vm5 = vcmask 261120  }
   0xd   : > { %3453 = vmatpush3.bf16.msra.mxu0 %v3791_v0  ;;  %3454 = vmatprep.mubr.msk.bf16.mxu0 %vm3828_vm0, %v5335_v1  ;;  %s5434_s26 = smov (!%p431_p3, %s3244_s26), 1  ;;  %v1374_v20 = vld [vmem:[%s5322_s1 + $0x18] sm:$0xff]  ;;  %v1375_v21 = vld [vmem:[%s5322_s1 + $0x20] sm:$0xff]  ;;  %v1376_v22 = vld [vmem:[%s5322_s1 + $0x28] sm:$0xff] }
   0xe   : > { %3775 = vmatpush3.bf16.msra.mxu1 %v3791_v0  ;;  %3546 = vmatprep.mubr.msk.bf16.mxu1 %vm3828_vm0, %v5335_v1  ;;  %s3776_s29 = smul.u32 200, %s5434_s26  ;;  %v1377_v23 = vld [vmem:[%s5322_s1 + $0x30] sm:$0xff]  ;;  %v1378_v25 = vld [vmem:[%s5322_s1 + $0x38] sm:$0xff]  ;;  %v1379_v26 = vld [vmem:[%s5322_s1 + $0x40] sm:$0xff] }
   0xf   : > { %3554 = vmatprep.subr.bf16.mxu1 %v5335_v1  ;;  %3664 = vmatprep.subr.bf16.mxu0 %v5335_v1  ;;  %v1380_v27 = vld [vmem:[%s5322_s1 + $0x48] sm:$0xff]  ;;  %v1383_v28 = vld [vmem:[%s5322_s1 + $0x60] sm:$0xff]  ;;  %v1385_v31 = vld [vmem:[%s5322_s1 + $0x70] sm:$0xff]  ;;  %s3777_s19 = smul.u32 80, %s5434_s26 }
  0x10   : > { %s3925_s15 = scalar_lea.vmem %s5321_s0, %s3776_s29  ;;  %3789 = vset.pattern.permute.xlu0 %v3829_v15  ;;  %3790 = vset.pattern.permute.xlu1 %v3829_v15  ;;  %v1384_v30 = vld [vmem:[%s5322_s1 + $0x68] sm:$0xff]  ;;  %v1386_v32 = vld [vmem:[%s5322_s1 + $0x78] sm:$0xff]  ;;  %v1387_v33 = vld [vmem:[%s5322_s1 + $0x80] sm:$0xff] }
  0x11   : > { %v3792_v2 = vld [vmem:[%s3925_s15] sm:$0xff]   ;;  %v3793_v3 = vld [vmem:[%s3925_s15 + $0x8] sm:$0xff]   ;;  %v3794_v4 = vld [vmem:[%s3925_s15 + $0x10] sm:$0xff]   ;;  %1423 = vperm.xlu0 %3789, %v1371_v16   ;;  %1433 = vperm.xlu1 %3790, %v1373_v17   ;;  %s5296_s28 = scalar_lea.vmem %s5334_s13, %s3777_s19 }
  0x12   : > { %3455 = vmatmul.mubr.msk.bf16.vlgmr.msra.gmra.mxu0 %vm625_vm1, %v3792_v2  ;;  %v3795_v5 = vld [vmem:[%s3925_s15 + $0x18] sm:$0xff]   ;;  %v3796_v6 = vld [vmem:[%s3925_s15 + $0x20] sm:$0xff]   ;;  %v3797_v7 = vld [vmem:[%s3925_s15 + $0x28] sm:$0xff]  }
  0x13   : > { %3458 = vmatprep.mubr.msk.bf16.mxu0 %vm3828_vm0, %v5335_v1  ;;  %v3814_v8 = vld [vmem:[%s3925_s15 + $0xb8] sm:$0xff]   ;;  %v3798_v9 = vld [vmem:[%s3925_s15 + $0x30] sm:$0xff]   ;;  %v3816_v10 = vld [vmem:[%s3925_s15 + $0xc0] sm:$0xff]  }
  0x14   : > { %3547 = vmatmul.mubr.msk.bf16.vlgmr.msra.gmra.mxu1 %vm625_vm1, %v3814_v8  ;;  %v3799_v11 = vld [vmem:[%s3925_s15 + $0x38] sm:$0xff]   ;;  %v3800_v12 = vld [vmem:[%s3925_s15 + $0x40] sm:$0xff]   ;;  %v3801_v13 = vld [vmem:[%s3925_s15 + $0x48] sm:$0xff]  }
  0x15   : > { %3550 = vmatprep.mubr.msk.bf16.mxu1 %vm3828_vm0, %v5335_v1  ;;  %v3802_v14 = vld [vmem:[%s3925_s15 + $0x50] sm:$0xff]   ;;  %1428 = vperm.xlu0 %3789, %v1372_v18   ;;  %v3803_v19 = vld [vmem:[%s3925_s15 + $0x58] sm:$0xff]   ;;  %v3804_v24 = vld [vmem:[%s3925_s15 + $0x60] sm:$0xff]  }
  0x16   : > { %1438 = vperm.xlu1 %3790, %v1374_v20   ;;  %v3805_v29 = vld [vmem:[%s3925_s15 + $0x68] sm:$0xff]   ;;  %v3806_v34 = vld [vmem:[%s3925_s15 + $0x70] sm:$0xff]   ;;  %v1390_v37 = vld [vmem:[%s5322_s1 + $0x98] sm:$0xff] }
  0x17   : > { %v1388_v35 = vld [vmem:[%s5322_s1 + $0x88] sm:$0xff]  ;;  %v1389_v36 = vld [vmem:[%s5322_s1 + $0x90] sm:$0xff]  ;;  %v1391_v38 = vld [vmem:[%s5322_s1 + $0xa0] sm:$0xff] }
  0x18   : > { %v3807_v39 = vld [vmem:[%s3925_s15 + $0x78] sm:$0xff]   ;;  %v1392_v40 = vld [vmem:[%s5322_s1 + $0xa8] sm:$0xff]  ;;  %v1393_v41 = vld [vmem:[%s5322_s1 + $0xb0] sm:$0xff] }
  0x19   : > { %1443 = vperm.xlu0 %3789, %v1375_v21   ;;  %v1381_v42 = vld [vmem:[%s5322_s1 + $0x50] sm:$0xff]  ;;  %v1396_v43 = vld [vmem:[%s5322_s1 + $0xc8] sm:$0xff]  ;;  %v3808_v44 = vld [vmem:[%s3925_s15 + $0x80] sm:$0xff]  }
  0x1a   : > { %3459 = vmatmul.mubr.msk.bf16.gmra.mxu0 %vm625_vm1, %v3793_v3  ;;  %1448 = vperm.xlu1 %3790, %v1376_v22   ;;  %v1397_v45 = vld [vmem:[%s5322_s1 + $0xd0] sm:$0xff]  ;;  %v1398_v46 = vld [vmem:[%s5322_s1 + $0xd8] sm:$0xff]  ;;  %v1399_v47 = vld [vmem:[%s5322_s1 + $0xe0] sm:$0xff] }
  0x1b   : > { %3462 = vmatprep.mubr.msk.bf16.mxu0 %vm3828_vm0, %v5335_v1  ;;  %v1400_v48 = vld [vmem:[%s5322_s1 + $0xe8] sm:$0xff]  ;;  %v1401_v50 = vld [vmem:[%s5322_s1 + $0xf0] sm:$0xff]  ;;  %v1402_v51 = vld [vmem:[%s5322_s1 + $0xf8] sm:$0xff] }
  0x1c   : > { %3551 = vmatmul.mubr.msk.bf16.gmra.mxu1 %vm625_vm1, %v3816_v10  ;;  %v3809_v49 = vld [vmem:[%s3925_s15 + $0x88] sm:$0xff]   ;;  %v1403_v52 = vld [vmem:[%s5322_s1 + $0x100] sm:$0xff]  ;;  %v3810_v54 = vld [vmem:[%s3925_s15 + $0x90] sm:$0xff]  }
  0x1d   : > { %3556 = vmatprep.mubr.msk.bf16.mxu1 %vm3828_vm0, %v5335_v1  ;;  %1453 = vperm.xlu0 %3789, %v1377_v23   ;;  %v1404_v53 = vld [vmem:[%s5322_s1 + $0x108] sm:$0xff]  ;;  %v1405_v55 = vld [vmem:[%s5322_s1 + $0x110] sm:$0xff]  ;;  %v1410_v58 = vld [vmem:[%s5322_s1 + $0x138] sm:$0xff] }
  0x1e   : > { %1458 = vperm.xlu1 %3790, %v1378_v25   ;;  %v1408_v56 = vld [vmem:[%s5322_s1 + $0x128] sm:$0xff]  ;;  %v1409_v57 = vld [vmem:[%s5322_s1 + $0x130] sm:$0xff]  ;;  %v3811_v59 = vld [vmem:[%s3925_s15 + $0x98] sm:$0xff]  }
  0x1f   : > { %v1411_v60 = vld [vmem:[%s5322_s1 + $0x140] sm:$0xff]  ;;  %v1412_v61 = vld [vmem:[%s5322_s1 + $0x148] sm:$0xff]  ;;  %v1413_v62 = vld [vmem:[%s5322_s1 + $0x150] sm:$0xff] }
  0x20   : > { %v1414_v63 = vld [vmem:[%s5322_s1 + $0x158] sm:$0xff]  ;;  %v3812_v0 = vld [vmem:[%s3925_s15 + $0xa0] sm:$0xff]   ;;  %v1416_v3 = vld [vmem:[%s5322_s1 + $0x168] sm:$0xff] }
  0x21   : > { %1463 = vperm.xlu0 %3789, %v1379_v26   ;;  %v1415_v2 = vld [vmem:[%s5322_s1 + $0x160] sm:$0xff]  ;;  %v1382_v8 = vld [vmem:[%s5322_s1 + $0x58] sm:$0xff] }
  0x22   : > { %3463 = vmatmul.mubr.msk.bf16.gmra.mxu0 %vm625_vm1, %v3794_v4  ;;  %1468 = vperm.xlu1 %3790, %v1380_v27   ;;  %v1417_v4 = vld [vmem:[%s5322_s1 + $0x170] sm:$0xff]  ;;  %v1395_v10 = vld [vmem:[%s5322_s1 + $0xc0] sm:$0xff] }
  0x23   : > { %3466 = vmatprep.mubr.msk.bf16.mxu0 %vm3828_vm0, %v5335_v1 }
  0x25   : > { %1483 = vperm.xlu0 %3789, %v1383_v28  }
  0x26   : > { %1488 = vperm.xlu1 %3790, %v1384_v30  }
  0x29   : > { %1493 = vperm.xlu0 %3789, %v1385_v31  }
  0x2a   : > { %3467 = vmatmul.mubr.msk.bf16.gmra.mxu0 %vm625_vm1, %v3795_v5  ;;  %1498 = vperm.xlu1 %3790, %v1386_v32   ;;  %v1418_v5 = vld [vmem:[%s5322_s1 + $0x178] sm:$0xff] }
  0x2b   : > { %3470 = vmatprep.mubr.msk.bf16.mxu0 %vm3828_vm0, %v5335_v1 }
  0x2d   : > { %1503 = vperm.xlu0 %3789, %v1387_v33  }
  0x2e   : > { %1508 = vperm.xlu1 %3790, %v1388_v35  }
  0x31   : > { %1513 = vperm.xlu0 %3789, %v1389_v36  }
  0x32   : > { %3471 = vmatmul.mubr.msk.bf16.gmra.mxu0 %vm625_vm1, %v3796_v6  ;;  %1518 = vperm.xlu1 %3790, %v1390_v37   ;;  %v3813_v6 = vld [vmem:[%s3925_s15 + $0xa8] sm:$0xff]  }
  0x33   : > { %3474 = vmatprep.mubr.msk.bf16.mxu0 %vm3828_vm0, %v5335_v1 }
  0x35   : > { %1523 = vperm.xlu0 %3789, %v1391_v38  }
  0x36   : > { %1528 = vperm.xlu1 %3790, %v1392_v40  }
  0x39   : > { %1533 = vperm.xlu0 %3789, %v1393_v41  }
  0x3a   : > { %3475 = vmatmul.mubr.msk.bf16.gmra.mxu0 %vm625_vm1, %v3797_v7  ;;  %1473 = vperm.xlu1 %3790, %v1381_v42   ;;  %v1406_v7 = vld [vmem:[%s5322_s1 + $0x118] sm:$0xff] }
  0x3b   : > { %3478 = vmatprep.mubr.msk.bf16.mxu0 %vm3828_vm0, %v5335_v1 }
  0x3d   : > { %1548 = vperm.xlu0 %3789, %v1396_v43  }
  0x3e   : > { %1553 = vperm.xlu1 %3790, %v1397_v45  }
  0x41   : > { %1558 = vperm.xlu0 %3789, %v1398_v46  }
  0x42   : > { %3479 = vmatmul.mubr.msk.bf16.gmra.mxu0 %vm625_vm1, %v3798_v9  ;;  %1563 = vperm.xlu1 %3790, %v1399_v47   ;;  %v1394_v9 = vld [vmem:[%s5322_s1 + $0xb8] sm:$0xff] }
  0x43   : > { %3482 = vmatprep.mubr.msk.bf16.mxu0 %vm3828_vm0, %v5335_v1 }
  0x45   : > { %1568 = vperm.xlu0 %3789, %v1400_v48  }
  0x46   : > { %1573 = vperm.xlu1 %3790, %v1401_v50  }
  0x49   : > { %1578 = vperm.xlu0 %3789, %v1402_v51  }
  0x4a   : > { %3483 = vmatmul.mubr.msk.bf16.gmra.mxu0 %vm625_vm1, %v3799_v11  ;;  %1583 = vperm.xlu1 %3790, %v1403_v52   ;;  %v3815_v11 = vld [vmem:[%s3925_s15 + $0xb0] sm:$0xff]  }
  0x4b   : > { %3486 = vmatprep.mubr.msk.bf16.mxu0 %vm3828_vm0, %v5335_v1 }
  0x4d   : > { %1588 = vperm.xlu0 %3789, %v1404_v53  }
  0x4e   : > { %1593 = vperm.xlu1 %3790, %v1405_v55  }
  0x51   : > { %1608 = vperm.xlu0 %3789, %v1408_v56  }
  0x52   : > { %3487 = vmatmul.mubr.msk.bf16.gmra.mxu0 %vm625_vm1, %v3800_v12  ;;  %1613 = vperm.xlu1 %3790, %v1409_v57   ;;  %v1407_v12 = vld [vmem:[%s5322_s1 + $0x120] sm:$0xff] }
  0x53   : > { %3490 = vmatprep.mubr.msk.bf16.mxu0 %vm3828_vm0, %v5335_v1 }
  0x55   : > { %1618 = vperm.xlu0 %3789, %v1410_v58  }
  0x56   : > { %1623 = vperm.xlu1 %3790, %v1411_v60  }
  0x59   : > { %1628 = vperm.xlu0 %3789, %v1412_v61  }
  0x5a   : > { %3491 = vmatmul.mubr.msk.bf16.gmra.mxu0 %vm625_vm1, %v3801_v13  ;;  %1633 = vperm.xlu1 %3790, %v1413_v62   ;;  %v1419_v13 = vld [vmem:[%s5322_s1 + $0x180] sm:$0xff] }
  0x5b   : > { %3494 = vmatprep.mubr.msk.bf16.mxu0 %vm3828_vm0, %v5335_v1 }
  0x5d   : > { %1638 = vperm.xlu0 %3789, %v1414_v63  }
  0x5e   : > { %1643 = vperm.xlu1 %3790, %v1415_v2  }
  0x61   : > { %1648 = vperm.xlu0 %3789, %v1416_v3  }
  0x62   : > { %3495 = vmatmul.mubr.msk.bf16.gmra.mxu0 %vm625_vm1, %v3802_v14  ;;  %1653 = vperm.xlu1 %3790, %v1417_v4   ;;  %v1420_v14 = vld [vmem:[%s5322_s1 + $0x188] sm:$0xff] }
  0x63   : > { %3498 = vmatprep.mubr.msk.bf16.mxu0 %vm3828_vm0, %v5335_v1 }
  0x65   : > { %1658 = vperm.xlu0 %3789, %v1418_v5  }
  0x66   : > { %1598 = vperm.xlu1 %3790, %v1406_v7  }
  0x69   : > { %1478 = vperm.xlu0 %3789, %v1382_v8  }
  0x6a   : > { %3499 = vmatmul.mubr.msk.bf16.gmra.mxu0 %vm625_vm1, %v3803_v19  ;;  %1538 = vperm.xlu1 %3790, %v1394_v9  }
  0x6b   : > { %3502 = vmatprep.mubr.msk.bf16.mxu0 %vm3828_vm0, %v5335_v1 }
  0x6d   : > { %1543 = vperm.xlu0 %3789, %v1395_v10  }
  0x6e   : > { %1603 = vperm.xlu1 %3790, %v1407_v12  }
  0x71   : > { %1663 = vperm.xlu0 %3789, %v1419_v13  }
  0x72   : > { %3503 = vmatmul.mubr.msk.bf16.gmra.mxu0 %vm625_vm1, %v3804_v24  ;;  %1668 = vperm.xlu1 %3790, %v1420_v14  }
  0x73   : > { %3506 = vmatprep.mubr.msk.bf16.mxu0 %vm3828_vm0, %v5335_v1 }
  0x7a   : > { %3507 = vmatmul.mubr.msk.bf16.gmra.mxu0 %vm625_vm1, %v3805_v29 }
  0x7b   : > { %3510 = vmatprep.mubr.msk.bf16.mxu0 %vm3828_vm0, %v5335_v1 }
  0x82   : > { %3511 = vmatmul.mubr.msk.bf16.gmra.mxu0 %vm625_vm1, %v3806_v34 }
  0x83   : > { %3514 = vmatprep.mubr.msk.bf16.mxu0 %vm3828_vm0, %v5335_v1 }
  0x8a   : > { %3515 = vmatmul.mubr.msk.bf16.gmra.mxu0 %vm625_vm1, %v3807_v39 }
  0x8b   : > { %3518 = vmatprep.mubr.msk.bf16.mxu0 %vm3828_vm0, %v5335_v1 }
  0x92   : > { %3519 = vmatmul.mubr.msk.bf16.gmra.mxu0 %vm625_vm1, %v3808_v44 }
  0x93   : > { %3522 = vmatprep.mubr.msk.bf16.mxu0 %vm3828_vm0, %v5335_v1 }
  0x9a   : > { %3523 = vmatmul.mubr.msk.bf16.gmra.mxu0 %vm625_vm1, %v3809_v49 }
  0x9b   : > { %3526 = vmatprep.mubr.msk.bf16.mxu0 %vm3828_vm0, %v5335_v1 }
  0xa2   : > { %3527 = vmatmul.mubr.msk.bf16.gmra.mxu0 %vm625_vm1, %v3810_v54 }
  0xa3   : > { %3530 = vmatprep.mubr.msk.bf16.mxu0 %vm3828_vm0, %v5335_v1 }
  0xaa   : > { %3531 = vmatmul.mubr.msk.bf16.gmra.mxu0 %vm625_vm1, %v3811_v59 }
  0xab   : > { %3534 = vmatprep.mubr.msk.bf16.mxu0 %vm3828_vm0, %v5335_v1 }
  0xb2   : > { %3535 = vmatmul.mubr.msk.bf16.gmra.mxu0 %vm625_vm1, %v3812_v0 }
  0xb3   : > { %3538 = vmatprep.mubr.msk.bf16.mxu0 %vm3828_vm0, %v5335_v1 }
  0xba   : > { %3539 = vmatmul.mubr.msk.bf16.gmra.mxu0 %vm625_vm1, %v3813_v6 }
  0xbb   : > { %3542 = vmatprep.mubr.msk.bf16.mxu0 %vm3828_vm0, %v5335_v1 }
  0xc2   : > { %3543 = vmatmul.mubr.msk.bf16.gmra.mxu0 %vm625_vm1, %v3815_v11 }
  0xc3   : > { %3666 = vmatprep.mubr.msk.bf16.mxu0 %vm3828_vm0, %v5335_v1 }
  0xd2   : > { %v4177_v15 = vpop.f32.mrf.mxu0 }
  0xd3   : > { %v1040_v7 = vmul.f32 %v4177_v15, %v4177_v15  ;;  %v935_v11 = vsel %vm934_vm2, %v4177_v15, 0.0 }
  0xd4   : > { %v3456_v16 = vpop.f32.mrf.mxu0  ;;  %v4199_v37 = vpop.f32.mrf.mxu1 }
  0xd5   : > { %5341 = vst [vmem:[#allocation4_spill] sm:$0xff] %v4199_v37 }
  0xd6   : > { %v4179_v17 = vpop.f32.mrf.mxu0  ;;  %v3548_v39 = vpop.f32.mrf.mxu1 }
  0xd7   : > { %v1041_v5 = vmul.f32 %v4179_v17, %v4179_v17  ;;  %v936_v8 = vsel %vm934_vm2, %v4179_v17, 0.0 }
  0xd8   : > { %v3457_v18 = vpop.f32.mrf.mxu0  ;;  %v4203_v41 = vpop.f32.mrf.mxu1  ;;  %v937_v16 = vadd.f32 %v936_v8, %v935_v11 }
  0xd9   : > { %5342 = vst [vmem:[#allocation5_spill] sm:$0xff] %v4203_v41  ;;  %v1091_v12 = vsel %vm934_vm2, %v1041_v5, 0.0 }
  0xda   : > { %v4181_v19 = vpop.f32.mrf.mxu0  ;;  %v3549_v43 = vpop.f32.mrf.mxu1 }
  0xdb   : > { %v1042_v9 = vmul.f32 %v4181_v19, %v4181_v19  ;;  %v938_v13 = vsel %vm934_vm2, %v4181_v19, 0.0 }
  0xdc   : > { %v3460_v20 = vpop.f32.mrf.mxu0  ;;  %v4207_v45 = vpop.f32.mrf.mxu1 }
  0xdd   : > { %v1090_v20 = vsel %vm934_vm2, %v1040_v7, 0.0 }
  0xde   : > { %v4183_v21 = vpop.f32.mrf.mxu0  ;;  %v3552_v47 = vpop.f32.mrf.mxu1 }
  0xdf   : > { %v1043_v14 = vmul.f32 %v4183_v21, %v4183_v21 }
  0xe0   : > { %v3461_v22 = vpop.f32.mrf.mxu0  ;;  %v4211_v49 = vpop.f32.mrf.mxu1 }
  0xe1   : > { %v1093_v22 = vsel %vm934_vm2, %v1042_v9, 0.0 }
  0xe2   : > { %v4185_v23 = vpop.f32.mrf.mxu0  ;;  %v3553_v51 = vpop.f32.mrf.mxu1 }
  0xe4   : > { %v3464_v24 = vpop.f32.mrf.mxu0 }
  0xe5   : > { %v940_v24 = vsel %vm934_vm2, %v4183_v21, 0.0 }
  0xe6   : > { %v4187_v25 = vpop.f32.mrf.mxu0 }
  0xe7   : > { %v1045_v39 = vmul.f32 %v4187_v25, %v4187_v25 }
  0xe8   : > { %v3465_v26 = vpop.f32.mrf.mxu0 }
  0xe9   : > { %v1044_v26 = vmul.f32 %v4185_v23, %v4185_v23 }
  0xea   : > { %v4189_v27 = vpop.f32.mrf.mxu0 }
  0xeb   : > { %v1097_v47 = vsel %vm934_vm2, %v1044_v26, 0.0  ;;  %v1046_v51 = vmul.f32 %v4189_v27, %v4189_v27 }
  0xec   : > { %v3468_v28 = vpop.f32.mrf.mxu0 }
  0xed   : > { %v1092_v28 = vadd.f32 %v1091_v12, %v1090_v20 }
  0xee   : > { %v4191_v29 = vpop.f32.mrf.mxu0 }
  0xef   : > { %v948_v7 = vsel %vm934_vm2, %v4191_v29, 0.0 }
  0xf0   : > { %v3469_v30 = vpop.f32.mrf.mxu0 }
  0xf1   : > { %v939_v30 = vadd.f32 %v938_v13, %v937_v16 }
  0xf2   : > { %v4193_v31 = vpop.f32.mrf.mxu0 }
  0xf3   : > { %v941_v43 = vadd.f32 %v940_v24, %v939_v30  ;;  %v1048_v8 = vmul.f32 %v4193_v31, %v4193_v31 }
  0xf4   : > { %v3472_v32 = vpop.f32.mrf.mxu0 }
  0xf5   : > { %v1105_v24 = vsel %vm934_vm2, %v1048_v8, 0.0 }
  0xf6   : > { %v4195_v33 = vpop.f32.mrf.mxu0 }
  0xf7   : > { %v1049_v16 = vmul.f32 %v4195_v33, %v4195_v33  ;;  %v952_v26 = vsel %vm934_vm2, %v4195_v33, 0.0 }
  0xf8   : > { %v3473_v34 = vpop.f32.mrf.mxu0 }
  0xf9   : > { %v1095_v34 = vsel %vm934_vm2, %v1043_v14, 0.0  ;;  %v950_v14 = vsel %vm934_vm2, %v4193_v31, 0.0 }
  0xfa   : > { %v4197_v35 = vpop.f32.mrf.mxu0 }
  0xfc   : > { %v3476_v36 = vpop.f32.mrf.mxu0 }
  0xfd   : > { %v942_v36 = vsel %vm934_vm2, %v4185_v23, 0.0 }
  0xfe   : > { %v4201_v38 = vpop.f32.mrf.mxu0 }
 0x100   : > { %v3477_v40 = vpop.f32.mrf.mxu0 }
 0x101   : > { %v1094_v40 = vadd.f32 %v1093_v22, %v1092_v28  ;;  %v1050_v28 = vmul.f32 %v4197_v35, %v4197_v35 }
 0x102   : > { %v4205_v42 = vpop.f32.mrf.mxu0 }
 0x104   : > { %v3480_v44 = vpop.f32.mrf.mxu0 }
 0x106   : > { %v4209_v46 = vpop.f32.mrf.mxu0 }
 0x108   : > { %v3481_v48 = vpop.f32.mrf.mxu0 }
 0x109   : > { %v944_v48 = vsel %vm934_vm2, %v4187_v25, 0.0 }
 0x10a   : > { %v4213_v50 = vpop.f32.mrf.mxu0 }
 0x10c   : > { %v3484_v52 = vpop.f32.mrf.mxu0 }
 0x10d   : > { %v1096_v52 = vadd.f32 %v1095_v34, %v1094_v40  ;;  %v954_v40 = vsel %vm934_vm2, %v4197_v35, 0.0 }
 0x10e   : > { %v4215_v53 = vpop.f32.mrf.mxu0 }
 0x110   : > { %v3485_v54 = vpop.f32.mrf.mxu0 }
 0x111   : > { %v943_v54 = vadd.f32 %v942_v36, %v941_v43  ;;  %v1051_v43 = vmul.f32 %v4201_v38, %v4201_v38 }
 0x112   : > { %v4217_v55 = vpop.f32.mrf.mxu0 }
 0x114   : > { %v3488_v56 = vpop.f32.mrf.mxu0 }
 0x116   : > { %v4219_v57 = vpop.f32.mrf.mxu0 }
 0x118   : > { %v3489_v58 = vpop.f32.mrf.mxu0 }
 0x119   : > { %v1099_v58 = vsel %vm934_vm2, %v1045_v39, 0.0  ;;  %v1107_v39 = vsel %vm934_vm2, %v1049_v16, 0.0 }
 0x11a   : > { %v4221_v59 = vpop.f32.mrf.mxu0 }
 0x11c   : > { %v3492_v60 = vpop.f32.mrf.mxu0 }
 0x11d   : > { %v946_v60 = vsel %vm934_vm2, %v4189_v27, 0.0 }
 0x11e   : > { %v4223_v61 = vpop.f32.mrf.mxu0 }
 0x120   : > { %v3493_v62 = vpop.f32.mrf.mxu0 }
 0x121   : > { %v1047_v62 = vmul.f32 %v4191_v29, %v4191_v29 }
 0x122   : > { %v4225_v63 = vpop.f32.mrf.mxu0 }
 0x123   : > { %v1103_v13 = vsel %vm934_vm2, %v1047_v62, 0.0 }
 0x124   : > { %v3496_v0 = vpop.f32.mrf.mxu0 }
 0x125   : > { %v1098_v0 = vadd.f32 %v1097_v47, %v1096_v52  ;;  %v956_v52 = vsel %vm934_vm2, %v4201_v38, 0.0 }
 0x126   : > { %v4227_v2 = vpop.f32.mrf.mxu0 }
 0x127   : > { %v1100_v9 = vadd.f32 %v1099_v58, %v1098_v0  ;;  %v1111_v0 = vsel %vm934_vm2, %v1051_v43, 0.0 }
 0x128   : > { %v3497_v3 = vpop.f32.mrf.mxu0 }
 0x129   : > { %v945_v3 = vadd.f32 %v944_v48, %v943_v54  ;;  %v1052_v54 = vmul.f32 %v4205_v42, %v4205_v42 }
 0x12a   : > { %v4229_v4 = vpop.f32.mrf.mxu0 }
 0x12b   : > { %v947_v11 = vadd.f32 %v946_v60, %v945_v3  ;;  %v958_v3 = vsel %vm934_vm2, %v4205_v42, 0.0 }
 0x12c   : > { %v3500_v6 = vpop.f32.mrf.mxu0 }
 0x12d   : > { %v1101_v6 = vsel %vm934_vm2, %v1046_v51, 0.0  ;;  %v949_v20 = vadd.f32 %v948_v7, %v947_v11  ;;  %v1109_v51 = vsel %vm934_vm2, %v1050_v28, 0.0  ;;  %v960_v11 = vsel %vm934_vm2, %v4209_v46, 0.0 }
 0x12e   : > { %v4239_v10 = vpop.f32.mrf.mxu0 }
 0x12f   : > { %v951_v34 = vadd.f32 %v950_v14, %v949_v20 }
 0x130   : > { %v3501_v18 = vpop.f32.mrf.mxu0 }
 0x131   : > { %v1102_v18 = vadd.f32 %v1101_v6, %v1100_v9  ;;  %v953_v47 = vadd.f32 %v952_v26, %v951_v34  ;;  %v1113_v9 = vsel %vm934_vm2, %v1052_v54, 0.0 }
 0x132   : > { %v4254_v32 = vpop.f32.mrf.mxu0 }
 0x133   : > { %v1104_v30 = vadd.f32 %v1103_v13, %v1102_v18  ;;  %v955_v60 = vadd.f32 %v954_v40, %v953_v47  ;;  %v1054_v13 = vmul.f32 %v4213_v50, %v4213_v50  ;;  %v1056_v40 = vmul.f32 %v4217_v55, %v4217_v55 }
 0x134   : > { %v3504_v44 = vpop.f32.mrf.mxu0 }
 0x135   : > { %v1106_v44 = vadd.f32 %v1105_v24, %v1104_v30  ;;  %v957_v7 = vadd.f32 %v956_v52, %v955_v60  ;;  %v1055_v24 = vmul.f32 %v4215_v53, %v4215_v53  ;;  %v1117_v34 = vsel %vm934_vm2, %v1054_v13, 0.0 }
 0x136   : > { %v4266_v56 = vpop.f32.mrf.mxu0  ;;  %v1057_v52 = vmul.f32 %v4219_v57, %v4219_v57  ;;  %v1059_v13 = vmul.f32 %v4223_v61, %v4223_v61 }
 0x137   : > { %v1108_v58 = vadd.f32 %v1107_v39, %v1106_v44  ;;  %v959_v16 = vadd.f32 %v958_v3, %v957_v7  ;;  %v964_v39 = vsel %vm934_vm2, %v4215_v53, 0.0  ;;  %v968_v3 = vsel %vm934_vm2, %v4219_v57, 0.0 }
 0x138   : > { %v3505_v5 = vpop.f32.mrf.mxu0 }
 0x139   : > { %v1053_v5 = vmul.f32 %v4209_v46, %v4209_v46  ;;  %v1110_v6 = vadd.f32 %v1109_v51, %v1108_v58  ;;  %v961_v28 = vadd.f32 %v960_v11, %v959_v16  ;;  %v966_v51 = vsel %vm934_vm2, %v4217_v55, 0.0 }
 0x13a   : > { %v4278_v12 = vpop.f32.mrf.mxu0  ;;  %v970_v11 = vsel %vm934_vm2, %v4221_v59, 0.0 }
 0x13b   : > { %v1112_v14 = vadd.f32 %v1111_v0, %v1110_v6  ;;  %v1115_v20 = vsel %vm934_vm2, %v1053_v5, 0.0  ;;  %v1121_v0 = vsel %vm934_vm2, %v1056_v40, 0.0  ;;  %v1058_v5 = vmul.f32 %v4221_v59, %v4221_v59 }
 0x13c   : > { %v3508_v22 = vpop.f32.mrf.mxu0  ;;  %v974_v40 = vsel %vm934_vm2, %v4225_v63, 0.0 }
 0x13d   : > { %v962_v22 = vsel %vm934_vm2, %v4213_v50, 0.0  ;;  %v1114_v26 = vadd.f32 %v1113_v9, %v1112_v14  ;;  %v1123_v9 = vsel %vm934_vm2, %v1057_v52, 0.0 }
 0x13e   : > { %v4290_v36 = vpop.f32.mrf.mxu0  ;;  %v963_v44 = vadd.f32 %v962_v22, %v961_v28  ;;  %v1125_v22 = vsel %vm934_vm2, %v1058_v5, 0.0 }
 0x13f   : > { %v1116_v43 = vadd.f32 %v1115_v20, %v1114_v26  ;;  %v1060_v26 = vmul.f32 %v4225_v63, %v4225_v63 }
 0x140   : > { %v3509_v48 = vpop.f32.mrf.mxu0  ;;  %v965_v58 = vadd.f32 %v964_v39, %v963_v44  ;;  %v1127_v39 = vsel %vm934_vm2, %v1059_v13, 0.0 }
 0x141   : > { %v1119_v48 = vsel %vm934_vm2, %v1055_v24, 0.0  ;;  %v1118_v54 = vadd.f32 %v1117_v34, %v1116_v43  ;;  %v972_v24 = vsel %vm934_vm2, %v4223_v61, 0.0  ;;  %v1061_v43 = vmul.f32 %v4227_v2, %v4227_v2 }
 0x142   : > { %v4302_v62 = vpop.f32.mrf.mxu0  ;;  %v967_v7 = vadd.f32 %v966_v51, %v965_v58  ;;  %v1129_v52 = vsel %vm934_vm2, %v1060_v26, 0.0  ;;  %v1062_v58 = vmul.f32 %v4229_v4, %v4229_v4 }
 0x143   : > { %v1120_v6 = vadd.f32 %v1119_v48, %v1118_v54  ;;  %v976_v54 = vsel %vm934_vm2, %v4227_v2, 0.0  ;;  %v1131_v5 = vsel %vm934_vm2, %v1061_v43, 0.0  ;;  %v4383_v43 = vpop.permute.xlu1 %1433 }
 0x144   : > { %v3512_v8 = vpop.f32.mrf.mxu0  ;;  %v969_v16 = vadd.f32 %v968_v3, %v967_v7  ;;  %v1063_v7 = vmul.f32 %v4239_v10, %v4239_v10  ;;  %5344 = vst [vmem:[#allocation7_spill] sm:$0xff] %v4383_v43 }
 0x145   : > { %v1122_v14 = vadd.f32 %v1121_v0, %v1120_v6  ;;  %v978_v6 = vsel %vm934_vm2, %v4229_v4, 0.0 }
 0x146   : > { %v4314_v18 = vpop.f32.mrf.mxu0 }
 0x147   : > { %v1124_v28 = vadd.f32 %v1123_v9, %v1122_v14  ;;  %v1133_v14 = vsel %vm934_vm2, %v1062_v58, 0.0  ;;  %v1066_v58 = vmul.f32 %v4278_v12, %v4278_v12 }
 0x148   : > { %v3513_v30 = vpop.f32.mrf.mxu0 }
 0x149   : > { %v971_v30 = vadd.f32 %v970_v11, %v969_v16  ;;  %v1126_v44 = vadd.f32 %v1125_v22, %v1124_v28  ;;  %v980_v16 = vsel %vm934_vm2, %v4239_v10, 0.0  ;;  %v4374_v22 = vpop.permute.xlu0 %1423 }
 0x14a   : > { %v4326_v47 = vpop.f32.mrf.mxu0  ;;  %5343 = vst [vmem:[#allocation6_spill] sm:$0xff] %v4374_v22 }
 0x14b   : > { %v973_v48 = vadd.f32 %v972_v24, %v971_v30  ;;  %v1135_v30 = vsel %vm934_vm2, %v1063_v7, 0.0  ;;  %v1067_v7 = vmul.f32 %v4290_v36, %v4290_v36 }
 0x14c   : > { %v3516_v60 = vpop.f32.mrf.mxu0 }
 0x14d   : > { %v1128_v60 = vadd.f32 %v1127_v39, %v1126_v44  ;;  %v975_v0 = vadd.f32 %v974_v40, %v973_v48  ;;  %v982_v39 = vsel %vm934_vm2, %v4254_v32, 0.0  ;;  %v1065_v40 = vmul.f32 %v4266_v56, %v4266_v56 }
 0x14e   : > { %v4338_v8 = vpop.f32.mrf.mxu0 }
 0x14f   : > { %v1130_v9 = vadd.f32 %v1129_v52, %v1128_v60  ;;  %v977_v11 = vadd.f32 %v976_v54, %v975_v0  ;;  %v984_v54 = vsel %vm934_vm2, %v4266_v56, 0.0 }
 0x150   : > { %v3517_v20 = vpop.f32.mrf.mxu0 }
 0x151   : > { %v1064_v20 = vmul.f32 %v4254_v32, %v4254_v32  ;;  %v1132_v24 = vadd.f32 %v1131_v5, %v1130_v9  ;;  %v979_v26 = vadd.f32 %v978_v6, %v977_v11  ;;  %v1139_v32 = vsel %vm934_vm2, %v1065_v40, 0.0  ;;  %v4397_v9 = vpop.permute.xlu0 %1428 }
 0x152   : > { %v4350_v34 = vpop.f32.mrf.mxu0  ;;  %v986_v6 = vsel %vm934_vm2, %v4278_v12, 0.0  ;;  %5345 = vst [vmem:[#allocation8_spill] sm:$0xff] %v4397_v9 }
 0x153   : > { %v1134_v44 = vadd.f32 %v1133_v14, %v1132_v24  ;;  %v981_v48 = vadd.f32 %v980_v16, %v979_v26  ;;  %v1137_v52 = vsel %vm934_vm2, %v1064_v20, 0.0  ;;  %v1141_v16 = vsel %vm934_vm2, %v1066_v58, 0.0  ;;  %v4404_v26 = vpop.permute.xlu1 %1438 }
 0x154   : > { %v3520_v51 = vpop.f32.mrf.mxu0  ;;  %v988_v20 = vsel %vm934_vm2, %v4290_v36, 0.0  ;;  %v1068_v24 = vmul.f32 %v4302_v62, %v4302_v62  ;;  %5346 = vst [vmem:[#allocation9_spill] sm:$0xff] %v4404_v26 }
 0x155   : > { %v1136_v60 = vadd.f32 %v1135_v30, %v1134_v44  ;;  %v983_v0 = vadd.f32 %v982_v39, %v981_v48  ;;  %v1143_v44 = vsel %vm934_vm2, %v1067_v7, 0.0  ;;  %v990_v48 = vsel %vm934_vm2, %v4302_v62, 0.0 }
 0x156   : > { %v4362_v3 = vpop.f32.mrf.mxu0 }
 0x157   : > { %v1138_v11 = vadd.f32 %v1137_v52, %v1136_v60  ;;  %v1145_v60 = vsel %vm934_vm2, %v1068_v24, 0.0  ;;  %v4427_v24 = vpop.permute.xlu1 %1448 }
 0x158   : > { %v3521_v13 = vpop.f32.mrf.mxu0  ;;  %5348 = vst [vmem:[#allocation11_spill] sm:$0xff] %v4427_v24  ;;  %v998_v24 = vsel %vm934_vm2, %v4350_v34, 0.0 }
 0x159   : > { %v985_v13 = vadd.f32 %v984_v54, %v983_v0  ;;  %v1140_v30 = vadd.f32 %v1139_v32, %v1138_v11  ;;  %v992_v0 = vsel %vm934_vm2, %v4314_v18, 0.0  ;;  %v1070_v32 = vmul.f32 %v4326_v47, %v4326_v47 }
 0x15a   : > { %v4376_v28 = vpop.f32.mrf.mxu0 }
 0x15b   : > { %v987_v39 = vadd.f32 %v986_v6, %v985_v13  ;;  %v1142_v52 = vadd.f32 %v1141_v16, %v1140_v30  ;;  %v4418_v6 = vpop.permute.xlu0 %1443  ;;  %v994_v16 = vsel %vm934_vm2, %v4326_v47, 0.0  ;;  %v1149_v1 = vsel %vm934_vm2, %v1070_v32, 0.0 }
 0x15c   : > { %v3524_v51 = vpop.f32.mrf.mxu0  ;;  %5347 = vst [vmem:[#allocation10_spill] sm:$0xff] %v4418_v6 }
 0x15d   : > { %v1069_v51 = vmul.f32 %v4314_v18, %v4314_v18  ;;  %v989_v54 = vadd.f32 %v988_v20, %v987_v39  ;;  %v1144_v7 = vadd.f32 %v1143_v44, %v1142_v52  ;;  %v1071_v20 = vmul.f32 %v4338_v8, %v4338_v8 }
 0x15e   : > { %v4390_v5 = vpop.f32.mrf.mxu0  ;;  %v996_v44 = vsel %vm934_vm2, %v4338_v8, 0.0 }
 0x15f   : > { %v991_v11 = vadd.f32 %v990_v48, %v989_v54  ;;  %v1146_v30 = vadd.f32 %v1145_v60, %v1144_v7  ;;  %v1072_v48 = vmul.f32 %v4350_v34, %v4350_v34  ;;  %v1151_v6 = vsel %vm934_vm2, %v1071_v20, 0.0 }
 0x160   : > { %v3525_v14 = vpop.f32.mrf.mxu0  ;;  %v1073_v60 = vmul.f32 %v4362_v3, %v4362_v3  ;;  %v1000_v20 = vsel %vm934_vm2, %v4362_v3, 0.0 }
 0x161   : > { %v1147_v14 = vsel %vm934_vm2, %v1069_v51, 0.0  ;;  %v993_v39 = vadd.f32 %v992_v0, %v991_v11  ;;  %v4441_v0 = vpop.permute.xlu0 %1453 }
 0x162   : > { %v4406_v40 = vpop.f32.mrf.mxu0  ;;  %v1148_v51 = vadd.f32 %v1147_v14, %v1146_v30  ;;  %5349 = vst [vmem:[#allocation12_spill] sm:$0xff] %v4441_v0  ;;  %v1786_v14 = vld [vmem:[%s5328_s7] sm:$0xf]  ;;  %v1074_v30 = vmul.f32 %v4376_v28, %v4376_v28  ;;  %v5351_v0 = vmov 0.0  }
 0x163   : > { %v995_v52 = vadd.f32 %v994_v16, %v993_v39  ;;  %v1153_v16 = vsel %vm934_vm2, %v1072_v48, 0.0  ;;  %v4451_v39 = vpop.permute.xlu1 %1458  ;;  %v1002_v48 = vsel %vm934_vm2, %v4376_v28, 0.0 }
 0x164   : > { %v3528_v58 = vpop.f32.mrf.mxu0  ;;  %v1150_v32 = vadd.f32 %v1149_v1, %v1148_v51  ;;  %5350 = vst [vmem:[#allocation13_spill] sm:$0xff] %v4451_v39 }
 0x165   : > { %v997_v7 = vadd.f32 %v996_v44, %v995_v52  ;;  %v1155_v52 = vsel %vm934_vm2, %v1073_v60, 0.0  ;;  %v1004_v60 = vsel %vm934_vm2, %v4390_v5, 0.0 }
 0x166   : > { %v4420_v13 = vpop.f32.mrf.mxu0  ;;  %v1152_v1 = vadd.f32 %v1151_v6, %v1150_v32  ;;  %v3331_v6 = vld [vmem:[%s5328_s7 + $0x14] sm:$0xf]  ;;  %v1076_v32 = vmul.f32 %v4406_v40, %v4406_v40 }
 0x167   : > { %v999_v44 = vadd.f32 %v998_v24, %v997_v7  ;;  %v1157_v24 = vsel %vm934_vm2, %v1074_v30, 0.0  ;;  %v4470_v7 = vpop.permute.xlu0 %1463  ;;  %v1006_v30 = vsel %vm934_vm2, %v4406_v40, 0.0 }
 0x168   : > { %v3529_v58 = vpop.f32.mrf.mxu0  ;;  %v1154_v26 = vadd.f32 %v1153_v16, %v1152_v1  ;;  %5352 = vst [vmem:[#allocation14_spill] sm:$0xff] %v4470_v7  ;;  %v1077_v1 = vmul.f32 %v4420_v13, %v4420_v13 }
 0x169   : > { %v1804_v58 = vsel %vm1802_vm3, %v1786_v14, 0  ;;  %v1001_v43 = vadd.f32 %v1000_v20, %v999_v44  ;;  %v2474_v14 = vsel %vm1802_vm3, %v3331_v6, 0  ;;  %v4480_v44 = vpop.permute.xlu1 %1468 }
 0x16a   : > { %v4434_v54 = vpop.f32.mrf.mxu0  ;;  %3555 = vmatpush3.bf16.msra.mxu1 %v1804_v58  ;;  %v1156_v58 = vadd.f32 %v1155_v52, %v1154_v26  ;;  %3665 = vmatpush3.bf16.msra.mxu0 %v2474_v14  ;;  %5354 = vst [vmem:[#allocation16_spill] sm:$0xff] %v4480_v44  ;;  %v1008_v26 = vsel %vm934_vm2, %v4420_v13, 0.0  ;;  %v1163_v14 = vsel %vm934_vm2, %v1077_v1, 0.0 }
 0x16b   : > { %3576 = vmatprep.subr.bf16.mxu1 %v5351_v0  ;;  %v1003_v16 = vadd.f32 %v1002_v48, %v1001_v43  ;;  %3708 = vmatprep.subr.bf16.mxu0 %v5351_v0  ;;  %v1161_v43 = vsel %vm934_vm2, %v1076_v32, 0.0  ;;  %v1078_v52 = vmul.f32 %v4434_v54, %v4434_v54  ;;  %v1010_v0 = vsel %vm934_vm2, %v4434_v54, 0.0 }
 0x16c   : > { %v3532_v11 = vpop.f32.mrf.mxu0  ;;  %v1158_v7 = vadd.f32 %v1157_v24, %v1156_v58 }
 0x16d   : > { %v1075_v11 = vmul.f32 %v4390_v5, %v4390_v5  ;;  %v1005_v9 = vadd.f32 %v1004_v60, %v1003_v16  ;;  %v4495_v60 = vpop.permute.xlu0 %1483 }
 0x16e   : > { %v4454_v51 = vpop.f32.mrf.mxu0  ;;  %5355 = vst [vmem:[#allocation17_spill] sm:$0xff] %v4495_v60 }
 0x16f   : > { %v1007_v40 = vadd.f32 %v1006_v30, %v1005_v9  ;;  %v1079_v24 = vmul.f32 %v4454_v51, %v4454_v51  ;;  %v1012_v9 = vsel %vm934_vm2, %v4454_v51, 0.0 }
 0x170   : > { %v3533_v39 = vpop.f32.mrf.mxu0 }
 0x171   : > { %v1159_v39 = vsel %vm934_vm2, %v1075_v11, 0.0  ;;  %v1009_v58 = vadd.f32 %v1008_v26, %v1007_v40  ;;  %v1167_v22 = vsel %vm934_vm2, %v1079_v24, 0.0  ;;  %v4512_v60 = vpop.permute.xlu0 %1493 }
 0x172   : > { %v4473_v20 = vpop.f32.mrf.mxu0  ;;  %v1160_v48 = vadd.f32 %v1159_v39, %v1158_v7  ;;  %v4502_v39 = vpop.permute.xlu1 %1488  ;;  %5357 = vst [vmem:[#allocation19_spill] sm:$0xff] %v4512_v60 }
 0x173   : > { %5353 = vst [vmem:[#allocation15_spill] sm:$0xff] %v4473_v20  ;;  %v1080_v7 = vmul.f32 %v4473_v20, %v4473_v20  ;;  %5356 = vst [vmem:[#allocation18_spill] sm:$0xff] %v4502_v39  ;;  %v1011_v1 = vadd.f32 %v1010_v0, %v1009_v58 }
 0x174   : > { %v3536_v6 = vpop.f32.mrf.mxu0  ;;  %v1162_v32 = vadd.f32 %v1161_v43, %v1160_v48  ;;  %v1014_v43 = vsel %vm934_vm2, %v4473_v20, 0.0 }
 0x175   : > { %v1165_v6 = vsel %vm934_vm2, %v1078_v52, 0.0  ;;  %v1013_v48 = vadd.f32 %v1012_v9, %v1011_v1 }
 0x176   : > { %v4488_v11 = vpop.f32.mrf.mxu0  ;;  %v1164_v30 = vadd.f32 %v1163_v14, %v1162_v32  ;;  %v4521_v20 = vpop.permute.xlu1 %1498 }
 0x177   : > { %v1081_v26 = vmul.f32 %v4488_v11, %v4488_v11  ;;  %v1016_v0 = vsel %vm934_vm2, %v4488_v11, 0.0  ;;  %v1015_v32 = vadd.f32 %v1014_v43, %v1013_v48  ;;  %5358 = vst [vmem:[#allocation20_spill] sm:$0xff] %v4521_v20 }
 0x178   : > { %v3537_v16 = vpop.f32.mrf.mxu0  ;;  %v1166_v52 = vadd.f32 %v1165_v6, %v1164_v30 }
 0x179   : > { %v1169_v16 = vsel %vm934_vm2, %v1080_v7, 0.0  ;;  %v1171_v39 = vsel %vm934_vm2, %v1081_v26, 0.0  ;;  %v1017_v30 = vadd.f32 %v1016_v0, %v1015_v32  ;;  %v4532_v26 = vpop.permute.xlu0 %1503 }
 0x17a   : > { %v4504_v44 = vpop.f32.mrf.mxu0  ;;  %v1168_v24 = vadd.f32 %v1167_v22, %v1166_v52  ;;  %5359 = vst [vmem:[#allocation21_spill] sm:$0xff] %v4532_v26  ;;  %v4539_v32 = vpop.permute.xlu1 %1508 }
 0x17b   : > { %v1082_v14 = vmul.f32 %v4504_v44, %v4504_v44  ;;  %v1018_v6 = vsel %vm934_vm2, %v4504_v44, 0.0  ;;  %5360 = vst [vmem:[#allocation22_spill] sm:$0xff] %v4539_v32 }
 0x17c   : > { %v3540_v40 = vpop.f32.mrf.mxu0  ;;  %v1170_v7 = vadd.f32 %v1169_v16, %v1168_v24  ;;  %v1019_v52 = vadd.f32 %v1018_v6, %v1017_v30 }
 0x17d   : > { %v1173_v40 = vsel %vm934_vm2, %v1082_v14, 0.0 }
 0x17e   : > { %v4518_v58 = vpop.f32.mrf.mxu0  ;;  %v1172_v43 = vadd.f32 %v1171_v39, %v1170_v7  ;;  %v4558_v32 = vpop.permute.xlu1 %1518 }
 0x17f   : > { %v1083_v9 = vmul.f32 %v4518_v58, %v4518_v58  ;;  %v1020_v22 = vsel %vm934_vm2, %v4518_v58, 0.0  ;;  %5362 = vst [vmem:[#allocation24_spill] sm:$0xff] %v4558_v32 }
 0x180   : > { %v3541_v1 = vpop.f32.mrf.mxu0  ;;  %v1174_v0 = vadd.f32 %v1173_v40, %v1172_v43  ;;  %v1021_v24 = vadd.f32 %v1020_v22, %v1019_v52  ;;  %v4550_v52 = vpop.permute.xlu0 %1513 }
 0x181   : > { %v1175_v20 = vsel %vm934_vm2, %v1083_v9, 0.0  ;;  %v1086_v9 = vmul.f32 %v4199_v37, %v4199_v37  ;;  %5361 = vst [vmem:[#allocation23_spill] sm:$0xff] %v4550_v52  ;;  %v1030_v52 = vsel %vm934_vm2, %v4207_v45, 0.0 }
 0x182   : > { %v4530_v48 = vpop.f32.mrf.mxu0  ;;  %v1176_v6 = vadd.f32 %v1175_v20, %v1174_v0  ;;  %v1026_v20 = vsel %vm934_vm2, %v4199_v37, 0.0 }
 0x183   : > { %v1022_v60 = vsel %vm934_vm2, %v4530_v48, 0.0  ;;  %v1084_v16 = vmul.f32 %v4530_v48, %v4530_v48 }
 0x184   : > { %v3544_v14 = vpop.f32.mrf.mxu0  ;;  %v1023_v7 = vadd.f32 %v1022_v60, %v1021_v24  ;;  %v1087_v60 = vmul.f32 %v4203_v41, %v4203_v41 }
 0x185   : > { %v1177_v39 = vsel %vm934_vm2, %v1084_v16, 0.0  ;;  %v1181_v14 = vsel %vm934_vm2, %v1086_v9, 0.0 }
 0x186   : > { %v4542_v30 = vpop.f32.mrf.mxu0  ;;  %v1178_v40 = vadd.f32 %v1177_v39, %v1176_v6  ;;  %v1028_v39 = vsel %vm934_vm2, %v4203_v41, 0.0  ;;  %v1088_v6 = vmul.f32 %v4207_v45, %v4207_v45 }
 0x187   : > { %v1024_v1 = vsel %vm934_vm2, %v4542_v30, 0.0  ;;  %v1085_v26 = vmul.f32 %v4542_v30, %v4542_v30 }
 0x188   : > { %v1025_v22 = vadd.f32 %v1024_v1, %v1023_v7  ;;  %v3545_v43 = vpop.f32.mrf.mxu0 }
 0x189   : > { %v1179_v16 = vsel %vm934_vm2, %v1085_v26, 0.0  ;;  %v1183_v43 = vsel %vm934_vm2, %v1087_v60, 0.0  ;;  %v1089_v26 = vmul.f32 %v4211_v49, %v4211_v49 }
 0x18a   : > { %v1027_v0 = vadd.f32 %v1026_v20, %v1025_v22  ;;  %v1180_v24 = vadd.f32 %v1179_v16, %v1178_v40  ;;  %v4569_v22 = vpop.permute.xlu0 %1523  ;;  %v1185_v20 = vsel %vm934_vm2, %v1088_v6, 0.0  ;;  %v1032_v16 = vsel %vm934_vm2, %v4211_v49, 0.0 }
 0x18b   : > { %5363 = vst [vmem:[#allocation25_spill] sm:$0xff] %v4569_v22  ;;  %v1187_v60 = vsel %vm934_vm2, %v1089_v26, 0.0 }
 0x18c   : > { %v1182_v7 = vadd.f32 %v1181_v14, %v1180_v24  ;;  %v1029_v1 = vadd.f32 %v1028_v39, %v1027_v0  ;;  %v4574_v0 = vpop.permute.xlu1 %1528 }
 0x18e   : > { %v1031_v40 = vadd.f32 %v1030_v52, %v1029_v1  ;;  %v1184_v9 = vadd.f32 %v1183_v43, %v1182_v7  ;;  %v4577_v37 = vpop.permute.xlu0 %1533 }
 0x18f   : > { %5364 = vst [vmem:[#allocation26_spill] sm:$0xff] %v4577_v37 }
 0x190   : > { %v1033_v32 = vadd.f32 %v1032_v16, %v1031_v40  ;;  %v1186_v24 = vadd.f32 %v1185_v20, %v1184_v9  ;;  %v4579_v1 = vpop.permute.xlu1 %1473 }
 0x192   : > { %v1034_v14 = vrot.slane %v1033_v32, 4  ;;  %v1188_v45 = vadd.f32 %v1187_v60, %v1186_v24  ;;  %v4581_v40 = vpop.permute.xlu0 %1548 }
 0x193   : > { %5365 = vst [vmem:[#allocation27_spill] sm:$0xff] %v4581_v40 }
 0x194   : > { %v1035_v39 = vadd.f32 %v1034_v14, %v1033_v32  ;;  %v1189_v41 = vrot.slane %v1188_v45, 4  ;;  %v4583_v16 = vpop.permute.xlu1 %1553 }
 0x196   : > { %v1036_v52 = vrot.slane %v1035_v39, 2  ;;  %v1190_v7 = vadd.f32 %v1189_v41, %v1188_v45  ;;  %v4585_v14 = vpop.permute.xlu0 %1558 }
 0x198   : > { %v1037_v6 = vadd.f32 %v1036_v52, %v1035_v39  ;;  %v1191_v43 = vrot.slane %v1190_v7, 2  ;;  %v4587_v41 = vpop.permute.xlu1 %1563 }
 0x199   : > { %5366 = vst [vmem:[#allocation28_spill] sm:$0xff] %v4587_v41 }
 0x19a   : > { %v1038_v22 = vrot.slane %v1037_v6, 1  ;;  %v1192_v49 = vadd.f32 %v1191_v43, %v1190_v7  ;;  %v4589_v39 = vpop.permute.xlu0 %1568  ;;  %v1206_v7 = vlaneseq }
 0x19b   : > { %5367 = vst [vmem:[#allocation29_spill] sm:$0xff] %v4589_v39 }
 0x19c   : > { %v1039_v9 = vadd.f32 %v1038_v22, %v1037_v6  ;;  %v1193_v20 = vrot.slane %v1192_v49, 1  ;;  %v4591_v52 = vpop.permute.xlu1 %1573  ;;  %v1207_v6 = vand.u32 127, %v1206_v7  ;;  %v1214_v43 = vshrl.u32 %v1206_v7, 7 }
 0x19d   : > { %5368 = vst [vmem:[#allocation30_spill] sm:$0xff] %v4591_v52  ;;  %v1211_v52 = vld [vmem:[%s5327_s6] sm:$0x1] }
 0x19e   : > { %v1194_v26 = vadd.f32 %v1193_v20, %v1192_v49  ;;  %v1195_v24 = vmul.f32 0.00390625, %v1039_v9  ;;  %v4593_v22 = vpop.permute.xlu0 %1578  ;;  %v1199_v9 = vld [vmem:[%s5324_s3] sm:$0x1]  ;;  %vm1208_vm4 = vcmp.lt.s32.totalorder %v1207_v6, 4 }
 0x19f   : > { %5369 = vst [vmem:[#allocation31_spill] sm:$0xff] %v4593_v22 }
 0x1a0   : > { %v1196_v32 = vmul.f32 0.00390625, %v1194_v26  ;;  %v1197_v60 = vmul.f32 %v1195_v24, %v1195_v24  ;;  %v4595_v49 = vpop.permute.xlu1 %1583  ;;  %v1215_v26 = vsub.s32 0, %v1214_v43 }
 0x1a1   : > { %5370 = vst [vmem:[#allocation32_spill] sm:$0xff] %v4595_v49 }
 0x1a2   : > { %v1198_v37 = vsub.f32 %v1196_v32, %v1197_v60  ;;  %v4603_v32 = vpop.permute.xlu0 %1588 }
 0x1a3   : > { %5371 = vst [vmem:[#allocation33_spill] sm:$0xff] %v4603_v32 }
 0x1a4   : > { %v1200_v45 = vadd.f32 1e-05, %v1198_v37  ;;  %v1209_v37 = vld [vmem:[%s5326_s5] sm:$0x1]  ;;  %v4608_v7 = vpop.permute.xlu1 %1593 }
 0x1a5   : > { %5372 = vst [vmem:[#allocation34_spill] sm:$0xff] %v4608_v7 }
 0x1a6   : > { %3817 = vrsqrt.f32 %v1200_v45  ;;  %v1203_v45 = vld [vmem:[%s5325_s4] sm:$0x1] }
 0x1b3   : > { %v3818_v20 = vpop.eup %3817 }
 0x1b4   : > { %v1202_v60 = vmul.f32 %v3818_v20, %v1199_v9  ;;  %v4617_v20 = vpop.permute.xlu0 %1608 }
 0x1b6   : > { %v1204_v49 = vmul.f32 %v1202_v60, %v1195_v24  ;;  %v1210_v22 = vsel %vm1208_vm4, %v1202_v60, %v1209_v37 }
 0x1b7   : > { %v1216_v39 = vrot.slane %v1210_v22, %v1215_v26 }
 0x1b8   : > { %v1205_v41 = vsub.f32 %v1203_v45, %v1204_v49  ;;  %v4628_v49 = vpop.permute.xlu1 %1613 }
 0x1b9   : > { %v1217_v43 = vmul.f32 %v1216_v39, %v4177_v15  ;;  %v1218_v32 = vmul.f32 %v1216_v39, %v4179_v17  ;;  %v1219_v9 = vmul.f32 %v1216_v39, %v4181_v19  ;;  %v1220_v24 = vmul.f32 %v1216_v39, %v4183_v21  ;;  %5373 = vst [vmem:[#allocation35_spill] sm:$0xff] %v4628_v49 }
 0x1ba   : > { %v1212_v40 = vsel %vm1208_vm4, %v1205_v41, %v1211_v52  ;;  %v1221_v37 = vmul.f32 %v1216_v39, %v4185_v23  ;;  %v1222_v60 = vmul.f32 %v1216_v39, %v4187_v25  ;;  %v1223_v22 = vmul.f32 %v1216_v39, %v4189_v27 }
 0x1bb   : > { %v4623_v7 = vrot.slane %v1212_v40, %v1215_v26  ;;  %v1224_v15 = vmul.f32 %v1216_v39, %v4191_v29  ;;  %v1225_v17 = vmul.f32 %v1216_v39, %v4193_v31  ;;  %v1226_v19 = vmul.f32 %v1216_v39, %v4195_v33  ;;  %v5383_v26 = vld [vmem:[#allocation5_spill] sm:$0xff] }
 0x1bc   : > { %v1227_v41 = vmul.f32 %v1216_v39, %v4197_v35  ;;  %v4633_v21 = vmul.f32 %v1216_v39, %v4201_v38  ;;  %v1229_v23 = vmul.f32 %v1216_v39, %v4205_v42  ;;  %v1230_v25 = vmul.f32 %v1216_v39, %v4209_v46 }
 0x1bd   : > { %v1231_v40 = vmul.f32 %v1216_v39, %v4213_v50  ;;  %v1232_v27 = vmul.f32 %v1216_v39, %v4215_v53  ;;  %v1233_v29 = vmul.f32 %v1216_v39, %v4217_v55  ;;  %v1234_v31 = vmul.f32 %v1216_v39, %v4219_v57  ;;  %v4649_v50 = vpop.permute.xlu0 %1618 }
 0x1be   : > { %5374 = vst [vmem:[#allocation36_spill] sm:$0xff] %v4633_v21  ;;  %v1235_v52 = vmul.f32 %v1216_v39, %v4221_v59  ;;  %v1236_v33 = vmul.f32 %v1216_v39, %v4223_v61  ;;  %v1237_v35 = vmul.f32 %v1216_v39, %v4225_v63  ;;  %v1238_v38 = vmul.f32 %v1216_v39, %v4227_v2 }
 0x1bf   : > { %v1239_v42 = vmul.f32 %v1216_v39, %v4229_v4  ;;  %v4647_v46 = vmul.f32 %v1216_v39, %v4239_v10  ;;  %5376 = vst [vmem:[#allocation38_spill] sm:$0xff] %v4649_v50  ;;  %v1242_v53 = vmul.f32 %v1216_v39, %v4266_v56  ;;  %v1243_v55 = vmul.f32 %v1216_v39, %v4278_v12  ;;  %v4671_v10 = vpop.permute.xlu1 %1623 }
 0x1c0   : > { %v4654_v57 = vmul.f32 %v1216_v39, %v4290_v36  ;;  %v4657_v59 = vmul.f32 %v1216_v39, %v4302_v62  ;;  %v4660_v61 = vmul.f32 %v1216_v39, %v4314_v18  ;;  %v4663_v63 = vmul.f32 %v1216_v39, %v4326_v47  ;;  %5377 = vst [vmem:[#allocation39_spill] sm:$0xff] %v4671_v10 }
 0x1c1   : > { %5375 = vst [vmem:[#allocation37_spill] sm:$0xff] %v4647_v46  ;;  %v4666_v2 = vmul.f32 %v1216_v39, %v4338_v8  ;;  %v4669_v4 = vmul.f32 %v1216_v39, %v4350_v34  ;;  %v4674_v56 = vmul.f32 %v1216_v39, %v4362_v3  ;;  %v4677_v12 = vmul.f32 %v1216_v39, %v4376_v28  ;;  %v5379_v8 = vld [vmem:[#allocation15_spill] sm:$0xff] }
 0x1c2   : > { %v4680_v36 = vmul.f32 %v1216_v39, %v4390_v5  ;;  %v4683_v62 = vmul.f32 %v1216_v39, %v4420_v13  ;;  %v4686_v18 = vmul.f32 %v1216_v39, %v4434_v54  ;;  %v4689_v47 = vmul.f32 %v1216_v39, %v4454_v51  ;;  %v5381_v51 = vld [vmem:[#allocation4_spill] sm:$0xff] }
 0x1c3   : > { %v4692_v34 = vmul.f32 %v1216_v39, %v5379_v8  ;;  %v4695_v3 = vmul.f32 %v1216_v39, %v4488_v11  ;;  %v4698_v28 = vmul.f32 %v1216_v39, %v4504_v44  ;;  %v4701_v5 = vmul.f32 %v1216_v39, %v4518_v58  ;;  %v4715_v11 = vpop.permute.xlu0 %1628 }
 0x1c4   : > { %5378 = vst [vmem:[#allocation40_spill] sm:$0xff] %v4680_v36  ;;  %v4704_v13 = vmul.f32 %v1216_v39, %v4530_v48  ;;  %v4707_v54 = vmul.f32 %v1216_v39, %v4542_v30  ;;  %v4710_v6 = vmul.f32 %v1216_v39, %v5381_v51  ;;  %v4713_v45 = vmul.f32 %v1216_v39, %v5383_v26  ;;  %v4725_v39 = vpop.permute.xlu1 %1633 }
 0x1c5   : > { %5385 = vst [vmem:[#allocation41_spill] sm:$0xff] %v4715_v11  ;;  %v1271_v44 = vadd.f32 %v4623_v7, %v1217_v43  ;;  %v1272_v8 = vadd.f32 %v4623_v7, %v1218_v32  ;;  %v1273_v58 = vadd.f32 %v4623_v7, %v1219_v9  ;;  %v1274_v48 = vadd.f32 %v4623_v7, %v1220_v24 }
 0x1c6   : > { %5380 = vst [vmem:[#allocation15_spill] sm:$0xff] %v4707_v54  ;;  %5382 = vst [vmem:[#allocation4_spill] sm:$0xff] %v4710_v6  ;;  %v1275_v46 = vadd.f32 %v4623_v7, %v1221_v37  ;;  %v1276_v30 = vadd.f32 %v4623_v7, %v1222_v60  ;;  %v1277_v51 = vadd.f32 %v4623_v7, %v1223_v22 }
 0x1c7   : > { %5384 = vst [vmem:[#allocation5_spill] sm:$0xff] %v4713_v45  ;;  %v1278_v21 = vadd.f32 %v4623_v7, %v1224_v15  ;;  %5386 = vst [vmem:[#allocation42_spill] sm:$0xff] %v4725_v39  ;;  %v1279_v26 = vadd.f32 %v4623_v7, %v1225_v17  ;;  %v1280_v43 = vadd.f32 %v4623_v7, %v1226_v19  ;;  %v1324_v36 = vmax.f32 %v1274_v48, 0.0 }
 0x1c8   : > { %v1281_v32 = vadd.f32 %v4623_v7, %v1227_v41  ;;  %v1283_v9 = vadd.f32 %v4623_v7, %v1229_v23  ;;  %v1284_v24 = vadd.f32 %v4623_v7, %v1230_v25  ;;  %v4733_v37 = vadd.f32 %v4623_v7, %v1231_v40 }
 0x1c9   : > { %v4736_v60 = vadd.f32 %v4623_v7, %v1232_v27  ;;  %v4739_v22 = vadd.f32 %v4623_v7, %v1233_v29  ;;  %v4742_v15 = vadd.f32 %v4623_v7, %v1234_v31  ;;  %v4745_v17 = vadd.f32 %v4623_v7, %v1235_v52  ;;  %v4763_v29 = vpop.permute.xlu0 %1638 }
 0x1ca   : > { %v4748_v19 = vadd.f32 %v4623_v7, %v1236_v33  ;;  %v4751_v41 = vadd.f32 %v4623_v7, %v1237_v35  ;;  %v4754_v23 = vadd.f32 %v4623_v7, %v1238_v38  ;;  %v4757_v25 = vadd.f32 %v4623_v7, %v1239_v42  ;;  %5387 = vst [vmem:[#allocation43_spill] sm:$0xff] %v4763_v29  ;;  %v4765_v38 = vpop.permute.xlu1 %1643 }
 0x1cb   : > { %v4760_v40 = vadd.f32 %v4623_v7, %v1242_v53  ;;  %v1297_v27 = vadd.f32 %v4623_v7, %v1243_v55  ;;  %v1321_v31 = vmax.f32 %v1271_v44, 0.0  ;;  %v1322_v52 = vmax.f32 %v1272_v8, 0.0  ;;  %5388 = vst [vmem:[#allocation44_spill] sm:$0xff] %v4765_v38 }
 0x1cc   : > { %v1323_v33 = vmax.f32 %v1273_v58, 0.0  ;;  %v1325_v35 = vmax.f32 %v1275_v46, 0.0  ;;  %v1326_v6 = vmax.f32 %v1276_v30, 0.0  ;;  %v1327_v39 = vmax.f32 %v1277_v51, 0.0 }
 0x1cd   : > { %v1347_v45 = vmax.f32 %v1297_v27, 0.0  ;;  %v1328_v11 = vmax.f32 %v1278_v21, 0.0  ;;  %v1329_v42 = vmax.f32 %v1279_v26, 0.0  ;;  %v1330_v10 = vmax.f32 %v1280_v43, 0.0  ;;  %v4778_v30 = vpop.permute.xlu0 %1648  ;;  %v5390_v43 = vld [vmem:[#allocation6_spill] sm:$0xff] }
 0x1ce   : > { %v1331_v50 = vmax.f32 %v1281_v32, 0.0  ;;  %v1333_v49 = vmax.f32 %v1283_v9, 0.0  ;;  %v1334_v55 = vmax.f32 %v1284_v24, 0.0  ;;  %v1335_v29 = vmax.f32 %v4733_v37, 0.0  ;;  %5389 = vst [vmem:[#allocation45_spill] sm:$0xff] %v4778_v30  ;;  %v5391_v9 = vld [vmem:[#allocation8_spill] sm:$0xff] }
 0x1cf   : > { %v1697_v53 = vmul.f32 %v4583_v16, %v1347_v45  ;;  %v1336_v44 = vmax.f32 %v4736_v60, 0.0  ;;  %v1337_v8 = vmax.f32 %v4739_v22, 0.0  ;;  %v1338_v46 = vmax.f32 %v4742_v15, 0.0  ;;  %v5392_v37 = vld [vmem:[#allocation7_spill] sm:$0xff]  ;;  %v5393_v22 = vld [vmem:[#allocation9_spill] sm:$0xff] }
 0x1d0   : > { %v1339_v58 = vmax.f32 %v4745_v17, 0.0  ;;  %v1340_v21 = vmax.f32 %v4748_v19, 0.0  ;;  %v1341_v48 = vmax.f32 %v4751_v41, 0.0  ;;  %v1342_v16 = vmax.f32 %v4754_v23, 0.0  ;;  %v5394_v17 = vld [vmem:[#allocation10_spill] sm:$0xff]  ;;  %v5395_v41 = vld [vmem:[#allocation11_spill] sm:$0xff] }
 0x1d1   : > { %1747 = vst.msk [vmem:[#allocation2 + $0xd0] sm:$0xff] %vm934_vm2, %v1697_v53  ;;  %v1343_v45 = vmax.f32 %v4757_v25, 0.0  ;;  %v1346_v51 = vmax.f32 %v4760_v40, 0.0  ;;  %v1298_v26 = vadd.f32 %v4623_v7, %v4654_v57  ;;  %v1671_v32 = vmul.f32 %v5390_v43, %v1321_v31  ;;  %v4789_v25 = vpop.permute.xlu1 %1653  ;;  %v5396_v53 = vld [vmem:[#allocation12_spill] sm:$0xff]  ;;  %v5397_v30 = vld [vmem:[#allocation13_spill] sm:$0xff]  ;;  %v5398_v57 = vld [vmem:[#allocation14_spill] sm:$0xff] }
 0x1d2   : > { %v1672_v24 = vmul.f32 %v5391_v9, %v1322_v52  ;;  %v1673_v60 = vmul.f32 %v5392_v37, %v1323_v33  ;;  %v1674_v15 = vmul.f32 %v5393_v22, %v1324_v36  ;;  %v1675_v19 = vmul.f32 %v5394_v17, %v1325_v35  ;;  %v5399_v31 = vld [vmem:[#allocation16_spill] sm:$0xff]  ;;  %v5400_v33 = vld [vmem:[#allocation17_spill] sm:$0xff] }
 0x1d3   : > { %v1676_v23 = vmul.f32 %v5395_v41, %v1326_v6  ;;  %v1348_v27 = vmax.f32 %v1298_v26, 0.0  ;;  %v1677_v40 = vmul.f32 %v5396_v53, %v1327_v39  ;;  %v1678_v38 = vmul.f32 %v5397_v30, %v1328_v11  ;;  %1721 = vst.msk [vmem:[#allocation2] sm:$0xff] %vm934_vm2, %v1671_v32  ;;  %v5401_v6 = vld [vmem:[#allocation18_spill] sm:$0xff]  ;;  %v5402_v39 = vld [vmem:[#allocation19_spill] sm:$0xff]  ;;  %v5403_v30 = vld [vmem:[#allocation20_spill] sm:$0xff] }
 0x1d4   : > { %v1679_v54 = vmul.f32 %v5398_v57, %v1329_v42  ;;  %1722 = vst.msk [vmem:[#allocation2 + $0x8] sm:$0xff] %vm934_vm2, %v1672_v24  ;;  %v1680_v52 = vmul.f32 %v5399_v31, %v1330_v10  ;;  %v1681_v36 = vmul.f32 %v4579_v1, %v1331_v50  ;;  %v1683_v35 = vmul.f32 %v5400_v33, %v1333_v49  ;;  %v5404_v26 = vld [vmem:[#allocation21_spill] sm:$0xff]  ;;  %v5405_v49 = vld [vmem:[#allocation22_spill] sm:$0xff]  ;;  %v5407_v9 = vld [vmem:[#allocation24_spill] sm:$0xff] }
 0x1d5   : > { %v1684_v43 = vmul.f32 %v5401_v6, %v1334_v55  ;;  %1723 = vst.msk [vmem:[#allocation2 + $0x10] sm:$0xff] %vm934_vm2, %v1673_v60  ;;  %1724 = vst.msk [vmem:[#allocation2 + $0x18] sm:$0xff] %vm934_vm2, %v1674_v15  ;;  %v1698_v11 = vmul.f32 %v4585_v14, %v1348_v27  ;;  %v1685_v42 = vmul.f32 %v5402_v39, %v1335_v29  ;;  %v5406_v55 = vld [vmem:[#allocation23_spill] sm:$0xff]  ;;  %v5408_v37 = vld [vmem:[#allocation25_spill] sm:$0xff]  ;;  %v4819_v29 = vpop.permute.xlu0 %1658 }
 0x1d6   : > { %1725 = vst.msk [vmem:[#allocation2 + $0x20] sm:$0xff] %vm934_vm2, %v1675_v19  ;;  %1726 = vst.msk [vmem:[#allocation2 + $0x28] sm:$0xff] %vm934_vm2, %v1676_v23  ;;  %v1686_v10 = vmul.f32 %v5403_v30, %v1336_v44  ;;  %v1687_v1 = vmul.f32 %v5404_v26, %v1337_v8  ;;  %v1688_v50 = vmul.f32 %v5405_v49, %v1338_v46  ;;  %v5410_v8 = vld [vmem:[#allocation27_spill] sm:$0xff]  ;;  %v5411_v15 = vld [vmem:[#allocation28_spill] sm:$0xff] }
 0x1d7   : > { %1727 = vst.msk [vmem:[#allocation2 + $0x30] sm:$0xff] %vm934_vm2, %v1677_v40  ;;  %1728 = vst.msk [vmem:[#allocation2 + $0x38] sm:$0xff] %vm934_vm2, %v1678_v38  ;;  %v1689_v32 = vmul.f32 %v5406_v55, %v1339_v58  ;;  %v1690_v24 = vmul.f32 %v5407_v9, %v1340_v21  ;;  %v1691_v14 = vmul.f32 %v5408_v37, %v1341_v48  ;;  %v5409_v38 = vld [vmem:[#allocation26_spill] sm:$0xff]  ;;  %v5412_v27 = vld [vmem:[#allocation29_spill] sm:$0xff] }
 0x1d8   : > { %1729 = vst.msk [vmem:[#allocation2 + $0x40] sm:$0xff] %vm934_vm2, %v1679_v54  ;;  %1730 = vst.msk [vmem:[#allocation2 + $0x48] sm:$0xff] %vm934_vm2, %v1680_v52  ;;  %v1692_v54 = vmul.f32 %v4574_v0, %v1342_v16  ;;  %v1693_v44 = vmul.f32 %v5409_v38, %v1343_v45  ;;  %v1696_v46 = vmul.f32 %v5410_v8, %v1346_v51  ;;  %v4842_v16 = vpop.permute.xlu1 %1598  ;;  %v5413_v40 = vld [vmem:[#allocation30_spill] sm:$0xff]  ;;  %v5415_v52 = vld [vmem:[#allocation32_spill] sm:$0xff] }
 0x1d9   : > { %1731 = vst.msk [vmem:[#allocation2 + $0x50] sm:$0xff] %vm934_vm2, %v1681_v36  ;;  %1733 = vst.msk [vmem:[#allocation2 + $0x60] sm:$0xff] %vm934_vm2, %v1683_v35  ;;  %v1299_v58 = vadd.f32 %v4623_v7, %v4657_v59  ;;  %v1300_v0 = vadd.f32 %v4623_v7, %v4660_v61  ;;  %v1301_v59 = vadd.f32 %v4623_v7, %v4663_v63  ;;  %v4858_v36 = vpop.permute.xlu0 %1478  ;;  %v5417_v35 = vld [vmem:[#allocation34_spill] sm:$0xff]  ;;  %v5418_v26 = vld [vmem:[#allocation15_spill] sm:$0xff] }
 0x1da   : > { %1734 = vst.msk [vmem:[#allocation2 + $0x68] sm:$0xff] %vm934_vm2, %v1684_v43  ;;  %1748 = vst.msk [vmem:[#allocation2 + $0xd8] sm:$0xff] %vm934_vm2, %v1698_v11  ;;  %v1302_v21 = vadd.f32 %v4623_v7, %v4666_v2  ;;  %v1303_v48 = vadd.f32 %v4623_v7, %v4669_v4  ;;  %v1304_v61 = vadd.f32 %v4623_v7, %v4674_v56  ;;  %v5414_v56 = vld [vmem:[#allocation31_spill] sm:$0xff] }
 0x1db   : > { %1735 = vst.msk [vmem:[#allocation2 + $0x70] sm:$0xff] %vm934_vm2, %v1685_v42  ;;  %1736 = vst.msk [vmem:[#allocation2 + $0x78] sm:$0xff] %vm934_vm2, %v1686_v10  ;;  %v1349_v45 = vmax.f32 %v1299_v58, 0.0  ;;  %v1305_v63 = vadd.f32 %v4623_v7, %v4677_v12  ;;  %v1308_v2 = vadd.f32 %v4623_v7, %v4683_v62  ;;  %v1350_v51 = vmax.f32 %v1300_v0, 0.0  ;;  %v5416_v62 = vld [vmem:[#allocation33_spill] sm:$0xff]  ;;  %v5419_v55 = vld [vmem:[#allocation35_spill] sm:$0xff] }
 0x1dc   : > { %1737 = vst.msk [vmem:[#allocation2 + $0x80] sm:$0xff] %vm934_vm2, %v1687_v1  ;;  %1738 = vst.msk [vmem:[#allocation2 + $0x88] sm:$0xff] %vm934_vm2, %v1688_v50  ;;  %v1351_v4 = vmax.f32 %v1301_v59, 0.0  ;;  %v1352_v60 = vmax.f32 %v1302_v21, 0.0  ;;  %v1353_v22 = vmax.f32 %v1303_v48, 0.0  ;;  %v1354_v19 = vmax.f32 %v1304_v61, 0.0  ;;  %v1539_v30 = vpop.permute.xlu1 %1538 }
 0x1dd   : > { %1739 = vst.msk [vmem:[#allocation2 + $0x90] sm:$0xff] %vm934_vm2, %v1689_v32  ;;  %1740 = vst.msk [vmem:[#allocation2 + $0x98] sm:$0xff] %vm934_vm2, %v1690_v24  ;;  %v1699_v17 = vmul.f32 %v5411_v15, %v1349_v45  ;;  %v1355_v41 = vmax.f32 %v1305_v63, 0.0  ;;  %v1358_v23 = vmax.f32 %v1308_v2, 0.0  ;;  %v1700_v53 = vmul.f32 %v5412_v27, %v1350_v51  ;;  %v5421_v38 = vld [vmem:[#allocation39_spill] sm:$0xff]  ;;  %v1544_v58 = vpop.permute.xlu0 %1543  ;;  %v5425_v21 = vld [vmem:[#allocation44_spill] sm:$0xff] }
 0x1de   : > { %1741 = vst.msk [vmem:[#allocation2 + $0xa0] sm:$0xff] %vm934_vm2, %v1691_v14  ;;  %1742 = vst.msk [vmem:[#allocation2 + $0xa8] sm:$0xff] %vm934_vm2, %v1692_v54  ;;  %v1701_v57 = vmul.f32 %v5413_v40, %v1351_v4  ;;  %v1702_v31 = vmul.f32 %v5414_v56, %v1352_v60  ;;  %v1703_v12 = vmul.f32 %v5415_v52, %v1353_v22  ;;  %v5420_v14 = vld [vmem:[#allocation38_spill] sm:$0xff]  ;;  %v5424_v0 = vld [vmem:[#allocation43_spill] sm:$0xff] }
 0x1df   : > { %1743 = vst.msk [vmem:[#allocation2 + $0xb0] sm:$0xff] %vm934_vm2, %v1693_v44  ;;  %1746 = vst.msk [vmem:[#allocation2 + $0xc8] sm:$0xff] %vm934_vm2, %v1696_v46  ;;  %v1704_v33 = vmul.f32 %v5416_v62, %v1354_v19  ;;  %v1705_v6 = vmul.f32 %v5417_v35, %v1355_v41  ;;  %v1708_v43 = vmul.f32 %v4617_v20, %v1358_v23  ;;  %v5423_v46 = vld [vmem:[#allocation42_spill] sm:$0xff]  ;;  %v5426_v45 = vld [vmem:[#allocation45_spill] sm:$0xff] }
 0x1e0   : > { %1749 = vst.msk [vmem:[#allocation2 + $0xe0] sm:$0xff] %vm934_vm2, %v1699_v17  ;;  %v1309_v11 = vadd.f32 %v4623_v7, %v4686_v18  ;;  %1750 = vst.msk [vmem:[#allocation2 + $0xe8] sm:$0xff] %vm934_vm2, %v1700_v53  ;;  %v1310_v39 = vadd.f32 %v4623_v7, %v4689_v47  ;;  %v1311_v42 = vadd.f32 %v4623_v7, %v4692_v34  ;;  %v5427_v63 = vld [vmem:[#allocation4_spill] sm:$0xff]  ;;  %v5428_v51 = vld [vmem:[#allocation5_spill] sm:$0xff]  ;;  %v1604_v23 = vpop.permute.xlu1 %1603 }
 0x1e1   : > { %1751 = vst.msk [vmem:[#allocation2 + $0xf0] sm:$0xff] %vm934_vm2, %v1701_v57  ;;  %1752 = vst.msk [vmem:[#allocation2 + $0xf8] sm:$0xff] %vm934_vm2, %v1702_v31  ;;  %v1312_v20 = vadd.f32 %v4623_v7, %v4695_v3  ;;  %v1313_v18 = vadd.f32 %v4623_v7, %v4698_v28  ;;  %v1314_v47 = vadd.f32 %v4623_v7, %v4701_v5  ;;  %v5422_v5 = vld [vmem:[#allocation41_spill] sm:$0xff]  ;;  %v5429_v60 = vld [vmem:[#allocation40_spill] sm:$0xff] }
 0x1e2   : > { %1753 = vst.msk [vmem:[#allocation2 + $0x100] sm:$0xff] %vm934_vm2, %v1703_v12  ;;  %1754 = vst.msk [vmem:[#allocation2 + $0x108] sm:$0xff] %vm934_vm2, %v1704_v33  ;;  %v1359_v10 = vmax.f32 %v1309_v11, 0.0  ;;  %v1315_v34 = vadd.f32 %v4623_v7, %v4704_v13  ;;  %v1316_v3 = vadd.f32 %v4623_v7, %v5418_v26  ;;  %v1360_v1 = vmax.f32 %v1310_v39, 0.0  ;;  %v5430_v15 = vld [vmem:[#allocation36_spill] sm:$0xff]  ;;  %v5431_v19 = vld [vmem:[#allocation37_spill] sm:$0xff]  ;;  %v1664_v39 = vpop.permute.xlu0 %1663 }
 0x1e3   : > { %1755 = vst.msk [vmem:[#allocation2 + $0x110] sm:$0xff] %vm934_vm2, %v1705_v6  ;;  %1758 = vst.msk [vmem:[#allocation2 + $0x128] sm:$0xff] %vm934_vm2, %v1708_v43  ;;  %v1361_v49 = vmax.f32 %v1311_v42, 0.0  ;;  %v1362_v28 = vmax.f32 %v1312_v20, 0.0  ;;  %v1363_v50 = vmax.f32 %v1313_v18, 0.0  ;;  %v1364_v9 = vmax.f32 %v1314_v47, 0.0 }
 0x1e4   : > { %v1709_v32 = vmul.f32 %v5419_v55, %v1359_v10  ;;  %v1365_v24 = vmax.f32 %v1315_v34, 0.0  ;;  %v1366_v37 = vmax.f32 %v1316_v3, 0.0  ;;  %v1710_v54 = vmul.f32 %v5420_v14, %v1360_v1  ;;  %v3307_v53 = vld [vmem:[%s5328_s7 + $0x4] sm:$0xf]  ;;  %v2442_v33 = vld [vmem:[#allocation2 + $0xd1] sm:$0xff] }
 0x1e5   : > { %v1711_v44 = vmul.f32 %v5421_v38, %v1361_v49  ;;  %v1712_v8 = vmul.f32 %v5422_v5, %v1362_v28  ;;  %v1713_v13 = vmul.f32 %v5423_v46, %v1363_v50  ;;  %v1714_v59 = vmul.f32 %v5424_v0, %v1364_v9  ;;  %v1771_v52 = vld [vmem:[#allocation2] sm:$0xff]  ;;  %v3343_v42 = vld [vmem:[%s5328_s7 + $0x1c] sm:$0xf]  ;;  %v1776_v49 = vld [vmem:[#allocation2 + $0x28] sm:$0xff] }
 0x1e6   : > { %1759 = vst.msk [vmem:[#allocation2 + $0x130] sm:$0xff] %vm934_vm2, %v1709_v32  ;;  %v1715_v48 = vmul.f32 %v5425_v21, %v1365_v24  ;;  %v1716_v61 = vmul.f32 %v5426_v45, %v1366_v37  ;;  %v1317_v2 = vadd.f32 %v4623_v7, %v5427_v63  ;;  %1760 = vst.msk [vmem:[#allocation2 + $0x138] sm:$0xff] %vm934_vm2, %v1710_v54  ;;  %v2441_v62 = vld [vmem:[#allocation2 + $0xc9] sm:$0xff]  ;;  %v2750_v20 = vsel %vm1802_vm3, %v3343_v42, 0  ;;  %v1774_v10 = vld [vmem:[#allocation2 + $0x18] sm:$0xff] }
 0x1e7   : > { %1761 = vst.msk [vmem:[#allocation2 + $0x140] sm:$0xff] %vm934_vm2, %v1711_v44  ;;  %1762 = vst.msk [vmem:[#allocation2 + $0x148] sm:$0xff] %vm934_vm2, %v1712_v8  ;;  %v1318_v4 = vadd.f32 %v4623_v7, %v5428_v51  ;;  %v1306_v22 = vadd.f32 %v4623_v7, %v5429_v60  ;;  %v1282_v17 = vadd.f32 %v4623_v7, %v5430_v15  ;;  %v5432_v18 = vmov 0.0   ;;  %v2443_v47 = vld [vmem:[#allocation2 + $0xd9] sm:$0xff]  ;;  %v2444_v34 = vld [vmem:[#allocation2 + $0xe1] sm:$0xff] }
 0x1e8   : > { %1763 = vst.msk [vmem:[#allocation2 + $0x150] sm:$0xff] %vm934_vm2, %v1713_v13  ;;  %v1294_v41 = vadd.f32 %v4623_v7, %v5431_v19  ;;  %1764 = vst.msk [vmem:[#allocation2 + $0x158] sm:$0xff] %vm934_vm2, %v1714_v59  ;;  %v1367_v27 = vmax.f32 %v1317_v2, 0.0  ;;  %v1772_v7 = vld [vmem:[#allocation2 + $0x8] sm:$0xff]  ;;  %v2452_v3 = vpack.c.bf16 %v2444_v34, %v2443_v47  ;;  %v1775_v1 = vld [vmem:[#allocation2 + $0x20] sm:$0xff] }
 0x1e9   : > { %1765 = vst.msk [vmem:[#allocation2 + $0x160] sm:$0xff] %vm934_vm2, %v1715_v48  ;;  %1766 = vst.msk [vmem:[#allocation2 + $0x168] sm:$0xff] %vm934_vm2, %v1716_v61  ;;  %v1368_v40 = vmax.f32 %v1318_v4, 0.0  ;;  %v1356_v57 = vmax.f32 %v1306_v22, 0.0  ;;  %v1332_v56 = vmax.f32 %v1282_v17, 0.0  ;;  %v2445_v28 = vld [vmem:[#allocation2 + $0xe9] sm:$0xff]  ;;  %v1783_v55 = vpack.c.bf16 %v1776_v49, %v1775_v1 }
 0x1ea   : > { %v1344_v31 = vmax.f32 %v1294_v41, 0.0  ;;  %v1717_v12 = vmul.f32 %v4789_v25, %v1367_v27  ;;  %v1669_v25 = vpop.permute.xlu1 %1668  ;;  %v2446_v50 = vld [vmem:[#allocation2 + $0xf1] sm:$0xff]  ;;  %v2447_v37 = vld [vmem:[#allocation2 + $0xf9] sm:$0xff]  ;;  %v2448_v14 = vld [vmem:[#allocation2 + $0x101] sm:$0xff] }
 0x1eb   : > { %v1718_v35 = vmul.f32 %v4819_v29, %v1368_v40  ;;  %v1706_v6 = vmul.f32 %v4842_v16, %v1356_v57  ;;  %v1682_v43 = vmul.f32 %v4858_v36, %v1332_v56  ;;  %v1781_v29 = vpack.c.bf16 %v1772_v7, %v1771_v52  ;;  %v1777_v9 = vld [vmem:[#allocation2 + $0x30] sm:$0xff]  ;;  %v1778_v24 = vld [vmem:[#allocation2 + $0x38] sm:$0xff]  ;;  %v1779_v44 = vld [vmem:[#allocation2 + $0x40] sm:$0xff] }
 0x1ec   : > { %v1694_v11 = vmul.f32 %v1539_v30, %v1344_v31  ;;  %1767 = vst.msk [vmem:[#allocation2 + $0x170] sm:$0xff] %vm934_vm2, %v1717_v12  ;;  %v1922_v16 = vsel %vm1802_vm3, %v3307_v53, 0  ;;  %v2451_v36 = vpack.c.bf16 %v2442_v33, %v2441_v62  ;;  %v1773_v30 = vld [vmem:[#allocation2 + $0x10] sm:$0xff]  ;;  %v2453_v32 = vpack.c.bf16 %v2446_v50, %v2445_v28  ;;  %v1780_v5 = vld [vmem:[#allocation2 + $0x48] sm:$0xff]  ;;  %v1892_v4 = vld [vmem:[#allocation2 + $0x7c] sm:$0xff] }
 0x1ed   : > { %1768 = vst.msk [vmem:[#allocation2 + $0x178] sm:$0xff] %vm934_vm2, %v1718_v35  ;;  %1756 = vst.msk [vmem:[#allocation2 + $0x118] sm:$0xff] %vm934_vm2, %v1706_v6  ;;  %3557 = vmatmul.mubr.msk.bf16.vlgmr.msra.gmra.mxu1 %vm934_vm2, %v1781_v29  ;;  %v1782_v26 = vpack.c.bf16 %v1774_v10, %v1773_v30  ;;  %v1784_v54 = vpack.c.bf16 %v1778_v24, %v1777_v9  ;;  %v2454_v38 = vpack.c.bf16 %v2448_v14, %v2447_v37  ;;  %v2449_v8 = vld [vmem:[#allocation2 + $0x109] sm:$0xff]  ;;  %v2718_v45 = vld [vmem:[#allocation2 + $0x76] sm:$0xff] }
 0x1ee   : > { %1732 = vst.msk [vmem:[#allocation2 + $0x58] sm:$0xff] %vm934_vm2, %v1682_v43  ;;  %1744 = vst.msk [vmem:[#allocation2 + $0xb8] sm:$0xff] %vm934_vm2, %v1694_v11  ;;  %3667 = vmatmul.mubr.msk.bf16.vlgmr.msra.gmra.mxu0 %vm934_vm2, %v2451_v36  ;;  %3577 = vmatpush3.bf16.msra.mxu1 %v1922_v16  ;;  %v1785_v13 = vpack.c.bf16 %v1780_v5, %v1779_v44  ;;  %v1889_v0 = vld [vmem:[#allocation2 + $0x64] sm:$0xff]  ;;  %v1890_v21 = vld [vmem:[#allocation2 + $0x6c] sm:$0xff] }
 0x1ef   : > { %3560 = vmatprep.mubr.msk.bf16.mxu1 %vm3828_vm0, %v5432_v18  ;;  %3670 = vmatprep.mubr.msk.bf16.mxu0 %vm3828_vm0, %v5432_v18  ;;  %v3313_v59 = vld [vmem:[%s5328_s7 + $0x8] sm:$0xf]  ;;  %v2717_v48 = vld [vmem:[#allocation2 + $0x6e] sm:$0xff]  ;;  %v1899_v61 = vpack.c.bf16 %v1890_v21, %v1889_v0  ;;  %v2719_v60 = vld [vmem:[#allocation2 + $0x7e] sm:$0xff] }
 0x1f0   : > { %3709 = vmatpush3.bf16.msra.mxu0 %v2750_v20  ;;  %3598 = vmatprep.subr.bf16.mxu1 %v5432_v18  ;;  %v2060_v63 = vsel %vm1802_vm3, %v3313_v59, 0  ;;  %v2727_v2 = vpack.c.bf16 %v2718_v45, %v2717_v48  ;;  %v1891_v51 = vld [vmem:[#allocation2 + $0x74] sm:$0xff]  ;;  %v2720_v22 = vld [vmem:[#allocation2 + $0x86] sm:$0xff]  ;;  %v1896_v56 = vld [vmem:[#allocation2 + $0x9c] sm:$0xff] }
 0x1f1   : > { %3752 = vmatprep.subr.bf16.mxu0 %v5432_v18  ;;  %v1900_v15 = vpack.c.bf16 %v1892_v4, %v1891_v51  ;;  %v2728_v17 = vpack.c.bf16 %v2720_v22, %v2719_v60  ;;  %v1893_v19 = vld [vmem:[#allocation2 + $0x84] sm:$0xff]  ;;  %v1894_v41 = vld [vmem:[#allocation2 + $0x8c] sm:$0xff]  ;;  %v2722_v27 = vld [vmem:[#allocation2 + $0x96] sm:$0xff] }
 0x1f2   : > { %v2721_v23 = vld [vmem:[#allocation2 + $0x8e] sm:$0xff]  ;;  %v1901_v53 = vpack.c.bf16 %v1894_v41, %v1893_v19  ;;  %v2723_v31 = vld [vmem:[#allocation2 + $0x9e] sm:$0xff]  ;;  %v2724_v52 = vld [vmem:[#allocation2 + $0xa6] sm:$0xff] }
 0x1f3   : > { %v2729_v40 = vpack.c.bf16 %v2722_v27, %v2721_v23  ;;  %v1895_v57 = vld [vmem:[#allocation2 + $0x94] sm:$0xff]  ;;  %v2730_v7 = vpack.c.bf16 %v2724_v52, %v2723_v31  ;;  %v1897_v62 = vld [vmem:[#allocation2 + $0xa4] sm:$0xff]  ;;  %v1898_v33 = vld [vmem:[#allocation2 + $0xac] sm:$0xff] }
 0x1f4   : > { %v2450_v46 = vld [vmem:[#allocation2 + $0x111] sm:$0xff]  ;;  %v1902_v12 = vpack.c.bf16 %v1896_v56, %v1895_v57  ;;  %v1903_v43 = vpack.c.bf16 %v1898_v33, %v1897_v62  ;;  %v2027_v39 = vld [vmem:[#allocation2 + $0x1] sm:$0xff]  ;;  %v2028_v42 = vld [vmem:[#allocation2 + $0x9] sm:$0xff] }
 0x1f5   : > { %3561 = vmatmul.mubr.msk.bf16.gmra.mxu1 %vm934_vm2, %v1782_v26  ;;  %v2455_v58 = vpack.c.bf16 %v2450_v46, %v2449_v8  ;;  %v2725_v35 = vld [vmem:[#allocation2 + $0xae] sm:$0xff]  ;;  %v2726_v6 = vld [vmem:[#allocation2 + $0xb6] sm:$0xff]  ;;  %v2037_v29 = vpack.c.bf16 %v2028_v42, %v2027_v39  ;;  %v2031_v10 = vld [vmem:[#allocation2 + $0x21] sm:$0xff] }
 0x1f6   : > { %3671 = vmatmul.mubr.msk.bf16.gmra.mxu0 %vm934_vm2, %v2452_v3  ;;  %3564 = vmatprep.mubr.msk.bf16.mxu1 %vm3828_vm0, %v5432_v18  ;;  %v2731_v11 = vpack.c.bf16 %v2726_v6, %v2725_v35  ;;  %v3319_v25 = vld [vmem:[%s5328_s7 + $0xc] sm:$0xf]  ;;  %v2029_v36 = vld [vmem:[#allocation2 + $0x11] sm:$0xff]  ;;  %v2030_v20 = vld [vmem:[#allocation2 + $0x19] sm:$0xff] }
 0x1f7   : > { %3674 = vmatprep.mubr.msk.bf16.mxu0 %vm3828_vm0, %v5432_v18  ;;  %v2198_v16 = vsel %vm1802_vm3, %v3319_v25, 0  ;;  %v2038_v30 = vpack.c.bf16 %v2030_v20, %v2029_v36  ;;  %v2032_v47 = vld [vmem:[#allocation2 + $0x29] sm:$0xff]  ;;  %v2033_v26 = vld [vmem:[#allocation2 + $0x31] sm:$0xff]  ;;  %v2034_v3 = vld [vmem:[#allocation2 + $0x39] sm:$0xff] }
 0x1f8   : > { %v2039_v34 = vpack.c.bf16 %v2032_v47, %v2031_v10  ;;  %v2040_v1 = vpack.c.bf16 %v2034_v3, %v2033_v26  ;;  %v2035_v49 = vld [vmem:[#allocation2 + $0x41] sm:$0xff]  ;;  %v2036_v28 = vld [vmem:[#allocation2 + $0x49] sm:$0xff]  ;;  %v2167_v14 = vld [vmem:[#allocation2 + $0xd8] sm:$0xff] }
 0x1f9   : > { %v2041_v50 = vpack.c.bf16 %v2036_v28, %v2035_v49  ;;  %v3325_v9 = vld [vmem:[%s5328_s7 + $0x10] sm:$0xf]  ;;  %v2169_v44 = vld [vmem:[#allocation2 + $0xe8] sm:$0xff]  ;;  %v2171_v46 = vld [vmem:[#allocation2 + $0xf8] sm:$0xff] }
 0x1fa   : > { %v2336_v37 = vsel %vm1802_vm3, %v3325_v9, 0  ;;  %v2170_v5 = vld [vmem:[#allocation2 + $0xf0] sm:$0xff]  ;;  %v2173_v0 = vld [vmem:[#allocation2 + $0x108] sm:$0xff]  ;;  %v2305_v51 = vld [vmem:[#allocation2 + $0x13c] sm:$0xff] }
 0x1fb   : > { %v2177_v8 = vpack.c.bf16 %v2170_v5, %v2169_v44  ;;  %v2174_v59 = vld [vmem:[#allocation2 + $0x110] sm:$0xff]  ;;  %v2306_v4 = vld [vmem:[#allocation2 + $0x144] sm:$0xff]  ;;  %v2309_v19 = vld [vmem:[#allocation2 + $0x15c] sm:$0xff] }
 0x1fc   : > { %v2179_v21 = vpack.c.bf16 %v2174_v59, %v2173_v0  ;;  %v2303_v48 = vld [vmem:[#allocation2 + $0x12c] sm:$0xff]  ;;  %v2304_v45 = vld [vmem:[#allocation2 + $0x134] sm:$0xff]  ;;  %v2314_v60 = vpack.c.bf16 %v2306_v4, %v2305_v51  ;;  %v2310_v41 = vld [vmem:[#allocation2 + $0x164] sm:$0xff] }
 0x1fd   : > { %3565 = vmatmul.mubr.msk.bf16.gmra.mxu1 %vm934_vm2, %v1783_v55  ;;  %v2165_v55 = vld [vmem:[#allocation2 + $0xc8] sm:$0xff]  ;;  %v2316_v23 = vpack.c.bf16 %v2310_v41, %v2309_v19  ;;  %v3349_v62 = vld [vmem:[%s5328_s7 + $0x20] sm:$0xf]  ;;  %v2588_v51 = vld [vmem:[#allocation2 + $0x52] sm:$0xff] }
 0x1fe   : > { %3675 = vmatmul.mubr.msk.bf16.gmra.mxu0 %vm934_vm2, %v2453_v32  ;;  %3568 = vmatprep.mubr.msk.bf16.mxu1 %vm3828_vm0, %v5432_v18  ;;  %v2166_v32 = vld [vmem:[#allocation2 + $0xd0] sm:$0xff]  ;;  %v2888_v39 = vsel %vm1802_vm3, %v3349_v62, 0  ;;  %v2581_v36 = vld [vmem:[#allocation2 + $0x1a] sm:$0xff]  ;;  %v2582_v20 = vld [vmem:[#allocation2 + $0x22] sm:$0xff] }
 0x1ff   : > { %3678 = vmatprep.mubr.msk.bf16.mxu0 %vm3828_vm0, %v5432_v18  ;;  %v2175_v24 = vpack.c.bf16 %v2166_v32, %v2165_v55  ;;  %v2307_v22 = vld [vmem:[#allocation2 + $0x14c] sm:$0xff]  ;;  %v2590_v26 = vpack.c.bf16 %v2582_v20, %v2581_v36  ;;  %v2857_v20 = vld [vmem:[#allocation2 + $0x1b] sm:$0xff] }
 0x200   : > { %v2311_v27 = vld [vmem:[#allocation2 + $0x16c] sm:$0xff] }
 0x201   : > { %v2584_v55 = vld [vmem:[#allocation2 + $0x32] sm:$0xff] }
 0x205   : > { %3569 = vmatmul.mubr.msk.bf16.gmra.mxu1 %vm934_vm2, %v1784_v54  ;;  %v2168_v54 = vld [vmem:[#allocation2 + $0xe0] sm:$0xff] }
 0x206   : > { %3679 = vmatmul.mubr.msk.bf16.gmra.mxu0 %vm934_vm2, %v2454_v38  ;;  %3572 = vmatprep.mubr.msk.bf16.mxu1 %vm3828_vm0, %v5432_v18  ;;  %v2176_v38 = vpack.c.bf16 %v2168_v54, %v2167_v14 }
 0x207   : > { %3682 = vmatprep.mubr.msk.bf16.mxu0 %vm3828_vm0, %v5432_v18 }
 0x20d   : > { %3573 = vmatmul.mubr.msk.bf16.gmra.mxu1 %vm934_vm2, %v1785_v13  ;;  %v2172_v13 = vld [vmem:[#allocation2 + $0x100] sm:$0xff] }
 0x20e   : > { %3683 = vmatmul.mubr.msk.bf16.gmra.mxu0 %vm934_vm2, %v2455_v58  ;;  %3578 = vmatprep.mubr.msk.bf16.mxu1 %vm3828_vm0, %v5432_v18  ;;  %v2178_v58 = vpack.c.bf16 %v2172_v13, %v2171_v46  ;;  %v2586_v46 = vld [vmem:[#allocation2 + $0x42] sm:$0xff] }
 0x20f   : > { %3710 = vmatprep.mubr.msk.bf16.mxu0 %vm3828_vm0, %v5432_v18 }
 0x215   : > { %3579 = vmatmul.mubr.msk.bf16.vlgmr.msra.gmra.mxu1 %vm934_vm2, %v1899_v61  ;;  %v3337_v61 = vld [vmem:[%s5328_s7 + $0x18] sm:$0xf] }
 0x216   : > { %3711 = vmatmul.mubr.msk.bf16.vlgmr.msra.gmra.mxu0 %vm934_vm2, %v2727_v2  ;;  %3599 = vmatpush3.bf16.msra.mxu1 %v2060_v63  ;;  %v2313_v63 = vpack.c.bf16 %v2304_v45, %v2303_v48  ;;  %v2612_v2 = vsel %vm1802_vm3, %v3337_v61, 0 }
 0x217   : > { %3582 = vmatprep.mubr.msk.bf16.mxu1 %vm3828_vm0, %v5432_v18  ;;  %3714 = vmatprep.mubr.msk.bf16.mxu0 %vm3828_vm0, %v5432_v18 }
 0x218   : > { %3620 = vmatprep.subr.bf16.mxu1 %v5432_v18 }
 0x21d   : > { %3583 = vmatmul.mubr.msk.bf16.gmra.mxu1 %vm934_vm2, %v1900_v15  ;;  %v2308_v15 = vld [vmem:[#allocation2 + $0x154] sm:$0xff] }
 0x21e   : > { %3715 = vmatmul.mubr.msk.bf16.gmra.mxu0 %vm934_vm2, %v2728_v17  ;;  %3586 = vmatprep.mubr.msk.bf16.mxu1 %vm3828_vm0, %v5432_v18  ;;  %v2315_v17 = vpack.c.bf16 %v2308_v15, %v2307_v22 }
 0x21f   : > { %3718 = vmatprep.mubr.msk.bf16.mxu0 %vm3828_vm0, %v5432_v18 }
 0x225   : > { %3587 = vmatmul.mubr.msk.bf16.gmra.mxu1 %vm934_vm2, %v1901_v53  ;;  %v2312_v53 = vld [vmem:[#allocation2 + $0x174] sm:$0xff] }
 0x226   : > { %3719 = vmatmul.mubr.msk.bf16.gmra.mxu0 %vm934_vm2, %v2729_v40  ;;  %3590 = vmatprep.mubr.msk.bf16.mxu1 %vm3828_vm0, %v5432_v18  ;;  %v2317_v40 = vpack.c.bf16 %v2312_v53, %v2311_v27 }
 0x227   : > { %3722 = vmatprep.mubr.msk.bf16.mxu0 %vm3828_vm0, %v5432_v18 }
 0x22d   : > { %3591 = vmatmul.mubr.msk.bf16.gmra.mxu1 %vm934_vm2, %v1902_v12  ;;  %v2579_v12 = vld [vmem:[#allocation2 + $0xa] sm:$0xff] }
 0x22e   : > { %3723 = vmatmul.mubr.msk.bf16.gmra.mxu0 %vm934_vm2, %v2730_v7  ;;  %3594 = vmatprep.mubr.msk.bf16.mxu1 %vm3828_vm0, %v5432_v18  ;;  %v2580_v7 = vld [vmem:[#allocation2 + $0x12] sm:$0xff] }
 0x22f   : > { %3726 = vmatprep.mubr.msk.bf16.mxu0 %vm3828_vm0, %v5432_v18 }
 0x235   : > { %3595 = vmatmul.mubr.msk.bf16.gmra.mxu1 %vm934_vm2, %v1903_v43 }
 0x236   : > { %3727 = vmatmul.mubr.msk.bf16.gmra.mxu0 %vm934_vm2, %v2731_v11  ;;  %3600 = vmatprep.mubr.msk.bf16.mxu1 %vm3828_vm0, %v5432_v18  ;;  %v2589_v11 = vpack.c.bf16 %v2580_v7, %v2579_v12 }
 0x237   : > { %3754 = vmatprep.mubr.msk.bf16.mxu0 %vm3828_vm0, %v5432_v18 }
 0x23d   : > { %3601 = vmatmul.mubr.msk.bf16.vlgmr.msra.gmra.mxu1 %vm934_vm2, %v2037_v29 }
 0x23e   : > { %3621 = vmatpush3.bf16.msra.mxu1 %v2198_v16  ;;  %3604 = vmatprep.mubr.msk.bf16.mxu1 %vm3828_vm0, %v5432_v18 }
 0x23f   : > { %3642 = vmatprep.subr.bf16.mxu1 %v5432_v18 }
 0x245   : > { %3605 = vmatmul.mubr.msk.bf16.gmra.mxu1 %vm934_vm2, %v2038_v30 }
 0x246   : > { %3608 = vmatprep.mubr.msk.bf16.mxu1 %vm3828_vm0, %v5432_v18 }
 0x24d   : > { %3609 = vmatmul.mubr.msk.bf16.gmra.mxu1 %vm934_vm2, %v2039_v34 }
 0x24e   : > { %3612 = vmatprep.mubr.msk.bf16.mxu1 %vm3828_vm0, %v5432_v18 }
 0x255   : > { %3613 = vmatmul.mubr.msk.bf16.gmra.mxu1 %vm934_vm2, %v2040_v1 }
 0x256   : > { %3616 = vmatprep.mubr.msk.bf16.mxu1 %vm3828_vm0, %v5432_v18 }
 0x25d   : > { %3617 = vmatmul.mubr.msk.bf16.gmra.mxu1 %vm934_vm2, %v2041_v50  ;;  %v2583_v50 = vld [vmem:[#allocation2 + $0x2a] sm:$0xff] }
 0x25e   : > { %3622 = vmatprep.mubr.msk.bf16.mxu1 %vm3828_vm0, %v5432_v18  ;;  %v2591_v14 = vpack.c.bf16 %v2584_v55, %v2583_v50 }
 0x265   : > { %3623 = vmatmul.mubr.msk.bf16.vlgmr.msra.gmra.mxu1 %vm934_vm2, %v2175_v24 }
 0x266   : > { %3643 = vmatpush3.bf16.msra.mxu1 %v2336_v37  ;;  %3626 = vmatprep.mubr.msk.bf16.mxu1 %vm3828_vm0, %v5432_v18 }
 0x267   : > { %3686 = vmatprep.subr.bf16.mxu1 %v5432_v18 }
 0x26d   : > { %3627 = vmatmul.mubr.msk.bf16.gmra.mxu1 %vm934_vm2, %v2176_v38 }
 0x26e   : > { %3630 = vmatprep.mubr.msk.bf16.mxu1 %vm3828_vm0, %v5432_v18 }
 0x275   : > { %3631 = vmatmul.mubr.msk.bf16.gmra.mxu1 %vm934_vm2, %v2177_v8  ;;  %v2585_v8 = vld [vmem:[#allocation2 + $0x3a] sm:$0xff] }
 0x276   : > { %3634 = vmatprep.mubr.msk.bf16.mxu1 %vm3828_vm0, %v5432_v18 }
 0x27d   : > { %3635 = vmatmul.mubr.msk.bf16.gmra.mxu1 %vm934_vm2, %v2178_v58 }
 0x27e   : > { %3638 = vmatprep.mubr.msk.bf16.mxu1 %vm3828_vm0, %v5432_v18 }
 0x285   : > { %3639 = vmatmul.mubr.msk.bf16.gmra.mxu1 %vm934_vm2, %v2179_v21  ;;  %v2592_v21 = vpack.c.bf16 %v2586_v46, %v2585_v8 }
 0x286   : > { %3644 = vmatprep.mubr.msk.bf16.mxu1 %vm3828_vm0, %v5432_v18 }
 0x28d   : > { %3645 = vmatmul.mubr.msk.bf16.vlgmr.msra.gmra.mxu1 %vm934_vm2, %v2313_v63 }
 0x28e   : > { %3687 = vmatpush3.bf16.msra.mxu1 %v2612_v2  ;;  %3648 = vmatprep.mubr.msk.bf16.mxu1 %vm3828_vm0, %v5432_v18  ;;  %v2587_v2 = vld [vmem:[#allocation2 + $0x4a] sm:$0xff] }
 0x28f   : > { %3730 = vmatprep.subr.bf16.mxu1 %v5432_v18 }
 0x295   : > { %3649 = vmatmul.mubr.msk.bf16.gmra.mxu1 %vm934_vm2, %v2314_v60 }
 0x296   : > { %3652 = vmatprep.mubr.msk.bf16.mxu1 %vm3828_vm0, %v5432_v18 }
 0x29d   : > { %3653 = vmatmul.mubr.msk.bf16.gmra.mxu1 %vm934_vm2, %v2315_v17  ;;  %v2593_v17 = vpack.c.bf16 %v2588_v51, %v2587_v2 }
 0x29e   : > { %3656 = vmatprep.mubr.msk.bf16.mxu1 %vm3828_vm0, %v5432_v18 }
 0x2a5   : > { %3657 = vmatmul.mubr.msk.bf16.gmra.mxu1 %vm934_vm2, %v2316_v23 }
 0x2a6   : > { %3660 = vmatprep.mubr.msk.bf16.mxu1 %vm3828_vm0, %v5432_v18 }
 0x2ad   : > { %v1840_v57 = vpop.f32.mrf.mxu1  ;;  %3661 = vmatmul.mubr.msk.bf16.gmra.mxu1 %vm934_vm2, %v2317_v40 }
 0x2ae   : > { %v5055_v56 = vpop.f32.mrf.mxu0  ;;  %1879 = vst.msk [vmem:[#allocation3] sm:$0xff] %vm934_vm2, %v1840_v57  ;;  %3688 = vmatprep.mubr.msk.bf16.mxu1 %vm3828_vm0, %v5432_v18  ;;  %v2855_v57 = vld [vmem:[#allocation2 + $0xb] sm:$0xff] }
 0x2af   : > { %v3558_v31 = vpop.f32.mrf.mxu1 }
 0x2b0   : > { %v3668_v52 = vpop.f32.mrf.mxu0  ;;  %v2856_v31 = vld [vmem:[#allocation2 + $0x13] sm:$0xff] }
 0x2b1   : > { %v1843_v33 = vpop.f32.mrf.mxu1 }
 0x2b2   : > { %v5063_v35 = vpop.f32.mrf.mxu0  ;;  %1880 = vst.msk [vmem:[#allocation3 + $0x8] sm:$0xff] %vm934_vm2, %v1843_v33 }
 0x2b3   : > { %v3559_v6 = vpop.f32.mrf.mxu1 }
 0x2b4   : > { %v3669_v43 = vpop.f32.mrf.mxu0 }
 0x2b5   : > { %v1848_v42 = vpop.f32.mrf.mxu1  ;;  %3689 = vmatmul.mubr.msk.bf16.vlgmr.msra.gmra.mxu1 %vm934_vm2, %v2589_v11  ;;  %v1997_v41 = vld [vmem:[#allocation3] sm:$0xff]  ;;  %v2865_v43 = vpack.c.bf16 %v2856_v31, %v2855_v57 }
 0x2b6   : > { %v5067_v25 = vpop.f32.mrf.mxu0  ;;  %1881 = vst.msk [vmem:[#allocation3 + $0x10] sm:$0xff] %vm934_vm2, %v1848_v42  ;;  %3731 = vmatpush3.bf16.msra.mxu1 %v2888_v39  ;;  %3692 = vmatprep.mubr.msk.bf16.mxu1 %vm3828_vm0, %v5432_v18 }
 0x2b7   : > { %v3562_v29 = vpop.f32.mrf.mxu1 }
 0x2b8   : > { %v3672_v16 = vpop.f32.mrf.mxu0 }
 0x2b9   : > { %v1851_v30 = vpop.f32.mrf.mxu1  ;;  %v1998_v12 = vld [vmem:[#allocation3 + $0x8] sm:$0xff] }
 0x2ba   : > { %v5073_v10 = vpop.f32.mrf.mxu0  ;;  %1882 = vst.msk [vmem:[#allocation3 + $0x18] sm:$0xff] %vm934_vm2, %v1851_v30  ;;  %v2858_v30 = vld [vmem:[#allocation2 + $0x23] sm:$0xff] }
 0x2bb   : > { %v3563_v47 = vpop.f32.mrf.mxu1  ;;  %v2866_v50 = vpack.c.bf16 %v2858_v30, %v2857_v20 }
 0x2bc   : > { %v3673_v34 = vpop.f32.mrf.mxu0 }
 0x2bd   : > { %v1856_v3 = vpop.f32.mrf.mxu1  ;;  %3693 = vmatmul.mubr.msk.bf16.gmra.mxu1 %vm934_vm2, %v2590_v26  ;;  %v1999_v39 = vld [vmem:[#allocation3 + $0x10] sm:$0xff] }
 0x2be   : > { %v5076_v1 = vpop.f32.mrf.mxu0  ;;  %1883 = vst.msk [vmem:[#allocation3 + $0x20] sm:$0xff] %vm934_vm2, %v1856_v3  ;;  %3696 = vmatprep.mubr.msk.bf16.mxu1 %vm3828_vm0, %v5432_v18 }
 0x2bf   : > { %v3566_v49 = vpop.f32.mrf.mxu1 }
 0x2c0   : > { %v3676_v28 = vpop.f32.mrf.mxu0 }
 0x2c1   : > { %v1859_v32 = vpop.f32.mrf.mxu1  ;;  %v2000_v34 = vld [vmem:[#allocation3 + $0x18] sm:$0xff] }
 0x2c2   : > { %v5082_v9 = vpop.f32.mrf.mxu0  ;;  %1884 = vst.msk [vmem:[#allocation3 + $0x28] sm:$0xff] %vm934_vm2, %v1859_v32 }
 0x2c3   : > { %v3567_v24 = vpop.f32.mrf.mxu1 }
 0x2c4   : > { %v3677_v37 = vpop.f32.mrf.mxu0 }
 0x2c5   : > { %v1864_v54 = vpop.f32.mrf.mxu1  ;;  %3697 = vmatmul.mubr.msk.bf16.gmra.mxu1 %vm934_vm2, %v2591_v14  ;;  %v2001_v32 = vld [vmem:[#allocation3 + $0x20] sm:$0xff] }
 0x2c6   : > { %v5085_v38 = vpop.f32.mrf.mxu0  ;;  %1885 = vst.msk [vmem:[#allocation3 + $0x30] sm:$0xff] %vm934_vm2, %v1864_v54  ;;  %3700 = vmatprep.mubr.msk.bf16.mxu1 %vm3828_vm0, %v5432_v18 }
 0x2c7   : > { %v3570_v44 = vpop.f32.mrf.mxu1 }
 0x2c8   : > { %v3680_v5 = vpop.f32.mrf.mxu0  ;;  %v2859_v44 = vld [vmem:[#allocation2 + $0x2b] sm:$0xff] }
 0x2c9   : > { %v1867_v13 = vpop.f32.mrf.mxu1  ;;  %v2860_v5 = vld [vmem:[#allocation2 + $0x33] sm:$0xff] }
 0x2ca   : > { %v5091_v58 = vpop.f32.mrf.mxu0  ;;  %1886 = vst.msk [vmem:[#allocation3 + $0x38] sm:$0xff] %vm934_vm2, %v1867_v13  ;;  %v2002_v46 = vld [vmem:[#allocation3 + $0x28] sm:$0xff] }
 0x2cb   : > { %v3571_v0 = vpop.f32.mrf.mxu1 }
 0x2cc   : > { %v3681_v59 = vpop.f32.mrf.mxu0 }
 0x2cd   : > { %v1872_v48 = vpop.f32.mrf.mxu1  ;;  %3701 = vmatmul.mubr.msk.bf16.gmra.mxu1 %vm934_vm2, %v2592_v21 }
 0x2ce   : > { %v5094_v45 = vpop.f32.mrf.mxu0  ;;  %1887 = vst.msk [vmem:[#allocation3 + $0x40] sm:$0xff] %vm934_vm2, %v1872_v48  ;;  %3704 = vmatprep.mubr.msk.bf16.mxu1 %vm3828_vm0, %v5432_v18  ;;  %v2867_v48 = vpack.c.bf16 %v2860_v5, %v2859_v44 }
 0x2cf   : > { %v3574_v61 = vpop.f32.mrf.mxu1 }
 0x2d0   : > { %v3684_v63 = vpop.f32.mrf.mxu0 }
 0x2d1   : > { %v1875_v4 = vpop.f32.mrf.mxu1  ;;  %v2003_v63 = vld [vmem:[#allocation3 + $0x30] sm:$0xff] }
 0x2d2   : > { %v5100_v60 = vpop.f32.mrf.mxu0  ;;  %1888 = vst.msk [vmem:[#allocation3 + $0x48] sm:$0xff] %vm934_vm2, %v1875_v4 }
 0x2d3   : > { %v3575_v22 = vpop.f32.mrf.mxu1 }
 0x2d4   : > { %v3685_v15 = vpop.f32.mrf.mxu0 }
 0x2d5   : > { %v1958_v19 = vpop.f32.mrf.mxu1  ;;  %3705 = vmatmul.mubr.msk.bf16.gmra.mxu1 %vm934_vm2, %v2593_v17  ;;  %v2861_v15 = vld [vmem:[#allocation2 + $0x3b] sm:$0xff]  ;;  %v2862_v17 = vld [vmem:[#allocation2 + $0x43] sm:$0xff] }
 0x2d6   : > { %v5104_v23 = vpop.f32.mrf.mxu0  ;;  %v2007_v27 = vadd.f32 %v1997_v41, %v1958_v19  ;;  %3732 = vmatprep.mubr.msk.bf16.mxu1 %vm3828_vm0, %v5432_v18  ;;  %v2004_v41 = vld [vmem:[#allocation3 + $0x38] sm:$0xff]  ;;  %v2868_v31 = vpack.c.bf16 %v2862_v17, %v2861_v15 }
 0x2d7   : > { %v3580_v53 = vpop.f32.mrf.mxu1 }
 0x2d8   : > { %v3712_v40 = vpop.f32.mrf.mxu0  ;;  %2017 = vst.msk [vmem:[#allocation3] sm:$0xff] %vm934_vm2, %v2007_v27 }
 0x2d9   : > { %v1961_v52 = vpop.f32.mrf.mxu1 }
 0x2da   : > { %v5109_v7 = vpop.f32.mrf.mxu0  ;;  %v2008_v62 = vadd.f32 %v1998_v12, %v1961_v52  ;;  %v2005_v12 = vld [vmem:[#allocation3 + $0x40] sm:$0xff] }
 0x2db   : > { %v3581_v33 = vpop.f32.mrf.mxu1 }
 0x2dc   : > { %v3713_v6 = vpop.f32.mrf.mxu0  ;;  %2018 = vst.msk [vmem:[#allocation3 + $0x8] sm:$0xff] %vm934_vm2, %v2008_v62 }
 0x2dd   : > { %v1966_v11 = vpop.f32.mrf.mxu1  ;;  %3733 = vmatmul.mubr.msk.bf16.vlgmr.msra.gmra.mxu1 %vm934_vm2, %v2865_v43 }
 0x2de   : > { %v5112_v42 = vpop.f32.mrf.mxu0  ;;  %v2009_v29 = vadd.f32 %v1999_v39, %v1966_v11  ;;  %3736 = vmatprep.mubr.msk.bf16.mxu1 %vm3828_vm0, %v5432_v18  ;;  %v2863_v11 = vld [vmem:[#allocation2 + $0x4b] sm:$0xff]  ;;  %v2864_v39 = vld [vmem:[#allocation2 + $0x53] sm:$0xff] }
 0x2df   : > { %v3584_v16 = vpop.f32.mrf.mxu1 }
 0x2e0   : > { %v3716_v36 = vpop.f32.mrf.mxu0  ;;  %2019 = vst.msk [vmem:[#allocation3 + $0x10] sm:$0xff] %vm934_vm2, %v2009_v29  ;;  %v2006_v16 = vld [vmem:[#allocation3 + $0x48] sm:$0xff] }
 0x2e1   : > { %v1969_v47 = vpop.f32.mrf.mxu1 }
 0x2e2   : > { %v5118_v26 = vpop.f32.mrf.mxu0  ;;  %v2010_v3 = vadd.f32 %v2000_v34, %v1969_v47  ;;  %v2869_v34 = vpack.c.bf16 %v2864_v39, %v2863_v11 }
 0x2e3   : > { %v3585_v49 = vpop.f32.mrf.mxu1 }
 0x2e4   : > { %v3717_v28 = vpop.f32.mrf.mxu0  ;;  %2020 = vst.msk [vmem:[#allocation3 + $0x18] sm:$0xff] %vm934_vm2, %v2010_v3  ;;  %v2135_v49 = vld [vmem:[#allocation3] sm:$0xff] }
 0x2e5   : > { %v1974_v55 = vpop.f32.mrf.mxu1  ;;  %3737 = vmatmul.mubr.msk.bf16.gmra.mxu1 %vm934_vm2, %v2866_v50 }
 0x2e6   : > { %v5121_v24 = vpop.f32.mrf.mxu0  ;;  %v2011_v37 = vadd.f32 %v2001_v32, %v1974_v55  ;;  %3740 = vmatprep.mubr.msk.bf16.mxu1 %vm3828_vm0, %v5432_v18  ;;  %v2136_v32 = vld [vmem:[#allocation3 + $0x8] sm:$0xff] }
 0x2e7   : > { %v3588_v14 = vpop.f32.mrf.mxu1  ;;  %v2137_v44 = vld [vmem:[#allocation3 + $0x10] sm:$0xff] }
 0x2e8   : > { %v3720_v54 = vpop.f32.mrf.mxu0  ;;  %2021 = vst.msk [vmem:[#allocation3 + $0x20] sm:$0xff] %vm934_vm2, %v2011_v37 }
 0x2e9   : > { %v1977_v8 = vpop.f32.mrf.mxu1 }
 0x2ea   : > { %v5127_v13 = vpop.f32.mrf.mxu0  ;;  %v2012_v0 = vadd.f32 %v2002_v46, %v1977_v8 }
 0x2eb   : > { %v3589_v59 = vpop.f32.mrf.mxu1 }
 0x2ec   : > { %v3721_v21 = vpop.f32.mrf.mxu0  ;;  %2022 = vst.msk [vmem:[#allocation3 + $0x28] sm:$0xff] %vm934_vm2, %v2012_v0  ;;  %v2138_v0 = vld [vmem:[#allocation3 + $0x18] sm:$0xff] }
 0x2ed   : > { %v1982_v61 = vpop.f32.mrf.mxu1  ;;  %3741 = vmatmul.mubr.msk.bf16.gmra.mxu1 %vm934_vm2, %v2867_v48  ;;  %v3052_v48 = vld [vmem:[%s5331_s10] sm:$0xf] }
 0x2ee   : > { %v5130_v2 = vpop.f32.mrf.mxu0  ;;  %v2013_v51 = vadd.f32 %v2003_v63, %v1982_v61  ;;  %3744 = vmatprep.mubr.msk.bf16.mxu1 %vm3828_vm0, %v5432_v18 }
 0x2ef   : > { %v3592_v4 = vpop.f32.mrf.mxu1  ;;  %v2139_v63 = vld [vmem:[#allocation3 + $0x20] sm:$0xff] }
 0x2f0   : > { %v3724_v22 = vpop.f32.mrf.mxu0  ;;  %2023 = vst.msk [vmem:[#allocation3 + $0x30] sm:$0xff] %vm934_vm2, %v2013_v51  ;;  %v3069_v51 = vsel %vm1802_vm3, %v3052_v48, 0 }
 0x2f1   : > { %v1985_v19 = vpop.f32.mrf.mxu1  ;;  %3753 = vmatpush3.bf16.msra.mxu0 %v3069_v51 }
 0x2f2   : > { %v5136_v27 = vpop.f32.mrf.mxu0  ;;  %v2014_v53 = vadd.f32 %v2004_v41, %v1985_v19 }
 0x2f3   : > { %v3593_v40 = vpop.f32.mrf.mxu1  ;;  %v2140_v17 = vld [vmem:[#allocation3 + $0x28] sm:$0xff] }
 0x2f4   : > { %v3725_v57 = vpop.f32.mrf.mxu0  ;;  %2024 = vst.msk [vmem:[#allocation3 + $0x38] sm:$0xff] %vm934_vm2, %v2014_v53 }
 0x2f5   : > { %v1990_v52 = vpop.f32.mrf.mxu1  ;;  %3745 = vmatmul.mubr.msk.bf16.gmra.mxu1 %vm934_vm2, %v2868_v31 }
 0x2f6   : > { %v5139_v62 = vpop.f32.mrf.mxu0  ;;  %v2015_v33 = vadd.f32 %v2005_v12, %v1990_v52  ;;  %3748 = vmatprep.mubr.msk.bf16.mxu1 %vm3828_vm0, %v5432_v18 }
 0x2f7   : > { %v3596_v6 = vpop.f32.mrf.mxu1  ;;  %v2141_v40 = vld [vmem:[#allocation3 + $0x30] sm:$0xff] }
 0x2f8   : > { %v3728_v43 = vpop.f32.mrf.mxu0  ;;  %2025 = vst.msk [vmem:[#allocation3 + $0x40] sm:$0xff] %vm934_vm2, %v2015_v33 }
 0x2f9   : > { %v1993_v29 = vpop.f32.mrf.mxu1 }
 0x2fa   : > { %v5145_v36 = vpop.f32.mrf.mxu0  ;;  %v2016_v20 = vadd.f32 %v2006_v16, %v1993_v29 }
 0x2fb   : > { %v3597_v30 = vpop.f32.mrf.mxu1  ;;  %v2142_v12 = vld [vmem:[#allocation3 + $0x38] sm:$0xff] }
 0x2fc   : > { %v3729_v47 = vpop.f32.mrf.mxu0  ;;  %2026 = vst.msk [vmem:[#allocation3 + $0x48] sm:$0xff] %vm934_vm2, %v2016_v20 }
 0x2fd   : > { %v2096_v3 = vpop.f32.mrf.mxu1  ;;  %3749 = vmatmul.mubr.msk.bf16.gmra.mxu1 %vm934_vm2, %v2869_v34 }
 0x2fe   : > { %v2145_v28 = vadd.f32 %v2135_v49, %v2096_v3 }
 0x2ff   : > { %v3602_v50 = vpop.f32.mrf.mxu1  ;;  %v2143_v11 = vld [vmem:[#allocation3 + $0x40] sm:$0xff] }
 0x300   : > { %2155 = vst.msk [vmem:[#allocation3] sm:$0xff] %vm934_vm2, %v2145_v28 }
 0x301   : > { %v2099_v55 = vpop.f32.mrf.mxu1 }
 0x302   : > { %v2146_v37 = vadd.f32 %v2136_v32, %v2099_v55 }
 0x303   : > { %v3603_v14 = vpop.f32.mrf.mxu1  ;;  %v2144_v20 = vld [vmem:[#allocation3 + $0x48] sm:$0xff] }
 0x304   : > { %2156 = vst.msk [vmem:[#allocation3 + $0x8] sm:$0xff] %vm934_vm2, %v2146_v37 }
 0x305   : > { %v2104_v54 = vpop.f32.mrf.mxu1 }
 0x306   : > { %v2147_v5 = vadd.f32 %v2137_v44, %v2104_v54 }
 0x307   : > { %v3606_v8 = vpop.f32.mrf.mxu1  ;;  %v2273_v3 = vld [vmem:[#allocation3] sm:$0xff] }
 0x308   : > { %2157 = vst.msk [vmem:[#allocation3 + $0x10] sm:$0xff] %vm934_vm2, %v2147_v5 }
 0x309   : > { %v2107_v46 = vpop.f32.mrf.mxu1 }
 0x30a   : > { %v2148_v59 = vadd.f32 %v2138_v0, %v2107_v46 }
 0x30b   : > { %v3607_v21 = vpop.f32.mrf.mxu1  ;;  %v2274_v55 = vld [vmem:[#allocation3 + $0x8] sm:$0xff] }
 0x30c   : > { %2158 = vst.msk [vmem:[#allocation3 + $0x18] sm:$0xff] %vm934_vm2, %v2148_v59 }
 0x30d   : > { %v2112_v61 = vpop.f32.mrf.mxu1 }
 0x30e   : > { %v2149_v4 = vadd.f32 %v2139_v63, %v2112_v61 }
 0x30f   : > { %v3610_v22 = vpop.f32.mrf.mxu1  ;;  %v2275_v54 = vld [vmem:[#allocation3 + $0x10] sm:$0xff] }
 0x310   : > { %2159 = vst.msk [vmem:[#allocation3 + $0x20] sm:$0xff] %vm934_vm2, %v2149_v4 }
 0x311   : > { %v2115_v15 = vpop.f32.mrf.mxu1 }
 0x312   : > { %v2150_v19 = vadd.f32 %v2140_v17, %v2115_v15 }
 0x313   : > { %v3611_v41 = vpop.f32.mrf.mxu1  ;;  %v2276_v46 = vld [vmem:[#allocation3 + $0x18] sm:$0xff] }
 0x314   : > { %2160 = vst.msk [vmem:[#allocation3 + $0x28] sm:$0xff] %vm934_vm2, %v2150_v19 }
 0x315   : > { %v2120_v53 = vpop.f32.mrf.mxu1 }
 0x316   : > { %v2151_v57 = vadd.f32 %v2141_v40, %v2120_v53 }
 0x317   : > { %v3614_v31 = vpop.f32.mrf.mxu1  ;;  %v2277_v48 = vld [vmem:[#allocation3 + $0x20] sm:$0xff] }
 0x318   : > { %2161 = vst.msk [vmem:[#allocation3 + $0x30] sm:$0xff] %vm934_vm2, %v2151_v57 }
 0x319   : > { %v2123_v52 = vpop.f32.mrf.mxu1 }
 0x31a   : > { %v2152_v33 = vadd.f32 %v2142_v12, %v2123_v52 }
 0x31b   : > { %v3615_v6 = vpop.f32.mrf.mxu1  ;;  %v2278_v4 = vld [vmem:[#allocation3 + $0x28] sm:$0xff] }
 0x31c   : > { %2162 = vst.msk [vmem:[#allocation3 + $0x38] sm:$0xff] %vm934_vm2, %v2152_v33 }
 0x31d   : > { %v2128_v43 = vpop.f32.mrf.mxu1 }
 0x31e   : > { %v2153_v39 = vadd.f32 %v2143_v11, %v2128_v43 }
 0x31f   : > { %v3618_v29 = vpop.f32.mrf.mxu1  ;;  %v2279_v19 = vld [vmem:[#allocation3 + $0x30] sm:$0xff] }
 0x320   : > { %2163 = vst.msk [vmem:[#allocation3 + $0x40] sm:$0xff] %vm934_vm2, %v2153_v39 }
 0x321   : > { %v2131_v16 = vpop.f32.mrf.mxu1 }
 0x322   : > { %v2154_v30 = vadd.f32 %v2144_v20, %v2131_v16 }
 0x323   : > { %v3619_v47 = vpop.f32.mrf.mxu1  ;;  %v2280_v57 = vld [vmem:[#allocation3 + $0x38] sm:$0xff] }
 0x324   : > { %2164 = vst.msk [vmem:[#allocation3 + $0x48] sm:$0xff] %vm934_vm2, %v2154_v30 }
 0x325   : > { %v2234_v34 = vpop.f32.mrf.mxu1 }
 0x326   : > { %v2283_v49 = vadd.f32 %v2273_v3, %v2234_v34 }
 0x327   : > { %v3624_v28 = vpop.f32.mrf.mxu1  ;;  %v2281_v33 = vld [vmem:[#allocation3 + $0x40] sm:$0xff] }
 0x328   : > { %2293 = vst.msk [vmem:[#allocation3] sm:$0xff] %vm934_vm2, %v2283_v49 }
 0x329   : > { %v2237_v50 = vpop.f32.mrf.mxu1 }
 0x32a   : > { %v2284_v32 = vadd.f32 %v2274_v55, %v2237_v50 }
 0x32b   : > { %v3625_v37 = vpop.f32.mrf.mxu1  ;;  %v2282_v39 = vld [vmem:[#allocation3 + $0x48] sm:$0xff] }
 0x32c   : > { %2294 = vst.msk [vmem:[#allocation3 + $0x8] sm:$0xff] %vm934_vm2, %v2284_v32 }
 0x32d   : > { %v2242_v14 = vpop.f32.mrf.mxu1 }
 0x32e   : > { %v2285_v44 = vadd.f32 %v2275_v54, %v2242_v14 }
 0x32f   : > { %v3628_v5 = vpop.f32.mrf.mxu1  ;;  %v2411_v30 = vld [vmem:[#allocation3] sm:$0xff] }
 0x330   : > { %2295 = vst.msk [vmem:[#allocation3 + $0x10] sm:$0xff] %vm934_vm2, %v2285_v44 }
 0x331   : > { %v2245_v8 = vpop.f32.mrf.mxu1 }
 0x332   : > { %v2286_v0 = vadd.f32 %v2276_v46, %v2245_v8 }
 0x333   : > { %v3629_v59 = vpop.f32.mrf.mxu1  ;;  %v2412_v49 = vld [vmem:[#allocation3 + $0x8] sm:$0xff] }
 0x334   : > { %2296 = vst.msk [vmem:[#allocation3 + $0x18] sm:$0xff] %vm934_vm2, %v2286_v0 }
 0x335   : > { %v2250_v21 = vpop.f32.mrf.mxu1 }
 0x336   : > { %v2287_v61 = vadd.f32 %v2277_v48, %v2250_v21 }
 0x337   : > { %v3632_v63 = vpop.f32.mrf.mxu1  ;;  %v2413_v32 = vld [vmem:[#allocation3 + $0x10] sm:$0xff] }
 0x338   : > { %2297 = vst.msk [vmem:[#allocation3 + $0x20] sm:$0xff] %vm934_vm2, %v2287_v61 }
 0x339   : > { %v2253_v51 = vpop.f32.mrf.mxu1 }
 0x33a   : > { %v2288_v22 = vadd.f32 %v2278_v4, %v2253_v51 }
 0x33b   : > { %v3633_v15 = vpop.f32.mrf.mxu1  ;;  %v2414_v8 = vld [vmem:[#allocation3 + $0x18] sm:$0xff] }
 0x33c   : > { %2298 = vst.msk [vmem:[#allocation3 + $0x28] sm:$0xff] %vm934_vm2, %v2288_v22 }
 0x33d   : > { %v2258_v17 = vpop.f32.mrf.mxu1 }
 0x33e   : > { %v2289_v41 = vadd.f32 %v2279_v19, %v2258_v17 }
 0x33f   : > { %v3636_v53 = vpop.f32.mrf.mxu1  ;;  %v2415_v61 = vld [vmem:[#allocation3 + $0x20] sm:$0xff] }
 0x340   : > { %2299 = vst.msk [vmem:[#allocation3 + $0x30] sm:$0xff] %vm934_vm2, %v2289_v41 }
 0x341   : > { %v2261_v40 = vpop.f32.mrf.mxu1 }
 0x342   : > { %v2290_v31 = vadd.f32 %v2280_v57, %v2261_v40 }
 0x343   : > { %v3637_v52 = vpop.f32.mrf.mxu1  ;;  %v2416_v15 = vld [vmem:[#allocation3 + $0x28] sm:$0xff] }
 0x344   : > { %2300 = vst.msk [vmem:[#allocation3 + $0x38] sm:$0xff] %vm934_vm2, %v2290_v31 }
 0x345   : > { %v2266_v12 = vpop.f32.mrf.mxu1 }
 0x346   : > { %v2291_v6 = vadd.f32 %v2281_v33, %v2266_v12 }
 0x347   : > { %v3640_v43 = vpop.f32.mrf.mxu1  ;;  %v2417_v40 = vld [vmem:[#allocation3 + $0x30] sm:$0xff] }
 0x348   : > { %2301 = vst.msk [vmem:[#allocation3 + $0x40] sm:$0xff] %vm934_vm2, %v2291_v6 }
 0x349   : > { %v2269_v11 = vpop.f32.mrf.mxu1 }
 0x34a   : > { %v2292_v29 = vadd.f32 %v2282_v39, %v2269_v11 }
 0x34b   : > { %v3641_v16 = vpop.f32.mrf.mxu1  ;;  %v2418_v33 = vld [vmem:[#allocation3 + $0x38] sm:$0xff] }
 0x34c   : > { %2302 = vst.msk [vmem:[#allocation3 + $0x48] sm:$0xff] %vm934_vm2, %v2292_v29 }
 0x34d   : > { %v2372_v20 = vpop.f32.mrf.mxu1 }
 0x34e   : > { %v2421_v47 = vadd.f32 %v2411_v30, %v2372_v20 }
 0x34f   : > { %v3646_v34 = vpop.f32.mrf.mxu1  ;;  %v2419_v29 = vld [vmem:[#allocation3 + $0x40] sm:$0xff] }
 0x350   : > { %2431 = vst.msk [vmem:[#allocation3] sm:$0xff] %vm934_vm2, %v2421_v47 }
 0x351   : > { %v2375_v3 = vpop.f32.mrf.mxu1 }
 0x352   : > { %v2422_v28 = vadd.f32 %v2412_v49, %v2375_v3 }
 0x353   : > { %v3647_v50 = vpop.f32.mrf.mxu1  ;;  %v2420_v34 = vld [vmem:[#allocation3 + $0x48] sm:$0xff] }
 0x354   : > { %2432 = vst.msk [vmem:[#allocation3 + $0x8] sm:$0xff] %vm934_vm2, %v2422_v28 }
 0x355   : > { %v2380_v55 = vpop.f32.mrf.mxu1 }
 0x356   : > { %v2423_v37 = vadd.f32 %v2413_v32, %v2380_v55 }
 0x357   : > { %v3650_v14 = vpop.f32.mrf.mxu1  ;;  %v2549_v54 = vld [vmem:[#allocation3] sm:$0xff] }
 0x358   : > { %2433 = vst.msk [vmem:[#allocation3 + $0x10] sm:$0xff] %vm934_vm2, %v2423_v37  ;;  %v2559_v44 = vadd.f32 %v2549_v54, %v5055_v56 }
 0x359   : > { %v2383_v5 = vpop.f32.mrf.mxu1 }
 0x35a   : > { %v2424_v46 = vadd.f32 %v2414_v8, %v2383_v5  ;;  %2569 = vst.msk [vmem:[#allocation3] sm:$0xff] %vm934_vm2, %v2559_v44 }
 0x35b   : > { %v3651_v0 = vpop.f32.mrf.mxu1  ;;  %v2550_v59 = vld [vmem:[#allocation3 + $0x8] sm:$0xff] }
 0x35c   : > { %2434 = vst.msk [vmem:[#allocation3 + $0x18] sm:$0xff] %vm934_vm2, %v2424_v46  ;;  %v2560_v21 = vadd.f32 %v2550_v59, %v5063_v35 }
 0x35d   : > { %v2388_v48 = vpop.f32.mrf.mxu1 }
 0x35e   : > { %v2425_v63 = vadd.f32 %v2415_v61, %v2388_v48  ;;  %2570 = vst.msk [vmem:[#allocation3 + $0x8] sm:$0xff] %vm934_vm2, %v2560_v21 }
 0x35f   : > { %v3654_v51 = vpop.f32.mrf.mxu1  ;;  %v2551_v4 = vld [vmem:[#allocation3 + $0x10] sm:$0xff] }
 0x360   : > { %2435 = vst.msk [vmem:[#allocation3 + $0x20] sm:$0xff] %vm934_vm2, %v2425_v63  ;;  %v2561_v56 = vadd.f32 %v2551_v4, %v5067_v25 }
 0x361   : > { %v2391_v22 = vpop.f32.mrf.mxu1  ;;  %v2687_v55 = vld [vmem:[#allocation3] sm:$0xff] }
 0x362   : > { %v2426_v17 = vadd.f32 %v2416_v15, %v2391_v22  ;;  %2571 = vst.msk [vmem:[#allocation3 + $0x10] sm:$0xff] %vm934_vm2, %v2561_v56 }
 0x363   : > { %v3655_v19 = vpop.f32.mrf.mxu1  ;;  %v2552_v41 = vld [vmem:[#allocation3 + $0x18] sm:$0xff] }
 0x364   : > { %2436 = vst.msk [vmem:[#allocation3 + $0x28] sm:$0xff] %vm934_vm2, %v2426_v17  ;;  %v2562_v35 = vadd.f32 %v2552_v41, %v5073_v10 }
 0x365   : > { %v2396_v53 = vpop.f32.mrf.mxu1  ;;  %v2688_v44 = vld [vmem:[#allocation3 + $0x8] sm:$0xff] }
 0x366   : > { %v2427_v57 = vadd.f32 %v2417_v40, %v2396_v53  ;;  %2572 = vst.msk [vmem:[#allocation3 + $0x18] sm:$0xff] %vm934_vm2, %v2562_v35 }
 0x367   : > { %v3658_v31 = vpop.f32.mrf.mxu1  ;;  %v2553_v52 = vld [vmem:[#allocation3 + $0x20] sm:$0xff] }
 0x368   : > { %2437 = vst.msk [vmem:[#allocation3 + $0x30] sm:$0xff] %vm934_vm2, %v2427_v57  ;;  %v2563_v25 = vadd.f32 %v2553_v52, %v5076_v1 }
 0x369   : > { %v2399_v12 = vpop.f32.mrf.mxu1  ;;  %v2689_v59 = vld [vmem:[#allocation3 + $0x10] sm:$0xff] }
 0x36a   : > { %v2428_v6 = vadd.f32 %v2418_v33, %v2399_v12  ;;  %2573 = vst.msk [vmem:[#allocation3 + $0x20] sm:$0xff] %vm934_vm2, %v2563_v25 }
 0x36b   : > { %v3659_v43 = vpop.f32.mrf.mxu1  ;;  %v2554_v11 = vld [vmem:[#allocation3 + $0x28] sm:$0xff] }
 0x36c   : > { %2438 = vst.msk [vmem:[#allocation3 + $0x38] sm:$0xff] %vm934_vm2, %v2428_v6  ;;  %v2564_v10 = vadd.f32 %v2554_v11, %v5082_v9 }
 0x36d   : > { %v2404_v39 = vpop.f32.mrf.mxu1  ;;  %v2690_v51 = vld [vmem:[#allocation3 + $0x18] sm:$0xff] }
 0x36e   : > { %v2429_v16 = vadd.f32 %v2419_v29, %v2404_v39  ;;  %2574 = vst.msk [vmem:[#allocation3 + $0x28] sm:$0xff] %vm934_vm2, %v2564_v10 }
 0x36f   : > { %v3662_v20 = vpop.f32.mrf.mxu1  ;;  %v2555_v30 = vld [vmem:[#allocation3 + $0x30] sm:$0xff] }
 0x370   : > { %2439 = vst.msk [vmem:[#allocation3 + $0x40] sm:$0xff] %vm934_vm2, %v2429_v16  ;;  %v2565_v1 = vadd.f32 %v2555_v30, %v5085_v38 }
 0x371   : > { %v2407_v47 = vpop.f32.mrf.mxu1  ;;  %v2691_v17 = vld [vmem:[#allocation3 + $0x20] sm:$0xff] }
 0x372   : > { %v2430_v3 = vadd.f32 %v2420_v34, %v2407_v47  ;;  %2575 = vst.msk [vmem:[#allocation3 + $0x30] sm:$0xff] %vm934_vm2, %v2565_v1 }
 0x373   : > { %v3663_v49 = vpop.f32.mrf.mxu1  ;;  %v2556_v28 = vld [vmem:[#allocation3 + $0x38] sm:$0xff] }
 0x374   : > { %2440 = vst.msk [vmem:[#allocation3 + $0x48] sm:$0xff] %vm934_vm2, %v2430_v3  ;;  %v2566_v9 = vadd.f32 %v2556_v28, %v5091_v58 }
 0x375   : > { %v2648_v50 = vpop.f32.mrf.mxu1  ;;  %v2692_v40 = vld [vmem:[#allocation3 + $0x28] sm:$0xff] }
 0x376   : > { %v2697_v32 = vadd.f32 %v2687_v55, %v2648_v50  ;;  %2576 = vst.msk [vmem:[#allocation3 + $0x38] sm:$0xff] %vm934_vm2, %v2566_v9 }
 0x377   : > { %v3690_v37 = vpop.f32.mrf.mxu1  ;;  %v2557_v14 = vld [vmem:[#allocation3 + $0x40] sm:$0xff] }
 0x378   : > { %2707 = vst.msk [vmem:[#allocation3] sm:$0xff] %vm934_vm2, %v2697_v32  ;;  %v2567_v38 = vadd.f32 %v2557_v14, %v5094_v45 }
 0x379   : > { %v2651_v54 = vpop.f32.mrf.mxu1  ;;  %v2693_v12 = vld [vmem:[#allocation3 + $0x30] sm:$0xff] }
 0x37a   : > { %v2698_v5 = vadd.f32 %v2688_v44, %v2651_v54  ;;  %2577 = vst.msk [vmem:[#allocation3 + $0x40] sm:$0xff] %vm934_vm2, %v2567_v38 }
 0x37b   : > { %v3691_v8 = vpop.f32.mrf.mxu1  ;;  %v2558_v46 = vld [vmem:[#allocation3 + $0x48] sm:$0xff] }
 0x37c   : > { %2708 = vst.msk [vmem:[#allocation3 + $0x8] sm:$0xff] %vm934_vm2, %v2698_v5  ;;  %v2568_v58 = vadd.f32 %v2558_v46, %v5100_v60 }
 0x37d   : > { %v2656_v0 = vpop.f32.mrf.mxu1  ;;  %v2694_v10 = vld [vmem:[#allocation3 + $0x38] sm:$0xff] }
 0x37e   : > { %v2699_v21 = vadd.f32 %v2689_v59, %v2656_v0  ;;  %2578 = vst.msk [vmem:[#allocation3 + $0x48] sm:$0xff] %vm934_vm2, %v2568_v58  ;;  %v5237_v59 = vld [vmem:[%s5329_s8] ss:$0 sm:$0xff] }
 0x37f   : > { %v3694_v48 = vpop.f32.mrf.mxu1  ;;  %v2825_v61 = vld [vmem:[#allocation3] sm:$0xff] }
 0x380   : > { %2709 = vst.msk [vmem:[#allocation3 + $0x10] sm:$0xff] %vm934_vm2, %v2699_v21  ;;  %v2835_v45 = vadd.f32 %v2825_v61, %v5104_v23 }
 0x381   : > { %v2659_v63 = vpop.f32.mrf.mxu1  ;;  %v2695_v30 = vld [vmem:[#allocation3 + $0x40] sm:$0xff] }
 0x382   : > { %v2700_v4 = vadd.f32 %v2690_v51, %v2659_v63  ;;  %2845 = vst.msk [vmem:[#allocation3] sm:$0xff] %vm934_vm2, %v2835_v45 }
 0x383   : > { %v3695_v56 = vpop.f32.mrf.mxu1  ;;  %v2826_v22 = vld [vmem:[#allocation3 + $0x8] sm:$0xff] }
 0x384   : > { %2710 = vst.msk [vmem:[#allocation3 + $0x18] sm:$0xff] %vm934_vm2, %v2700_v4  ;;  %v2836_v60 = vadd.f32 %v2826_v22, %v5109_v7 }
 0x385   : > { %v2664_v15 = vpop.f32.mrf.mxu1  ;;  %v2696_v49 = vld [vmem:[#allocation3 + $0x48] sm:$0xff] }
 0x386   : > { %v2701_v19 = vadd.f32 %v2691_v17, %v2664_v15  ;;  %2846 = vst.msk [vmem:[#allocation3 + $0x8] sm:$0xff] %vm934_vm2, %v2836_v60 }
 0x387   : > { %v3698_v41 = vpop.f32.mrf.mxu1  ;;  %v2827_v35 = vld [vmem:[#allocation3 + $0x10] sm:$0xff] }
 0x388   : > { %2711 = vst.msk [vmem:[#allocation3 + $0x20] sm:$0xff] %vm934_vm2, %v2701_v19  ;;  %v2837_v23 = vadd.f32 %v2827_v35, %v5112_v42 }
 0x389   : > { %v2667_v53 = vpop.f32.mrf.mxu1  ;;  %v2963_v32 = vld [vmem:[#allocation3] sm:$0xff] }
 0x38a   : > { %v2702_v57 = vadd.f32 %v2692_v40, %v2667_v53  ;;  %2847 = vst.msk [vmem:[#allocation3 + $0x10] sm:$0xff] %vm934_vm2, %v2837_v23 }
 0x38b   : > { %v3699_v31 = vpop.f32.mrf.mxu1  ;;  %v2828_v52 = vld [vmem:[#allocation3 + $0x18] sm:$0xff] }
 0x38c   : > { %2712 = vst.msk [vmem:[#allocation3 + $0x28] sm:$0xff] %vm934_vm2, %v2702_v57  ;;  %v2838_v7 = vadd.f32 %v2828_v52, %v5118_v26 }
 0x38d   : > { %v2672_v25 = vpop.f32.mrf.mxu1  ;;  %v2964_v44 = vld [vmem:[#allocation3 + $0x8] sm:$0xff] }
 0x38e   : > { %v2703_v33 = vadd.f32 %v2693_v12, %v2672_v25  ;;  %2848 = vst.msk [vmem:[#allocation3 + $0x18] sm:$0xff] %vm934_vm2, %v2838_v7 }
 0x38f   : > { %v3702_v6 = vpop.f32.mrf.mxu1  ;;  %v2829_v43 = vld [vmem:[#allocation3 + $0x20] sm:$0xff] }
 0x390   : > { %2713 = vst.msk [vmem:[#allocation3 + $0x30] sm:$0xff] %vm934_vm2, %v2703_v33  ;;  %v2839_v42 = vadd.f32 %v2829_v43, %v5121_v24 }
 0x391   : > { %v2675_v11 = vpop.f32.mrf.mxu1  ;;  %v2965_v0 = vld [vmem:[#allocation3 + $0x10] sm:$0xff] }
 0x392   : > { %v2704_v39 = vadd.f32 %v2694_v10, %v2675_v11  ;;  %2849 = vst.msk [vmem:[#allocation3 + $0x20] sm:$0xff] %vm934_vm2, %v2839_v42 }
 0x393   : > { %v3703_v29 = vpop.f32.mrf.mxu1  ;;  %v2830_v16 = vld [vmem:[#allocation3 + $0x28] sm:$0xff] }
 0x394   : > { %2714 = vst.msk [vmem:[#allocation3 + $0x38] sm:$0xff] %vm934_vm2, %v2704_v39  ;;  %v2840_v26 = vadd.f32 %v2830_v16, %v5127_v13 }
 0x395   : > { %v2680_v20 = vpop.f32.mrf.mxu1  ;;  %v2966_v63 = vld [vmem:[#allocation3 + $0x18] sm:$0xff] }
 0x396   : > { %v2705_v1 = vadd.f32 %v2695_v30, %v2680_v20  ;;  %2850 = vst.msk [vmem:[#allocation3 + $0x28] sm:$0xff] %vm934_vm2, %v2840_v26 }
 0x397   : > { %v3706_v47 = vpop.f32.mrf.mxu1  ;;  %v2831_v34 = vld [vmem:[#allocation3 + $0x30] sm:$0xff] }
 0x398   : > { %2715 = vst.msk [vmem:[#allocation3 + $0x40] sm:$0xff] %vm934_vm2, %v2705_v1  ;;  %v2841_v24 = vadd.f32 %v2831_v34, %v5130_v2 }
 0x399   : > { %v2683_v3 = vpop.f32.mrf.mxu1  ;;  %v2967_v17 = vld [vmem:[#allocation3 + $0x20] sm:$0xff] }
 0x39a   : > { %v2706_v28 = vadd.f32 %v2696_v49, %v2683_v3  ;;  %2851 = vst.msk [vmem:[#allocation3 + $0x30] sm:$0xff] %vm934_vm2, %v2841_v24 }
 0x39b   : > { %v3707_v9 = vpop.f32.mrf.mxu1  ;;  %v2832_v50 = vld [vmem:[#allocation3 + $0x38] sm:$0xff] }
 0x39c   : > { %2716 = vst.msk [vmem:[#allocation3 + $0x48] sm:$0xff] %vm934_vm2, %v2706_v28  ;;  %v2842_v13 = vadd.f32 %v2832_v50, %v5136_v27 }
 0x39d   : > { %v2924_v55 = vpop.f32.mrf.mxu1  ;;  %v2968_v52 = vld [vmem:[#allocation3 + $0x28] sm:$0xff] }
 0x39e   : > { %v2973_v37 = vadd.f32 %v2963_v32, %v2924_v55  ;;  %2852 = vst.msk [vmem:[#allocation3 + $0x38] sm:$0xff] %vm934_vm2, %v2842_v13 }
 0x39f   : > { %v3734_v14 = vpop.f32.mrf.mxu1  ;;  %v2833_v38 = vld [vmem:[#allocation3 + $0x40] sm:$0xff] }
 0x3a0   : > { %2983 = vst.msk [vmem:[#allocation3] sm:$0xff] %vm934_vm2, %v2973_v37  ;;  %v2843_v2 = vadd.f32 %v2833_v38, %v5139_v62 }
 0x3a1   : > { %v2927_v54 = vpop.f32.mrf.mxu1  ;;  %v2969_v11 = vld [vmem:[#allocation3 + $0x30] sm:$0xff] }
 0x3a2   : > { %v2974_v5 = vadd.f32 %v2964_v44, %v2927_v54  ;;  %2853 = vst.msk [vmem:[#allocation3 + $0x40] sm:$0xff] %vm934_vm2, %v2843_v2 }
 0x3a3   : > { %v3735_v8 = vpop.f32.mrf.mxu1  ;;  %v2834_v46 = vld [vmem:[#allocation3 + $0x48] sm:$0xff] }
 0x3a4   : > { %2984 = vst.msk [vmem:[#allocation3 + $0x8] sm:$0xff] %vm934_vm2, %v2974_v5  ;;  %v2844_v27 = vadd.f32 %v2834_v46, %v5145_v36  ;;  %v5245_v36 = vld [vmem:[%s5330_s9] ss:$0 sm:$0xff] }
 0x3a5   : > { %v2932_v58 = vpop.f32.mrf.mxu1  ;;  %v2970_v47 = vld [vmem:[#allocation3 + $0x38] sm:$0xff] }
 0x3a6   : > { %v2975_v21 = vadd.f32 %v2965_v0, %v2932_v58  ;;  %2854 = vst.msk [vmem:[#allocation3 + $0x48] sm:$0xff] %vm934_vm2, %v2844_v27 }
 0x3a7   : > { %v3738_v62 = vpop.f32.mrf.mxu1  ;;  %v2993_v48 = vld [vmem:[#allocation3] sm:$0xff] }
 0x3a8   : > { %2985 = vst.msk [vmem:[#allocation3 + $0x10] sm:$0xff] %vm934_vm2, %v2975_v21  ;;  %v3010_v61 = vmul.f32 %v5237_v59, %v2993_v48 }
 0x3a9   : > { %v2935_v45 = vpop.f32.mrf.mxu1  ;;  %v2971_v13 = vld [vmem:[#allocation3 + $0x40] sm:$0xff] }
 0x3aa   : > { %v2976_v51 = vadd.f32 %v2966_v63, %v2935_v45  ;;  %v3027_v60 = vadd.f32 %v5245_v36, %v3010_v61 }
 0x3ab   : > { %v3739_v4 = vpop.f32.mrf.mxu1  ;;  %v2994_v56 = vld [vmem:[#allocation3 + $0x8] sm:$0xff] }
 0x3ac   : > { %2986 = vst.msk [vmem:[#allocation3 + $0x18] sm:$0xff] %vm934_vm2, %v2976_v51  ;;  %v3011_v22 = vmul.f32 %v5237_v59, %v2994_v56  ;;  %v3037_v53 = vmax.f32 %v3027_v60, 0.0 }
 0x3ad   : > { %v2940_v15 = vpop.f32.mrf.mxu1  ;;  %v2972_v5 = vld [vmem:[#allocation3 + $0x48] sm:$0xff] }
 0x3ae   : > { %v2977_v19 = vadd.f32 %v2967_v17, %v2940_v15  ;;  %v3028_v41 = vadd.f32 %v5245_v36, %v3011_v22 }
 0x3af   : > { %v3742_v35 = vpop.f32.mrf.mxu1  ;;  %v2995_v23 = vld [vmem:[#allocation3 + $0x10] sm:$0xff] }
 0x3b0   : > { %2987 = vst.msk [vmem:[#allocation3 + $0x20] sm:$0xff] %vm934_vm2, %v2977_v19  ;;  %v3038_v40 = vmax.f32 %v3028_v41, 0.0  ;;  %v3012_v57 = vmul.f32 %v5237_v59, %v2995_v23  ;;  %v3362_v41 = vld [vmem:[%s5332_s11] ss:$0 sm:$0xff] }
 0x3b1   : > { %v2943_v31 = vpop.f32.mrf.mxu1 }
 0x3b2   : > { %v2978_v7 = vadd.f32 %v2968_v52, %v2943_v31  ;;  %v3047_v25 = vpack.c.bf16 %v3038_v40, %v3037_v53  ;;  %v3029_v43 = vadd.f32 %v5245_v36, %v3012_v57 }
 0x3b3   : > { %v3743_v12 = vpop.f32.mrf.mxu1  ;;  %v2996_v33 = vld [vmem:[#allocation3 + $0x18] sm:$0xff] }
 0x3b4   : > { %2988 = vst.msk [vmem:[#allocation3 + $0x28] sm:$0xff] %vm934_vm2, %v2978_v7  ;;  %3755 = vmatmul.mubr.msk.bf16.vlgmr.msra.gmra.mxu0 %vm934_vm2, %v3047_v25  ;;  %v3013_v6 = vmul.f32 %v5237_v59, %v2996_v33  ;;  %v3039_v26 = vmax.f32 %v3029_v43, 0.0 }
 0x3b5   : > { %v2948_v42 = vpop.f32.mrf.mxu1  ;;  %3758 = vmatprep.mubr.msk.bf16.mxu0 %vm3828_vm0, %v5432_v18 }
 0x3b6   : > { %v2979_v10 = vadd.f32 %v2969_v11, %v2948_v42  ;;  %v3030_v39 = vadd.f32 %v5245_v36, %v3013_v6 }
 0x3b7   : > { %v3746_v29 = vpop.f32.mrf.mxu1  ;;  %v2997_v16 = vld [vmem:[#allocation3 + $0x20] sm:$0xff] }
 0x3b8   : > { %2989 = vst.msk [vmem:[#allocation3 + $0x30] sm:$0xff] %vm934_vm2, %v2979_v10  ;;  %v3040_v20 = vmax.f32 %v3030_v39, 0.0  ;;  %v3014_v30 = vmul.f32 %v5237_v59, %v2997_v16 }
 0x3b9   : > { %v2951_v1 = vpop.f32.mrf.mxu1 }
 0x3ba   : > { %v2980_v34 = vadd.f32 %v2970_v47, %v2951_v1  ;;  %v3048_v24 = vpack.c.bf16 %v3040_v20, %v3039_v26  ;;  %v3031_v9 = vadd.f32 %v5245_v36, %v3014_v30 }
 0x3bb   : > { %v3747_v3 = vpop.f32.mrf.mxu1  ;;  %v2998_v49 = vld [vmem:[#allocation3 + $0x28] sm:$0xff] }
 0x3bc   : > { %2990 = vst.msk [vmem:[#allocation3 + $0x38] sm:$0xff] %vm934_vm2, %v2980_v34  ;;  %3759 = vmatmul.mubr.msk.bf16.gmra.mxu0 %vm934_vm2, %v3048_v24  ;;  %v3015_v28 = vmul.f32 %v5237_v59, %v2998_v49  ;;  %v3041_v38 = vmax.f32 %v3031_v9, 0.0 }
 0x3bd   : > { %v2956_v50 = vpop.f32.mrf.mxu1  ;;  %3762 = vmatprep.mubr.msk.bf16.mxu0 %vm3828_vm0, %v5432_v18 }
 0x3be   : > { %v2981_v55 = vadd.f32 %v2971_v13, %v2956_v50  ;;  %v3032_v32 = vadd.f32 %v5245_v36, %v3015_v28 }
 0x3bf   : > { %v3750_v37 = vpop.f32.mrf.mxu1  ;;  %v2999_v14 = vld [vmem:[#allocation3 + $0x30] sm:$0xff] }
 0x3c0   : > { %2991 = vst.msk [vmem:[#allocation3 + $0x40] sm:$0xff] %vm934_vm2, %v2981_v55  ;;  %v3042_v2 = vmax.f32 %v3032_v32, 0.0  ;;  %v3016_v54 = vmul.f32 %v5237_v59, %v2999_v14 }
 0x3c1   : > { %v2959_v44 = vpop.f32.mrf.mxu1 }
 0x3c2   : > { %v2982_v8 = vadd.f32 %v2972_v5, %v2959_v44  ;;  %v3049_v46 = vpack.c.bf16 %v3042_v2, %v3041_v38  ;;  %v3033_v21 = vadd.f32 %v5245_v36, %v3016_v54 }
 0x3c3   : > { %v3751_v27 = vpop.f32.mrf.mxu1  ;;  %v3000_v58 = vld [vmem:[#allocation3 + $0x38] sm:$0xff] }
 0x3c4   : > { %2992 = vst.msk [vmem:[#allocation3 + $0x48] sm:$0xff] %vm934_vm2, %v2982_v8  ;;  %3763 = vmatmul.mubr.msk.bf16.gmra.mxu0 %vm934_vm2, %v3049_v46  ;;  %v3017_v0 = vmul.f32 %v5237_v59, %v3000_v58  ;;  %v3043_v61 = vmax.f32 %v3033_v21, 0.0 }
 0x3c5   : > { %3766 = vmatprep.mubr.msk.bf16.mxu0 %vm3828_vm0, %v5432_v18 }
 0x3c6   : > { %v3034_v62 = vadd.f32 %v5245_v36, %v3017_v0 }
 0x3c7   : > { %v3001_v48 = vld [vmem:[#allocation3 + $0x40] sm:$0xff] }
 0x3c8   : > { %v3044_v45 = vmax.f32 %v3034_v62, 0.0  ;;  %v3018_v63 = vmul.f32 %v5237_v59, %v3001_v48 }
 0x3ca   : > { %v3050_v51 = vpack.c.bf16 %v3044_v45, %v3043_v61  ;;  %v3035_v22 = vadd.f32 %v5245_v36, %v3018_v63 }
 0x3cb   : > { %v3002_v4 = vld [vmem:[#allocation3 + $0x48] sm:$0xff] }
 0x3cc   : > { %3767 = vmatmul.mubr.msk.bf16.gmra.mxu0 %vm934_vm2, %v3050_v51  ;;  %v3019_v56 = vmul.f32 %v5237_v59, %v3002_v4  ;;  %v3045_v15 = vmax.f32 %v3035_v22, 0.0  ;;  %v3363_v59 = vld [vmem:[%s5333_s12] ss:$0 sm:$0xff] }
 0x3cd   : > { %3770 = vmatprep.mubr.msk.bf16.mxu0 %vm3828_vm0, %v5432_v18 }
 0x3ce   : > { %v3036_v60 = vadd.f32 %v5245_v36, %v3019_v56 }
 0x3d0   : > { %v3046_v17 = vmax.f32 %v3036_v60, 0.0 }
 0x3d2   : > { %v3051_v19 = vpack.c.bf16 %v3046_v17, %v3045_v15 }
 0x3d4   : > { %3771 = vmatmul.mubr.msk.bf16.gmra.mxu0 %vm934_vm2, %v3051_v19 }
 0x474   : > { %v3105_v35 = vpop.f32.mrf.mxu0 }
 0x475   : > { %v3151_v23 = vmul.f32 %v3362_v41, %v3105_v35 }
 0x476   : > { %v3756_v18 = vpop.f32.mrf.mxu0 }
 0x477   : > { %v3168_v36 = vadd.f32 %v3363_v59, %v3151_v23 }
 0x478   : > { %v3108_v53 = vpop.f32.mrf.mxu0 }
 0x479   : > { %3179 = vst.msk [vmem:[%s5296_s28] sm:$0xff] %vm3178_vm5, %v3168_v36  ;;  %v3152_v40 = vmul.f32 %v3362_v41, %v3108_v53 }
 0x47a   : > { %v3757_v57 = vpop.f32.mrf.mxu0 }
 0x47b   : > { %v3169_v31 = vadd.f32 %v3363_v59, %v3152_v40 }
 0x47c   : > { %v3113_v52 = vpop.f32.mrf.mxu0 }
 0x47d   : > { %3180 = vst.msk [vmem:[%s5296_s28 + $0x8] sm:$0xff] %vm3178_vm5, %v3169_v31  ;;  %v3153_v7 = vmul.f32 %v3362_v41, %v3113_v52 }
 0x47e   : > { %v3760_v25 = vpop.f32.mrf.mxu0 }
 0x47f   : > { %v3170_v12 = vadd.f32 %v3363_v59, %v3153_v7 }
 0x480   : > { %v3116_v33 = vpop.f32.mrf.mxu0 }
 0x481   : > { %3181 = vst.msk [vmem:[%s5296_s28 + $0x10] sm:$0xff] %vm3178_vm5, %v3170_v12  ;;  %v3154_v6 = vmul.f32 %v3362_v41, %v3116_v33 }
 0x482   : > { %v3761_v43 = vpop.f32.mrf.mxu0 }
 0x483   : > { %v3171_v42 = vadd.f32 %v3363_v59, %v3154_v6 }
 0x484   : > { %v3121_v11 = vpop.f32.mrf.mxu0 }
 0x485   : > { %3182 = vst.msk [vmem:[%s5296_s28 + $0x18] sm:$0xff] %vm3178_vm5, %v3171_v42  ;;  %v3155_v10 = vmul.f32 %v3362_v41, %v3121_v11 }
 0x486   : > { %v3764_v39 = vpop.f32.mrf.mxu0 }
 0x487   : > { %v3172_v29 = vadd.f32 %v3363_v59, %v3155_v10 }
 0x488   : > { %v3124_v16 = vpop.f32.mrf.mxu0 }
 0x489   : > { %3183 = vst.msk [vmem:[%s5296_s28 + $0x20] sm:$0xff] %vm3178_vm5, %v3172_v29  ;;  %v3156_v26 = vmul.f32 %v3362_v41, %v3124_v16 }
 0x48a   : > { %v3765_v20 = vpop.f32.mrf.mxu0 }
 0x48b   : > { %v3173_v30 = vadd.f32 %v3363_v59, %v3156_v26 }
 0x48c   : > { %v3129_v1 = vpop.f32.mrf.mxu0 }
 0x48d   : > { %3184 = vst.msk [vmem:[%s5296_s28 + $0x28] sm:$0xff] %vm3178_vm5, %v3173_v30  ;;  %v3157_v47 = vmul.f32 %v3362_v41, %v3129_v1 }
 0x48e   : > { %v3768_v34 = vpop.f32.mrf.mxu0 }
 0x48f   : > { %v3174_v24 = vadd.f32 %v3363_v59, %v3157_v47 }
 0x490   : > { %v3132_v3 = vpop.f32.mrf.mxu0 }
 0x491   : > { %3185 = vst.msk [vmem:[%s5296_s28 + $0x30] sm:$0xff] %vm3178_vm5, %v3174_v24  ;;  %v3158_v49 = vmul.f32 %v3362_v41, %v3132_v3 }
 0x492   : > { %v3769_v28 = vpop.f32.mrf.mxu0 }
 0x493   : > { %v3175_v9 = vadd.f32 %v3363_v59, %v3158_v49 }
 0x494   : > { %v3137_v50 = vpop.f32.mrf.mxu0 }
 0x495   : > { %3186 = vst.msk [vmem:[%s5296_s28 + $0x38] sm:$0xff] %vm3178_vm5, %v3175_v9  ;;  %v3159_v13 = vmul.f32 %v3362_v41, %v3137_v50 }
 0x496   : > { %v3772_v55 = vpop.f32.mrf.mxu0 }
 0x497   : > { %v3176_v32 = vadd.f32 %v3363_v59, %v3159_v13 }
 0x498   : > { %v3140_v37 = vpop.f32.mrf.mxu0 }
 0x499   : > { %3187 = vst.msk [vmem:[%s5296_s28 + $0x40] sm:$0xff] %vm3178_vm5, %v3176_v32  ;;  %v3160_v14 = vmul.f32 %v3362_v41, %v3140_v37 }
 0x49a   : > { %v3773_v38 = vpop.f32.mrf.mxu0 }
 0x49b   : > { %v3177_v2 = vadd.f32 %v3363_v59, %v3160_v14 }
 0x49d   : > { %3188 = vst.msk [vmem:[%s5296_s28 + $0x48] sm:$0xff] %vm3178_vm5, %v3177_v2 }
 0x49e PF: > { %s23_s25 = sadd.s32 1, %s3825_s25  }
 0x49f   : > { %p20_p4 = scmp.ge.s32.totalorder %s23_s25, 4  }
 0x4a1   :  { %22 = sbr.rel (!%p20_p4) target bundleno = 1 (0x1), region = 110 }

</bundles_post_ra>
